<compile_context>
chip_gen: v5e
topology: v5e:2x2
jax: 0.10.0
libtpu: 0.0.40
codegen_flags: <defaults>
</compile_context>

<pallas_src>
import functools

import numpy as np
import jax
import jax.numpy as jnp
from jax import lax
from jax.experimental import pallas as pl
from jax.experimental.pallas import tpu as pltpu


# ----------------------------------------------------------------------------
# Static shift tables (equivalent of multilayer.__init__).
# ----------------------------------------------------------------------------
def _split_shift(d):
    f = int(np.floor(d))
    return f, float(d - f)


def _shift_tables(angular, n_layers, h, w):
    """Per (angular index, layer) integer/fractional pixel shifts (static)."""
    avals = list(range(-angular // 2 + 1, angular // 2 + 1))
    cvals = list(range(-n_layers // 2 + 1, n_layers // 2 + 1))
    # dy depends on (k, layer); dx depends on (l, layer).
    row = tuple(tuple(_split_shift((-k / h) * c * (h - 1) / 2.0) for c in cvals)
                for k in avals)
    col = tuple(tuple(_split_shift((-l / w) * c * (w - 1) / 2.0) for c in cvals)
                for l in avals)
    return row, col


# ----------------------------------------------------------------------------
# In-kernel helpers: constant-shift resample with border clamp.
# ----------------------------------------------------------------------------
def _edge_shift(x, g, axis):
    """out[..., i, ...] = x[..., clip(i + g, 0, n-1), ...], static integer g."""
    n = x.shape[axis]
    if g == 0:
        return x
    if g >= n:
        return jnp.broadcast_to(lax.slice_in_dim(x, n - 1, n, axis=axis), x.shape)
    if g <= -n:
        return jnp.broadcast_to(lax.slice_in_dim(x, 0, 1, axis=axis), x.shape)
    pad_shape = list(x.shape)
    pad_shape[axis] = abs(g)
    if g > 0:
        body = lax.slice_in_dim(x, g, n, axis=axis)
        edge = jnp.broadcast_to(lax.slice_in_dim(x, n - 1, n, axis=axis),
                                tuple(pad_shape))
        return jnp.concatenate([body, edge], axis=axis)
    body = lax.slice_in_dim(x, 0, n + g, axis=axis)
    edge = jnp.broadcast_to(lax.slice_in_dim(x, 0, 1, axis=axis),
                            tuple(pad_shape))
    return jnp.concatenate([edge, body], axis=axis)


def _shift_blend(x, f, t, axis):
    """1-D bilinear resample by constant shift f + t (0 <= t < 1), border clamp."""
    if t == 0.0:
        return _edge_shift(x, f, axis)
    return (1.0 - t) * _edge_shift(x, f, axis) + t * _edge_shift(x, f + 1, axis)


# ----------------------------------------------------------------------------
# Pallas kernel: one grid step = one batch element n; all A2 views inside.
# ----------------------------------------------------------------------------
def _multilayer_kernel(layers_ref, out_ref, *, row_sh, col_sh, angular,
                       n_layers, rank, chans, reduce_mean):
    inv_rank = 1.0 / rank
    for ki in range(angular):
        # Row (y) pass depends only on (ki, layer): compute once, reuse for
        # the `angular` views sharing this angular row.
        rowshifted = []
        for l in range(n_layers):
            fy, ty = row_sh[ki][l]
            rowshifted.append(_shift_blend(layers_ref[0, l], fy, ty, axis=1))

        for li in range(angular):
            a = ki * angular + li
            prod = None
            for l in range(n_layers):
                fx, tx = col_sh[li][l]
                s = _shift_blend(rowshifted[l], fx, tx, axis=2)
                prod = s if prod is None else prod * s   # (RC, H, W)

            if reduce_mean:
                acc = prod[0:chans]
                for r in range(1, rank):
                    acc = acc + prod[r * chans:(r + 1) * chans]
                out_ref[0, a] = acc * inv_rank           # (C, H, W)
            else:
                out_ref[0, a] = prod                     # (RC, H, W)


# ----------------------------------------------------------------------------
# Wrapper: block specs, grid, pallas_call, output reshape.
# ----------------------------------------------------------------------------
def multilayer_forward(layers, angular, reduce_mean=True):
    """layers: (N, num_layers, rank, C, H, W) float32."""
    N, L, R, C, H, W = layers.shape
    A2 = angular * angular
    RC = R * C

    row_sh, col_sh = _shift_tables(angular, L, H, W)
    layers5 = layers.reshape(N, L, RC, H, W)

    kern = functools.partial(_multilayer_kernel, row_sh=row_sh, col_sh=col_sh,
                             angular=angular, n_layers=L, rank=R, chans=C,
                             reduce_mean=reduce_mean)

    out_ch = C if reduce_mean else RC
    out_shape = jax.ShapeDtypeStruct((N, A2, out_ch, H, W), jnp.float32)
    out_spec = pl.BlockSpec((1, A2, out_ch, H, W), lambda n: (n, 0, 0, 0, 0))
    in_spec = pl.BlockSpec((1, L, RC, H, W), lambda n: (n, 0, 0, 0, 0))

    # Only raise the scoped-VMEM limit if the blocks outgrow the default.
    block_bytes = 4 * (L * RC * H * W + A2 * out_ch * H * W)
    vmem_needed = 2 * block_bytes + (4 << 20)
    cp_kwargs = dict(dimension_semantics=("parallel",))
    if vmem_needed > (16 << 20):
        cp_kwargs["vmem_limit_bytes"] = int(min(vmem_needed, 100 * 1024 * 1024))

    out = pl.pallas_call(
        kern,
        out_shape=out_shape,
        grid=(N,),
        in_specs=[in_spec],
        out_specs=out_spec,
        compiler_params=pltpu.CompilerParams(**cp_kwargs),
    )(layers5)

    if reduce_mean:
        return out                                          # (N, A2, C, H, W)
    # (N, A2, R*C, H, W) -> (N, R, A2, C, H, W)   (matches torch.stack(lf, 2))
    return jnp.transpose(out.reshape(N, A2, R, C, H, W), (0, 2, 1, 3, 4, 5))


# ----------------------------------------------------------------------------
# Pure-numpy reference (direct port of the PyTorch forward, incl. grid_sample
# with bilinear / border / align_corners=True) for correctness checking.
# ----------------------------------------------------------------------------
def _build_filters(angular, n_layers, h, w):
    disp_level_h = -1.0 / h
    disp_level_w = -1.0 / w
    x = np.linspace(-1.0, 1.0, w)
    y = np.linspace(-1.0, 1.0, h)
    xv, yv = np.meshgrid(x, y)
    default_flow = np.zeros((h, w, 2))
    default_flow[..., 0] = xv
    default_flow[..., 1] = yv
    disp_layers = np.zeros((angular ** 2, h, w, 2))
    a = 0
    for k in range(-angular // 2 + 1, angular // 2 + 1):
        for l in range(-angular // 2 + 1, angular // 2 + 1):
            disp_layers[a, :, :, 0] = disp_level_w * l
            disp_layers[a, :, :, 1] = disp_level_h * k
            a += 1
    stacked = np.stack([disp_layers * c
                        for c in range(-n_layers // 2 + 1, n_layers // 2 + 1)], 0)
    stacked = stacked + default_flow[None, None, ...]
    return stacked.astype(np.float32)            # (L, A2, H, W, 2)


def _ref_grid_sample_border(img, grid):
    # img: (C, H, W); grid: (H, W, 2) with (x, y) in [-1, 1].
    C, H, W = img.shape
    ix = np.clip((grid[..., 0] + 1.0) * 0.5 * (W - 1), 0.0, W - 1)
    iy = np.clip((grid[..., 1] + 1.0) * 0.5 * (H - 1), 0.0, H - 1)
    ix0 = np.floor(ix).astype(np.int64)
    iy0 = np.floor(iy).astype(np.int64)
    ix1 = np.clip(ix0 + 1, 0, W - 1)
    iy1 = np.clip(iy0 + 1, 0, H - 1)
    txf = ix - ix0
    tyf = iy - iy0
    v00 = img[:, iy0, ix0]
    v01 = img[:, iy0, ix1]
    v10 = img[:, iy1, ix0]
    v11 = img[:, iy1, ix1]
    return (v00 * (1 - tyf) * (1 - txf) + v01 * (1 - tyf) * txf
            + v10 * tyf * (1 - txf) + v11 * tyf * txf)


def ref_forward(x, angular, reduce_mean=True):
    N, L, R, C, H, W = x.shape
    A2 = angular ** 2
    filters = _build_filters(angular, L, H, W)
    outs = []
    for a in range(A2):
        prod = np.ones((N, R * C, H, W), np.float32)
        for l in range(L):
            layer = x[:, l].reshape(N, R * C, H, W)
            for n in range(N):
                prod[n] = prod[n] * _ref_grid_sample_border(layer[n], filters[l, a])
        prod = prod.reshape(N, R, C, H, W)
        outs.append(prod.mean(1, keepdims=True) if reduce_mean else prod)
    return np.concatenate(outs, 1) if reduce_mean else np.stack(outs, 2)


# ----------------------------------------------------------------------------
if __name__ == "__main__":
    angular = 3       # -> a^2 = 9 angular views
    n_layers = 3
    N, rank, C, H, W = 2, 2, 3, 16, 16

    key = jax.random.PRNGKey(0)
    x = jax.random.uniform(key, (N, n_layers, rank, C, H, W),
                           dtype=jnp.float32, minval=0.5, maxval=1.5)

    # reduce_mean=True path (module default): output (N, a^2, C, H, W)
    out = jax.block_until_ready(multilayer_forward(x, angular, reduce_mean=True))
    ref = ref_forward(np.asarray(x), angular, reduce_mean=True)
    np.testing.assert_allclose(np.asarray(out), ref, rtol=1e-4, atol=1e-4)

    # reduce_mean=False path: output (N, rank, a^2, C, H, W)
    out2 = jax.block_until_ready(multilayer_forward(x, angular, reduce_mean=False))
    ref2 = ref_forward(np.asarray(x), angular, reduce_mean=False)
    np.testing.assert_allclose(np.asarray(out2), ref2, rtol=1e-4, atol=1e-4)

    print("KERNEL_OK")
</pallas_src>

<mosaic_0001>
module attributes {stable_mosaic.version = 11 : i64} {
  func.func @_multilayer_kernel(%arg0: i32, %arg1: memref<1x3x6x16x16xf32, #tpu.memory_space<vmem>>, %arg2: memref<1x9x3x16x16xf32, #tpu.memory_space<vmem>>) attributes {dimension_semantics = [#tpu.dimension_semantics<parallel>], iteration_bounds = array<i64: 2>, scalar_prefetch = 0 : i64, scratch_operands = 0 : i64, tpu.core_type = #tpu.core_type<tc>, window_params = [{transform_indices = @transform_0, window_bounds = array<i64: 1, 3, 6, 16, 16>}, {transform_indices = @transform_1, window_bounds = array<i64: 1, 9, 3, 16, 16>}]} {
    %c0 = arith.constant 0 : index
    %c0_0 = arith.constant 0 : index
    %c0_1 = arith.constant 0 : index
    %c0_2 = arith.constant 0 : index
    %c0_3 = arith.constant 0 : index
    %0 = vector.load %arg1[%c0, %c0_0, %c0_1, %c0_2, %c0_3] : memref<1x3x6x16x16xf32, #tpu.memory_space<vmem>>, vector<1x1x6x16x16xf32>
    %1 = vector.shape_cast %0 : vector<1x1x6x16x16xf32> to vector<6x16x16xf32>
    %2 = vector.extract_strided_slice %1 {offsets = [0, 0, 0], sizes = [6, 15, 16], strides = [1, 1, 1]} : vector<6x16x16xf32> to vector<6x15x16xf32>
    %3 = vector.extract_strided_slice %1 {offsets = [0, 0, 0], sizes = [6, 1, 16], strides = [1, 1, 1]} : vector<6x16x16xf32> to vector<6x1x16xf32>
    %4 = tpu.concatenate %3, %2 in 1 : vector<6x1x16xf32>, vector<6x15x16xf32> -> vector<6x16x16xf32>
    %cst = arith.constant 4.687500e-01 : f32
    %5 = vector.broadcast %cst : f32 to vector<6x16x16xf32>
    %6 = arith.mulf %5, %4 : vector<6x16x16xf32>
    %cst_4 = arith.constant 5.312500e-01 : f32
    %7 = vector.broadcast %cst_4 : f32 to vector<6x16x16xf32>
    %8 = arith.mulf %7, %1 : vector<6x16x16xf32>
    %9 = arith.addf %6, %8 : vector<6x16x16xf32>
    %c0_5 = arith.constant 0 : index
    %c1 = arith.constant 1 : index
    %c0_6 = arith.constant 0 : index
    %c0_7 = arith.constant 0 : index
    %c0_8 = arith.constant 0 : index
    %10 = vector.load %arg1[%c0_5, %c1, %c0_6, %c0_7, %c0_8] : memref<1x3x6x16x16xf32, #tpu.memory_space<vmem>>, vector<1x1x6x16x16xf32>
    %11 = vector.shape_cast %10 : vector<1x1x6x16x16xf32> to vector<6x16x16xf32>
    %c0_9 = arith.constant 0 : index
    %c2 = arith.constant 2 : index
    %c0_10 = arith.constant 0 : index
    %c0_11 = arith.constant 0 : index
    %c0_12 = arith.constant 0 : index
    %12 = vector.load %arg1[%c0_9, %c2, %c0_10, %c0_11, %c0_12] : memref<1x3x6x16x16xf32, #tpu.memory_space<vmem>>, vector<1x1x6x16x16xf32>
    %13 = vector.shape_cast %12 : vector<1x1x6x16x16xf32> to vector<6x16x16xf32>
    %cst_13 = arith.constant 5.312500e-01 : f32
    %14 = vector.broadcast %cst_13 : f32 to vector<6x16x16xf32>
    %15 = arith.mulf %14, %13 : vector<6x16x16xf32>
    %16 = vector.extract_strided_slice %13 {offsets = [0, 1, 0], sizes = [6, 15, 16], strides = [1, 1, 1]} : vector<6x16x16xf32> to vector<6x15x16xf32>
    %17 = vector.extract_strided_slice %13 {offsets = [0, 15, 0], sizes = [6, 1, 16], strides = [1, 1, 1]} : vector<6x16x16xf32> to vector<6x1x16xf32>
    %18 = tpu.concatenate %16, %17 in 1 : vector<6x15x16xf32>, vector<6x1x16xf32> -> vector<6x16x16xf32>
    %cst_14 = arith.constant 4.687500e-01 : f32
    %19 = vector.broadcast %cst_14 : f32 to vector<6x16x16xf32>
    %20 = arith.mulf %19, %18 : vector<6x16x16xf32>
    %21 = arith.addf %15, %20 : vector<6x16x16xf32>
    %22 = vector.extract_strided_slice %9 {offsets = [0, 0, 0], sizes = [6, 16, 15], strides = [1, 1, 1]} : vector<6x16x16xf32> to vector<6x16x15xf32>
    %23 = vector.extract_strided_slice %9 {offsets = [0, 0, 0], sizes = [6, 16, 1], strides = [1, 1, 1]} : vector<6x16x16xf32> to vector<6x16x1xf32>
    %24 = tpu.concatenate %23, %22 in 2 : vector<6x16x1xf32>, vector<6x16x15xf32> -> vector<6x16x16xf32>
    %cst_15 = arith.constant 4.687500e-01 : f32
    %25 = vector.broadcast %cst_15 : f32 to vector<6x16x16xf32>
    %26 = arith.mulf %25, %24 : vector<6x16x16xf32>
    %cst_16 = arith.constant 5.312500e-01 : f32
    %27 = vector.broadcast %cst_16 : f32 to vector<6x16x16xf32>
    %28 = arith.mulf %27, %9 : vector<6x16x16xf32>
    %29 = arith.addf %26, %28 : vector<6x16x16xf32>
    %30 = arith.mulf %29, %11 : vector<6x16x16xf32>
    %cst_17 = arith.constant 5.312500e-01 : f32
    %31 = vector.broadcast %cst_17 : f32 to vector<6x16x16xf32>
    %32 = arith.mulf %31, %21 : vector<6x16x16xf32>
    %33 = vector.extract_strided_slice %21 {offsets = [0, 0, 1], sizes = [6, 16, 15], strides = [1, 1, 1]} : vector<6x16x16xf32> to vector<6x16x15xf32>
    %34 = vector.extract_strided_slice %21 {offsets = [0, 0, 15], sizes = [6, 16, 1], strides = [1, 1, 1]} : vector<6x16x16xf32> to vector<6x16x1xf32>
    %35 = tpu.concatenate %33, %34 in 2 : vector<6x16x15xf32>, vector<6x16x1xf32> -> vector<6x16x16xf32>
    %cst_18 = arith.constant 4.687500e-01 : f32
    %36 = vector.broadcast %cst_18 : f32 to vector<6x16x16xf32>
    %37 = arith.mulf %36, %35 : vector<6x16x16xf32>
    %38 = arith.addf %32, %37 : vector<6x16x16xf32>
    %39 = arith.mulf %30, %38 : vector<6x16x16xf32>
    %40 = vector.extract_strided_slice %39 {offsets = [0, 0, 0], sizes = [3, 16, 16], strides = [1, 1, 1]} : vector<6x16x16xf32> to vector<3x16x16xf32>
    %41 = vector.extract_strided_slice %39 {offsets = [3, 0, 0], sizes = [3, 16, 16], strides = [1, 1, 1]} : vector<6x16x16xf32> to vector<3x16x16xf32>
    %42 = arith.addf %40, %41 : vector<3x16x16xf32>
    %cst_19 = arith.constant 5.000000e-01 : f32
    %43 = vector.broadcast %cst_19 : f32 to vector<3x16x16xf32>
    %44 = arith.mulf %42, %43 : vector<3x16x16xf32>
    %c0_20 = arith.constant 0 : index
    %c0_21 = arith.constant 0 : index
    %c0_22 = arith.constant 0 : index
    %c0_23 = arith.constant 0 : index
    %c0_24 = arith.constant 0 : index
    %45 = vector.load %arg2[%c0_20, %c0_21, %c0_22, %c0_23, %c0_24] : memref<1x9x3x16x16xf32, #tpu.memory_space<vmem>>, vector<1x1x3x16x16xf32>
    %46 = vector.shape_cast %45 : vector<1x1x3x16x16xf32> to vector<3x16x16xf32>
    %47 = vector.shape_cast %44 : vector<3x16x16xf32> to vector<1x1x3x16x16xf32>
    tpu.vector_store %arg2[%c0_20, %c0_21, %c0_22, %c0_23, %c0_24], %47 {strides = array<i32>} : memref<1x9x3x16x16xf32, #tpu.memory_space<vmem>>, vector<1x1x3x16x16xf32>,
    %48 = arith.mulf %9, %11 : vector<6x16x16xf32>
    %49 = arith.mulf %48, %21 : vector<6x16x16xf32>
    %50 = vector.extract_strided_slice %49 {offsets = [0, 0, 0], sizes = [3, 16, 16], strides = [1, 1, 1]} : vector<6x16x16xf32> to vector<3x16x16xf32>
    %51 = vector.extract_strided_slice %49 {offsets = [3, 0, 0], sizes = [3, 16, 16], strides = [1, 1, 1]} : vector<6x16x16xf32> to vector<3x16x16xf32>
    %52 = arith.addf %50, %51 : vector<3x16x16xf32>
    %cst_25 = arith.constant 5.000000e-01 : f32
    %53 = vector.broadcast %cst_25 : f32 to vector<3x16x16xf32>
    %54 = arith.mulf %52, %53 : vector<3x16x16xf32>
    %c0_26 = arith.constant 0 : index
    %c1_27 = arith.constant 1 : index
    %c0_28 = arith.constant 0 : index
    %c0_29 = arith.constant 0 : index
    %c0_30 = arith.constant 0 : index
    %55 = vector.load %arg2[%c0_26, %c1_27, %c0_28, %c0_29, %c0_30] : memref<1x9x3x16x16xf32, #tpu.memory_space<vmem>>, vector<1x1x3x16x16xf32>
    %56 = vector.shape_cast %55 : vector<1x1x3x16x16xf32> to vector<3x16x16xf32>
    %57 = vector.shape_cast %54 : vector<3x16x16xf32> to vector<1x1x3x16x16xf32>
    tpu.vector_store %arg2[%c0_26, %c1_27, %c0_28, %c0_29, %c0_30], %57 {strides = array<i32>} : memref<1x9x3x16x16xf32, #tpu.memory_space<vmem>>, vector<1x1x3x16x16xf32>,
    %cst_31 = arith.constant 5.312500e-01 : f32
    %58 = vector.broadcast %cst_31 : f32 to vector<6x16x16xf32>
    %59 = arith.mulf %58, %9 : vector<6x16x16xf32>
    %60 = vector.extract_strided_slice %9 {offsets = [0, 0, 1], sizes = [6, 16, 15], strides = [1, 1, 1]} : vector<6x16x16xf32> to vector<6x16x15xf32>
    %61 = vector.extract_strided_slice %9 {offsets = [0, 0, 15], sizes = [6, 16, 1], strides = [1, 1, 1]} : vector<6x16x16xf32> to vector<6x16x1xf32>
    %62 = tpu.concatenate %60, %61 in 2 : vector<6x16x15xf32>, vector<6x16x1xf32> -> vector<6x16x16xf32>
    %cst_32 = arith.constant 4.687500e-01 : f32
    %63 = vector.broadcast %cst_32 : f32 to vector<6x16x16xf32>
    %64 = arith.mulf %63, %62 : vector<6x16x16xf32>
    %65 = arith.addf %59, %64 : vector<6x16x16xf32>
    %66 = arith.mulf %65, %11 : vector<6x16x16xf32>
    %67 = vector.extract_strided_slice %21 {offsets = [0, 0, 0], sizes = [6, 16, 15], strides = [1, 1, 1]} : vector<6x16x16xf32> to vector<6x16x15xf32>
    %68 = vector.extract_strided_slice %21 {offsets = [0, 0, 0], sizes = [6, 16, 1], strides = [1, 1, 1]} : vector<6x16x16xf32> to vector<6x16x1xf32>
    %69 = tpu.concatenate %68, %67 in 2 : vector<6x16x1xf32>, vector<6x16x15xf32> -> vector<6x16x16xf32>
    %cst_33 = arith.constant 4.687500e-01 : f32
    %70 = vector.broadcast %cst_33 : f32 to vector<6x16x16xf32>
    %71 = arith.mulf %70, %69 : vector<6x16x16xf32>
    %cst_34 = arith.constant 5.312500e-01 : f32
    %72 = vector.broadcast %cst_34 : f32 to vector<6x16x16xf32>
    %73 = arith.mulf %72, %21 : vector<6x16x16xf32>
    %74 = arith.addf %71, %73 : vector<6x16x16xf32>
    %75 = arith.mulf %66, %74 : vector<6x16x16xf32>
    %76 = vector.extract_strided_slice %75 {offsets = [0, 0, 0], sizes = [3, 16, 16], strides = [1, 1, 1]} : vector<6x16x16xf32> to vector<3x16x16xf32>
    %77 = vector.extract_strided_slice %75 {offsets = [3, 0, 0], sizes = [3, 16, 16], strides = [1, 1, 1]} : vector<6x16x16xf32> to vector<3x16x16xf32>
    %78 = arith.addf %76, %77 : vector<3x16x16xf32>
    %cst_35 = arith.constant 5.000000e-01 : f32
    %79 = vector.broadcast %cst_35 : f32 to vector<3x16x16xf32>
    %80 = arith.mulf %78, %79 : vector<3x16x16xf32>
    %c0_36 = arith.constant 0 : index
    %c2_37 = arith.constant 2 : index
    %c0_38 = arith.constant 0 : index
    %c0_39 = arith.constant 0 : index
    %c0_40 = arith.constant 0 : index
    %81 = vector.load %arg2[%c0_36, %c2_37, %c0_38, %c0_39, %c0_40] : memref<1x9x3x16x16xf32, #tpu.memory_space<vmem>>, vector<1x1x3x16x16xf32>
    %82 = vector.shape_cast %81 : vector<1x1x3x16x16xf32> to vector<3x16x16xf32>
    %83 = vector.shape_cast %80 : vector<3x16x16xf32> to vector<1x1x3x16x16xf32>
    tpu.vector_store %arg2[%c0_36, %c2_37, %c0_38, %c0_39, %c0_40], %83 {strides = array<i32>} : memref<1x9x3x16x16xf32, #tpu.memory_space<vmem>>, vector<1x1x3x16x16xf32>,
    %c0_41 = arith.constant 0 : index
    %c0_42 = arith.constant 0 : index
    %c0_43 = arith.constant 0 : index
    %c0_44 = arith.constant 0 : index
    %c0_45 = arith.constant 0 : index
    %84 = vector.load %arg1[%c0_41, %c0_42, %c0_43, %c0_44, %c0_45] : memref<1x3x6x16x16xf32, #tpu.memory_space<vmem>>, vector<1x1x6x16x16xf32>
    %85 = vector.shape_cast %84 : vector<1x1x6x16x16xf32> to vector<6x16x16xf32>
    %c0_46 = arith.constant 0 : index
    %c1_47 = arith.constant 1 : index
    %c0_48 = arith.constant 0 : index
    %c0_49 = arith.constant 0 : index
    %c0_50 = arith.constant 0 : index
    %86 = vector.load %arg1[%c0_46, %c1_47, %c0_48, %c0_49, %c0_50] : memref<1x3x6x16x16xf32, #tpu.memory_space<vmem>>, vector<1x1x6x16x16xf32>
    %87 = vector.shape_cast %86 : vector<1x1x6x16x16xf32> to vector<6x16x16xf32>
    %c0_51 = arith.constant 0 : index
    %c2_52 = arith.constant 2 : index
    %c0_53 = arith.constant 0 : index
    %c0_54 = arith.constant 0 : index
    %c0_55 = arith.constant 0 : index
    %88 = vector.load %arg1[%c0_51, %c2_52, %c0_53, %c0_54, %c0_55] : memref<1x3x6x16x16xf32, #tpu.memory_space<vmem>>, vector<1x1x6x16x16xf32>
    %89 = vector.shape_cast %88 : vector<1x1x6x16x16xf32> to vector<6x16x16xf32>
    %90 = vector.extract_strided_slice %85 {offsets = [0, 0, 0], sizes = [6, 16, 15], strides = [1, 1, 1]} : vector<6x16x16xf32> to vector<6x16x15xf32>
    %91 = vector.extract_strided_slice %85 {offsets = [0, 0, 0], sizes = [6, 16, 1], strides = [1, 1, 1]} : vector<6x16x16xf32> to vector<6x16x1xf32>
    %92 = tpu.concatenate %91, %90 in 2 : vector<6x16x1xf32>, vector<6x16x15xf32> -> vector<6x16x16xf32>
    %cst_56 = arith.constant 4.687500e-01 : f32
    %93 = vector.broadcast %cst_56 : f32 to vector<6x16x16xf32>
    %94 = arith.mulf %93, %92 : vector<6x16x16xf32>
    %cst_57 = arith.constant 5.312500e-01 : f32
    %95 = vector.broadcast %cst_57 : f32 to vector<6x16x16xf32>
    %96 = arith.mulf %95, %85 : vector<6x16x16xf32>
    %97 = arith.addf %94, %96 : vector<6x16x16xf32>
    %98 = arith.mulf %97, %87 : vector<6x16x16xf32>
    %cst_58 = arith.constant 5.312500e-01 : f32
    %99 = vector.broadcast %cst_58 : f32 to vector<6x16x16xf32>
    %100 = arith.mulf %99, %89 : vector<6x16x16xf32>
    %101 = vector.extract_strided_slice %89 {offsets = [0, 0, 1], sizes = [6, 16, 15], strides = [1, 1, 1]} : vector<6x16x16xf32> to vector<6x16x15xf32>
    %102 = vector.extract_strided_slice %89 {offsets = [0, 0, 15], sizes = [6, 16, 1], strides = [1, 1, 1]} : vector<6x16x16xf32> to vector<6x16x1xf32>
    %103 = tpu.concatenate %101, %102 in 2 : vector<6x16x15xf32>, vector<6x16x1xf32> -> vector<6x16x16xf32>
    %cst_59 = arith.constant 4.687500e-01 : f32
    %104 = vector.broadcast %cst_59 : f32 to vector<6x16x16xf32>
    %105 = arith.mulf %104, %103 : vector<6x16x16xf32>
    %106 = arith.addf %100, %105 : vector<6x16x16xf32>
    %107 = arith.mulf %98, %106 : vector<6x16x16xf32>
    %108 = vector.extract_strided_slice %107 {offsets = [0, 0, 0], sizes = [3, 16, 16], strides = [1, 1, 1]} : vector<6x16x16xf32> to vector<3x16x16xf32>
    %109 = vector.extract_strided_slice %107 {offsets = [3, 0, 0], sizes = [3, 16, 16], strides = [1, 1, 1]} : vector<6x16x16xf32> to vector<3x16x16xf32>
    %110 = arith.addf %108, %109 : vector<3x16x16xf32>
    %cst_60 = arith.constant 5.000000e-01 : f32
    %111 = vector.broadcast %cst_60 : f32 to vector<3x16x16xf32>
    %112 = arith.mulf %110, %111 : vector<3x16x16xf32>
    %c0_61 = arith.constant 0 : index
    %c3 = arith.constant 3 : index
    %c0_62 = arith.constant 0 : index
    %c0_63 = arith.constant 0 : index
    %c0_64 = arith.constant 0 : index
    %113 = vector.load %arg2[%c0_61, %c3, %c0_62, %c0_63, %c0_64] : memref<1x9x3x16x16xf32, #tpu.memory_space<vmem>>, vector<1x1x3x16x16xf32>
    %114 = vector.shape_cast %113 : vector<1x1x3x16x16xf32> to vector<3x16x16xf32>
    %115 = vector.shape_cast %112 : vector<3x16x16xf32> to vector<1x1x3x16x16xf32>
    tpu.vector_store %arg2[%c0_61, %c3, %c0_62, %c0_63, %c0_64], %115 {strides = array<i32>} : memref<1x9x3x16x16xf32, #tpu.memory_space<vmem>>, vector<1x1x3x16x16xf32>,
    %116 = arith.mulf %85, %87 : vector<6x16x16xf32>
    %117 = arith.mulf %116, %89 : vector<6x16x16xf32>
    %118 = vector.extract_strided_slice %117 {offsets = [0, 0, 0], sizes = [3, 16, 16], strides = [1, 1, 1]} : vector<6x16x16xf32> to vector<3x16x16xf32>
    %119 = vector.extract_strided_slice %117 {offsets = [3, 0, 0], sizes = [3, 16, 16], strides = [1, 1, 1]} : vector<6x16x16xf32> to vector<3x16x16xf32>
    %120 = arith.addf %118, %119 : vector<3x16x16xf32>
    %cst_65 = arith.constant 5.000000e-01 : f32
    %121 = vector.broadcast %cst_65 : f32 to vector<3x16x16xf32>
    %122 = arith.mulf %120, %121 : vector<3x16x16xf32>
    %c0_66 = arith.constant 0 : index
    %c4 = arith.constant 4 : index
    %c0_67 = arith.constant 0 : index
    %c0_68 = arith.constant 0 : index
    %c0_69 = arith.constant 0 : index
    %123 = vector.load %arg2[%c0_66, %c4, %c0_67, %c0_68, %c0_69] : memref<1x9x3x16x16xf32, #tpu.memory_space<vmem>>, vector<1x1x3x16x16xf32>
    %124 = vector.shape_cast %123 : vector<1x1x3x16x16xf32> to vector<3x16x16xf32>
    %125 = vector.shape_cast %122 : vector<3x16x16xf32> to vector<1x1x3x16x16xf32>
    tpu.vector_store %arg2[%c0_66, %c4, %c0_67, %c0_68, %c0_69], %125 {strides = array<i32>} : memref<1x9x3x16x16xf32, #tpu.memory_space<vmem>>, vector<1x1x3x16x16xf32>,
    %cst_70 = arith.constant 5.312500e-01 : f32
    %126 = vector.broadcast %cst_70 : f32 to vector<6x16x16xf32>
    %127 = arith.mulf %126, %85 : vector<6x16x16xf32>
    %128 = vector.extract_strided_slice %85 {offsets = [0, 0, 1], sizes = [6, 16, 15], strides = [1, 1, 1]} : vector<6x16x16xf32> to vector<6x16x15xf32>
    %129 = vector.extract_strided_slice %85 {offsets = [0, 0, 15], sizes = [6, 16, 1], strides = [1, 1, 1]} : vector<6x16x16xf32> to vector<6x16x1xf32>
    %130 = tpu.concatenate %128, %129 in 2 : vector<6x16x15xf32>, vector<6x16x1xf32> -> vector<6x16x16xf32>
    %cst_71 = arith.constant 4.687500e-01 : f32
    %131 = vector.broadcast %cst_71 : f32 to vector<6x16x16xf32>
    %132 = arith.mulf %131, %130 : vector<6x16x16xf32>
    %133 = arith.addf %127, %132 : vector<6x16x16xf32>
    %134 = arith.mulf %133, %87 : vector<6x16x16xf32>
    %135 = vector.extract_strided_slice %89 {offsets = [0, 0, 0], sizes = [6, 16, 15], strides = [1, 1, 1]} : vector<6x16x16xf32> to vector<6x16x15xf32>
    %136 = vector.extract_strided_slice %89 {offsets = [0, 0, 0], sizes = [6, 16, 1], strides = [1, 1, 1]} : vector<6x16x16xf32> to vector<6x16x1xf32>
    %137 = tpu.concatenate %136, %135 in 2 : vector<6x16x1xf32>, vector<6x16x15xf32> -> vector<6x16x16xf32>
    %cst_72 = arith.constant 4.687500e-01 : f32
    %138 = vector.broadcast %cst_72 : f32 to vector<6x16x16xf32>
    %139 = arith.mulf %138, %137 : vector<6x16x16xf32>
    %cst_73 = arith.constant 5.312500e-01 : f32
    %140 = vector.broadcast %cst_73 : f32 to vector<6x16x16xf32>
    %141 = arith.mulf %140, %89 : vector<6x16x16xf32>
    %142 = arith.addf %139, %141 : vector<6x16x16xf32>
    %143 = arith.mulf %134, %142 : vector<6x16x16xf32>
    %144 = vector.extract_strided_slice %143 {offsets = [0, 0, 0], sizes = [3, 16, 16], strides = [1, 1, 1]} : vector<6x16x16xf32> to vector<3x16x16xf32>
    %145 = vector.extract_strided_slice %143 {offsets = [3, 0, 0], sizes = [3, 16, 16], strides = [1, 1, 1]} : vector<6x16x16xf32> to vector<3x16x16xf32>
    %146 = arith.addf %144, %145 : vector<3x16x16xf32>
    %cst_74 = arith.constant 5.000000e-01 : f32
    %147 = vector.broadcast %cst_74 : f32 to vector<3x16x16xf32>
    %148 = arith.mulf %146, %147 : vector<3x16x16xf32>
    %c0_75 = arith.constant 0 : index
    %c5 = arith.constant 5 : index
    %c0_76 = arith.constant 0 : index
    %c0_77 = arith.constant 0 : index
    %c0_78 = arith.constant 0 : index
    %149 = vector.load %arg2[%c0_75, %c5, %c0_76, %c0_77, %c0_78] : memref<1x9x3x16x16xf32, #tpu.memory_space<vmem>>, vector<1x1x3x16x16xf32>
    %150 = vector.shape_cast %149 : vector<1x1x3x16x16xf32> to vector<3x16x16xf32>
    %151 = vector.shape_cast %148 : vector<3x16x16xf32> to vector<1x1x3x16x16xf32>
    tpu.vector_store %arg2[%c0_75, %c5, %c0_76, %c0_77, %c0_78], %151 {strides = array<i32>} : memref<1x9x3x16x16xf32, #tpu.memory_space<vmem>>, vector<1x1x3x16x16xf32>,
    %c0_79 = arith.constant 0 : index
    %c0_80 = arith.constant 0 : index
    %c0_81 = arith.constant 0 : index
    %c0_82 = arith.constant 0 : index
    %c0_83 = arith.constant 0 : index
    %152 = vector.load %arg1[%c0_79, %c0_80, %c0_81, %c0_82, %c0_83] : memref<1x3x6x16x16xf32, #tpu.memory_space<vmem>>, vector<1x1x6x16x16xf32>
    %153 = vector.shape_cast %152 : vector<1x1x6x16x16xf32> to vector<6x16x16xf32>
    %cst_84 = arith.constant 5.312500e-01 : f32
    %154 = vector.broadcast %cst_84 : f32 to vector<6x16x16xf32>
    %155 = arith.mulf %154, %153 : vector<6x16x16xf32>
    %156 = vector.extract_strided_slice %153 {offsets = [0, 1, 0], sizes = [6, 15, 16], strides = [1, 1, 1]} : vector<6x16x16xf32> to vector<6x15x16xf32>
    %157 = vector.extract_strided_slice %153 {offsets = [0, 15, 0], sizes = [6, 1, 16], strides = [1, 1, 1]} : vector<6x16x16xf32> to vector<6x1x16xf32>
    %158 = tpu.concatenate %156, %157 in 1 : vector<6x15x16xf32>, vector<6x1x16xf32> -> vector<6x16x16xf32>
    %cst_85 = arith.constant 4.687500e-01 : f32
    %159 = vector.broadcast %cst_85 : f32 to vector<6x16x16xf32>
    %160 = arith.mulf %159, %158 : vector<6x16x16xf32>
    %161 = arith.addf %155, %160 : vector<6x16x16xf32>
    %c0_86 = arith.constant 0 : index
    %c1_87 = arith.constant 1 : index
    %c0_88 = arith.constant 0 : index
    %c0_89 = arith.constant 0 : index
    %c0_90 = arith.constant 0 : index
    %162 = vector.load %arg1[%c0_86, %c1_87, %c0_88, %c0_89, %c0_90] : memref<1x3x6x16x16xf32, #tpu.memory_space<vmem>>, vector<1x1x6x16x16xf32>
    %163 = vector.shape_cast %162 : vector<1x1x6x16x16xf32> to vector<6x16x16xf32>
    %c0_91 = arith.constant 0 : index
    %c2_92 = arith.constant 2 : index
    %c0_93 = arith.constant 0 : index
    %c0_94 = arith.constant 0 : index
    %c0_95 = arith.constant 0 : index
    %164 = vector.load %arg1[%c0_91, %c2_92, %c0_93, %c0_94, %c0_95] : memref<1x3x6x16x16xf32, #tpu.memory_space<vmem>>, vector<1x1x6x16x16xf32>
    %165 = vector.shape_cast %164 : vector<1x1x6x16x16xf32> to vector<6x16x16xf32>
    %166 = vector.extract_strided_slice %165 {offsets = [0, 0, 0], sizes = [6, 15, 16], strides = [1, 1, 1]} : vector<6x16x16xf32> to vector<6x15x16xf32>
    %167 = vector.extract_strided_slice %165 {offsets = [0, 0, 0], sizes = [6, 1, 16], strides = [1, 1, 1]} : vector<6x16x16xf32> to vector<6x1x16xf32>
    %168 = tpu.concatenate %167, %166 in 1 : vector<6x1x16xf32>, vector<6x15x16xf32> -> vector<6x16x16xf32>
    %cst_96 = arith.constant 4.687500e-01 : f32
    %169 = vector.broadcast %cst_96 : f32 to vector<6x16x16xf32>
    %170 = arith.mulf %169, %168 : vector<6x16x16xf32>
    %cst_97 = arith.constant 5.312500e-01 : f32
    %171 = vector.broadcast %cst_97 : f32 to vector<6x16x16xf32>
    %172 = arith.mulf %171, %165 : vector<6x16x16xf32>
    %173 = arith.addf %170, %172 : vector<6x16x16xf32>
    %174 = vector.extract_strided_slice %161 {offsets = [0, 0, 0], sizes = [6, 16, 15], strides = [1, 1, 1]} : vector<6x16x16xf32> to vector<6x16x15xf32>
    %175 = vector.extract_strided_slice %161 {offsets = [0, 0, 0], sizes = [6, 16, 1], strides = [1, 1, 1]} : vector<6x16x16xf32> to vector<6x16x1xf32>
    %176 = tpu.concatenate %175, %174 in 2 : vector<6x16x1xf32>, vector<6x16x15xf32> -> vector<6x16x16xf32>
    %cst_98 = arith.constant 4.687500e-01 : f32
    %177 = vector.broadcast %cst_98 : f32 to vector<6x16x16xf32>
    %178 = arith.mulf %177, %176 : vector<6x16x16xf32>
    %cst_99 = arith.constant 5.312500e-01 : f32
    %179 = vector.broadcast %cst_99 : f32 to vector<6x16x16xf32>
    %180 = arith.mulf %179, %161 : vector<6x16x16xf32>
    %181 = arith.addf %178, %180 : vector<6x16x16xf32>
    %182 = arith.mulf %181, %163 : vector<6x16x16xf32>
    %cst_100 = arith.constant 5.312500e-01 : f32
    %183 = vector.broadcast %cst_100 : f32 to vector<6x16x16xf32>
    %184 = arith.mulf %183, %173 : vector<6x16x16xf32>
    %185 = vector.extract_strided_slice %173 {offsets = [0, 0, 1], sizes = [6, 16, 15], strides = [1, 1, 1]} : vector<6x16x16xf32> to vector<6x16x15xf32>
    %186 = vector.extract_strided_slice %173 {offsets = [0, 0, 15], sizes = [6, 16, 1], strides = [1, 1, 1]} : vector<6x16x16xf32> to vector<6x16x1xf32>
    %187 = tpu.concatenate %185, %186 in 2 : vector<6x16x15xf32>, vector<6x16x1xf32> -> vector<6x16x16xf32>
    %cst_101 = arith.constant 4.687500e-01 : f32
    %188 = vector.broadcast %cst_101 : f32 to vector<6x16x16xf32>
    %189 = arith.mulf %188, %187 : vector<6x16x16xf32>
    %190 = arith.addf %184, %189 : vector<6x16x16xf32>
    %191 = arith.mulf %182, %190 : vector<6x16x16xf32>
    %192 = vector.extract_strided_slice %191 {offsets = [0, 0, 0], sizes = [3, 16, 16], strides = [1, 1, 1]} : vector<6x16x16xf32> to vector<3x16x16xf32>
    %193 = vector.extract_strided_slice %191 {offsets = [3, 0, 0], sizes = [3, 16, 16], strides = [1, 1, 1]} : vector<6x16x16xf32> to vector<3x16x16xf32>
    %194 = arith.addf %192, %193 : vector<3x16x16xf32>
    %cst_102 = arith.constant 5.000000e-01 : f32
    %195 = vector.broadcast %cst_102 : f32 to vector<3x16x16xf32>
    %196 = arith.mulf %194, %195 : vector<3x16x16xf32>
    %c0_103 = arith.constant 0 : index
    %c6 = arith.constant 6 : index
    %c0_104 = arith.constant 0 : index
    %c0_105 = arith.constant 0 : index
    %c0_106 = arith.constant 0 : index
    %197 = vector.load %arg2[%c0_103, %c6, %c0_104, %c0_105, %c0_106] : memref<1x9x3x16x16xf32, #tpu.memory_space<vmem>>, vector<1x1x3x16x16xf32>
    %198 = vector.shape_cast %197 : vector<1x1x3x16x16xf32> to vector<3x16x16xf32>
    %199 = vector.shape_cast %196 : vector<3x16x16xf32> to vector<1x1x3x16x16xf32>
    tpu.vector_store %arg2[%c0_103, %c6, %c0_104, %c0_105, %c0_106], %199 {strides = array<i32>} : memref<1x9x3x16x16xf32, #tpu.memory_space<vmem>>, vector<1x1x3x16x16xf32>,
    %200 = arith.mulf %161, %163 : vector<6x16x16xf32>
    %201 = arith.mulf %200, %173 : vector<6x16x16xf32>
    %202 = vector.extract_strided_slice %201 {offsets = [0, 0, 0], sizes = [3, 16, 16], strides = [1, 1, 1]} : vector<6x16x16xf32> to vector<3x16x16xf32>
    %203 = vector.extract_strided_slice %201 {offsets = [3, 0, 0], sizes = [3, 16, 16], strides = [1, 1, 1]} : vector<6x16x16xf32> to vector<3x16x16xf32>
    %204 = arith.addf %202, %203 : vector<3x16x16xf32>
    %cst_107 = arith.constant 5.000000e-01 : f32
    %205 = vector.broadcast %cst_107 : f32 to vector<3x16x16xf32>
    %206 = arith.mulf %204, %205 : vector<3x16x16xf32>
    %c0_108 = arith.constant 0 : index
    %c7 = arith.constant 7 : index
    %c0_109 = arith.constant 0 : index
    %c0_110 = arith.constant 0 : index
    %c0_111 = arith.constant 0 : index
    %207 = vector.load %arg2[%c0_108, %c7, %c0_109, %c0_110, %c0_111] : memref<1x9x3x16x16xf32, #tpu.memory_space<vmem>>, vector<1x1x3x16x16xf32>
    %208 = vector.shape_cast %207 : vector<1x1x3x16x16xf32> to vector<3x16x16xf32>
    %209 = vector.shape_cast %206 : vector<3x16x16xf32> to vector<1x1x3x16x16xf32>
    tpu.vector_store %arg2[%c0_108, %c7, %c0_109, %c0_110, %c0_111], %209 {strides = array<i32>} : memref<1x9x3x16x16xf32, #tpu.memory_space<vmem>>, vector<1x1x3x16x16xf32>,
    %cst_112 = arith.constant 5.312500e-01 : f32
    %210 = vector.broadcast %cst_112 : f32 to vector<6x16x16xf32>
    %211 = arith.mulf %210, %161 : vector<6x16x16xf32>
    %212 = vector.extract_strided_slice %161 {offsets = [0, 0, 1], sizes = [6, 16, 15], strides = [1, 1, 1]} : vector<6x16x16xf32> to vector<6x16x15xf32>
    %213 = vector.extract_strided_slice %161 {offsets = [0, 0, 15], sizes = [6, 16, 1], strides = [1, 1, 1]} : vector<6x16x16xf32> to vector<6x16x1xf32>
    %214 = tpu.concatenate %212, %213 in 2 : vector<6x16x15xf32>, vector<6x16x1xf32> -> vector<6x16x16xf32>
    %cst_113 = arith.constant 4.687500e-01 : f32
    %215 = vector.broadcast %cst_113 : f32 to vector<6x16x16xf32>
    %216 = arith.mulf %215, %214 : vector<6x16x16xf32>
    %217 = arith.addf %211, %216 : vector<6x16x16xf32>
    %218 = arith.mulf %217, %163 : vector<6x16x16xf32>
    %219 = vector.extract_strided_slice %173 {offsets = [0, 0, 0], sizes = [6, 16, 15], strides = [1, 1, 1]} : vector<6x16x16xf32> to vector<6x16x15xf32>
    %220 = vector.extract_strided_slice %173 {offsets = [0, 0, 0], sizes = [6, 16, 1], strides = [1, 1, 1]} : vector<6x16x16xf32> to vector<6x16x1xf32>
    %221 = tpu.concatenate %220, %219 in 2 : vector<6x16x1xf32>, vector<6x16x15xf32> -> vector<6x16x16xf32>
    %cst_114 = arith.constant 4.687500e-01 : f32
    %222 = vector.broadcast %cst_114 : f32 to vector<6x16x16xf32>
    %223 = arith.mulf %222, %221 : vector<6x16x16xf32>
    %cst_115 = arith.constant 5.312500e-01 : f32
    %224 = vector.broadcast %cst_115 : f32 to vector<6x16x16xf32>
    %225 = arith.mulf %224, %173 : vector<6x16x16xf32>
    %226 = arith.addf %223, %225 : vector<6x16x16xf32>
    %227 = arith.mulf %218, %226 : vector<6x16x16xf32>
    %228 = vector.extract_strided_slice %227 {offsets = [0, 0, 0], sizes = [3, 16, 16], strides = [1, 1, 1]} : vector<6x16x16xf32> to vector<3x16x16xf32>
    %229 = vector.extract_strided_slice %227 {offsets = [3, 0, 0], sizes = [3, 16, 16], strides = [1, 1, 1]} : vector<6x16x16xf32> to vector<3x16x16xf32>
    %230 = arith.addf %228, %229 : vector<3x16x16xf32>
    %cst_116 = arith.constant 5.000000e-01 : f32
    %231 = vector.broadcast %cst_116 : f32 to vector<3x16x16xf32>
    %232 = arith.mulf %230, %231 : vector<3x16x16xf32>
    %c0_117 = arith.constant 0 : index
    %c8 = arith.constant 8 : index
    %c0_118 = arith.constant 0 : index
    %c0_119 = arith.constant 0 : index
    %c0_120 = arith.constant 0 : index
    %233 = vector.load %arg2[%c0_117, %c8, %c0_118, %c0_119, %c0_120] : memref<1x9x3x16x16xf32, #tpu.memory_space<vmem>>, vector<1x1x3x16x16xf32>
    %234 = vector.shape_cast %233 : vector<1x1x3x16x16xf32> to vector<3x16x16xf32>
    %235 = vector.shape_cast %232 : vector<3x16x16xf32> to vector<1x1x3x16x16xf32>
    tpu.vector_store %arg2[%c0_117, %c8, %c0_118, %c0_119, %c0_120], %235 {strides = array<i32>} : memref<1x9x3x16x16xf32, #tpu.memory_space<vmem>>, vector<1x1x3x16x16xf32>,
    return
  }
  func.func @transform_0(%arg0: i32) -> (i32, i32, i32, i32, i32) {
    %c0_i32 = arith.constant 0 : i32
    %c0_i32_0 = arith.constant 0 : i32
    %c0_i32_1 = arith.constant 0 : i32
    %c0_i32_2 = arith.constant 0 : i32
    %c0_i32_3 = arith.constant 0 : i32
    return %arg0, %c0_i32, %c0_i32_0, %c0_i32_1, %c0_i32_2 : i32, i32, i32, i32, i32
  }
  func.func @transform_1(%arg0: i32) -> (i32, i32, i32, i32, i32) {
    %c0_i32 = arith.constant 0 : i32
    %c0_i32_0 = arith.constant 0 : i32
    %c0_i32_1 = arith.constant 0 : i32
    %c0_i32_2 = arith.constant 0 : i32
    %c0_i32_3 = arith.constant 0 : i32
    return %arg0, %c0_i32, %c0_i32_0, %c0_i32_1, %c0_i32_2 : i32, i32, i32, i32, i32
  }
}

</mosaic_0001>

<bundles_post_ra>
// kernel: tpu_custom_call.1
= control target key start
LH: loop header
LB: loop body
LE: loop exit
PB: predicated region body
PF: predicated region fallthrough
CT: control target
= control target key end

     0   :  { %6 = vsyncpa [#allocation3], 0  ;;  %s4478_s0 = inlined_call_operand.hbm [shape: f32[2,3,6,16,16], index: 0, kind: input, shape index: {}]   ;;  %s4479_s1 = inlined_call_operand.hbm [shape: f32[2,9,3,16,16], index: 1, kind: output, shape index: {}]  }
   0x1   :  { %8 = vsyncpa [#allocation3 + $0x1], 0 }
   0x2   :  { %9 = vsyncpa [#allocation4], 0 }
   0x3   :  { %11 = vsyncpa [#allocation4 + $0x1], 0  ;;  %s2406_s6 = smov 0   ;;  %s2408_s7 = smov 0  }
   0x4   :  { %s2410_s8 = smov 0   ;;  %s2412_s9 = smov 0  }
   0x5 LB: > { %s2427_s10 = sadd.s32 4294967295, %s2388_s9   ;;  %s2071_s11 = sadd.s32 4294967294, %s2388_s9   ;;  %s2388_s9 = sphi %s2412_s9, %s4896_s9   ;;  %s2384_s8 = sphi %s2410_s8, %s4895_s8   ;;  %s2380_s7 = sphi %s2408_s7, %s4894_s7   ;;  %s2376_s6 = sphi %s2406_s6, %s4893_s6  }
   0x6   : > { %s2431_s12 = sadd.s32 1, %s2388_s9   ;;  %s24_s13 = sadd.s32 1, %s2384_s8 }
   0x7   : > { %s21_s14 = ssub.s32 %s2388_s9, %s2431_s12  ;;  %p31_p0 = scmp.ne.s32.totalorder %s2384_s8, %s2380_s7 }
   0x8   : > { %p22_p1 = scmp.eq.s32.totalorder %s21_s14, 0  ;;  %p32_p2 = scmp.eq.s32.totalorder %s2388_s9, 0 }
   0x9   : > { %p37_p3 = scmp.ne.s32.totalorder %s2380_s7, %s2376_s6  ;;  %p38_p4 = scmp.eq.s32.totalorder %s2427_s10, 0 }
   0xa   : > { %s2443_s15 = scalar_select %p22_p1, %s2384_s8, %s24_s13  }
   0xb   : > { %p33_p5 = por %p32_p2, %p31_p0  ;;  %p2445_p6 = por %p38_p4, %p37_p3 }
   0xc   : > { %p61_p7 = scmp.eq.s32.totalorder %s2427_s10, 1  ;;  %p67_p8 = scmp.eq.s32.totalorder %s2071_s11, 1 }
   0xd   : > { %p2073_p9 = scmp.ge.s32.totalorder %s2388_s9, 2  ;;  %p2216_p10 = scmp.lt.s32.totalorder %s2388_s9, 2 }
   0xe   : > { %p2452_p11 = por %p61_p7, %p31_p0  ;;  %p2456_p12 = por %p67_p8, %p37_p3 }
   0xf   : > { %s87_s19 = sand.u32 1, %s2384_s8   ;;  %s2200_s20 = smul.u32 288, %s2388_s9 }
  0x10   : > { %s2199_s21 = smul.u32 288, %s87_s19  ;;  %p2465_p13 = pnand %p2216_p10, %p33_p5 }
  0x11   : > { %s96_s24 = scalar_lea.hbm %s4478_s0, %s2200_s20  ;;  %s88_s29 = scalar_lea.sflag [#allocation3], %s87_s19 }
  0x12   : > { %s97_s26 = sshll.u32 %s96_s24, 4  ;;  %s91_s27 = scalar_lea.vmem [#allocation2], %s2199_s21  ;;  %s98_s26 = int_to_ptr.hbm [resolvable:$true] %s97_s26 }
  0x13   : > { %s99_s28 = sshll.u32 %s91_s27, 4  ;;  %s2292_s30 = sshra.s32 %s98_s26, 4  ;;  %s100_s28 = int_to_ptr.vmem [resolvable:$true] %s99_s28  ;;  %s2293_s30 = int_to_ptr.hbm [resolvable:$true] %s2292_s30 }
  0x14   : > { %s2294_s2 = scalar_lea.hbm %s2293_s30, 288  ;;  %p2296_p1 = pneg %p2465_p13 }
  0x15   : > { %p2295_p0 = scmp.ne.s32.totalorder %s2293_s30, %s2294_s2  ;;  %s2299_s5 = scalar_lea.hbm %s4478_s0, 576 }
  0x16   : > { %p2300_p4 = scmp.lt.s32.totalorder %s2293_s30, %s4478_s0  ;;  %p2301_p5 = scmp.lt.s32.totalorder %s2299_s5, %s2294_s2 }
  0x17   : > { %p2297_p2 = pnand %p2296_p1, %p2295_p0 }
  0x18   : > { %p2302_p7 = por %p2301_p5, %p2300_p4 }
  0x19   : > { %p2298_p3 = pneg %p2297_p2 }
  0x1b   : > { %p2303_p8 = pnand %p2302_p7, %p2298_p3 }
  0x1d   : > { %2306 = shalt.err (!%p2303_p8)
}
  0x1e   : > { %s2390_s14 = smov 128   ;;  %s2391_s19 = smov 8  }
  0x1f   : > { %2211 = dma.hbm_to_vmem [thread:$0]  (!%p2465_p13), %s98_s26, 4608, %s100_s28, %s88_s29, %s2390_s14, %s2390_s14, %s2391_s19  }
  0x20   : > { %p2075_p10 = scmp.ge.s32.totalorder %s2388_s9, 1  ;;  %p107_p0 = scmp.lt.s32.totalorder %s2388_s9, 3 }
  0x22   : > { %p108_p1 = pnand %p2075_p10, %p107_p0 }
  0x24   : > { %111 = sbr.rel (%p108_p1) target bundleno = 564 (0x234), region = 24 }
  0x29   : > { %s2482_s20 = sand.u32 1, %s2380_s7  }
  0x2a   : > { %s2201_s21 = smul.u32 288, %s2482_s20  ;;  %s114_s22 = scalar_lea.sflag [#allocation3], %s2482_s20 }
  0x2c   : > { %s2486_s23 = scalar_lea.vmem [#allocation2], %s2201_s21 }
  0x2d   : > { %2367 = dma.done.wait (%p2445_p6), %s114_s22, 4608  }
  0x2e   : > { %2369 = vsyncadd (%p2445_p6), %s114_s22, 4294962688  ;;  %v2493_v0 = vld [vmem:[%s2486_s23 + $0x20] sm:$0xff]  ;;  %vm161_vm0 = vcmask 1040384   ;;  %v2496_v1 = vld [vmem:[%s2486_s23 + $0x10] sm:$0xff]  ;;  %s2392_s16 = smov 1   ;;  %vm284_vm1 = vcmask 1046528  }
  0x2f   : > { %4645 = vst [vmem:[#allocation8_spill] sm:$0xff] %v2493_v0  ;;  %v2499_v2 = vld [vmem:[%s2486_s23] sm:$0xff]  ;;  %v168_v3 = vrot.slane %v2493_v0, 7  ;;  %v165_v4 = vrot.slane %v2496_v1, 7  ;;  %v2504_v5 = vld [vmem:[%s2486_s23 + $0x28] sm:$0xff]  ;;  %v2507_v6 = vld [vmem:[%s2486_s23 + $0x18] sm:$0xff] }
  0x30   : > { %4646 = vst [vmem:[#allocation9_spill] sm:$0xff] %v2496_v1  ;;  %v214_v7 = vmul.f32 0.53125, %v2493_v0  ;;  %v212_v8 = vmul.f32 0.53125, %v2496_v1  ;;  %v162_v9 = vrot.slane %v2499_v2, 7  ;;  %v169_v10 = vrot.slane %v2504_v5, 7  ;;  %v2514_v11 = vld [vmem:[%s2486_s23 + $0x8] sm:$0xff] }
  0x31   : > { %4647 = vst [vmem:[#allocation10_spill] sm:$0xff] %v2499_v2  ;;  %v194_v12 = vsel %vm161_vm0, %v2493_v0, %v168_v3  ;;  %v193_v13 = vsel %vm161_vm0, %v2496_v1, %v165_v4  ;;  %v210_v14 = vmul.f32 0.53125, %v2499_v2  ;;  %v166_v15 = vrot.slane %v2507_v6, 7  ;;  %v2532_v25 = vld [vmem:[%s2486_s23 + $0x40] sm:$0xff]  ;;  %v2535_v26 = vld [vmem:[%s2486_s23 + $0x30] sm:$0xff]  ;;  %v2538_v27 = vld [vmem:[%s2486_s23 + $0x38] sm:$0xff] }
  0x32   : > { %4648 = vst [vmem:[#allocation11_spill] sm:$0xff] %v2504_v5  ;;  %v202_v16 = vmul.f32 0.46875, %v194_v12  ;;  %v200_v17 = vmul.f32 0.46875, %v193_v13  ;;  %v192_v18 = vsel %vm161_vm0, %v2499_v2, %v162_v9  ;;  %v170_v20 = vsel %vm161_vm0, %v168_v3, %v169_v10  ;;  %v2567_v45 = vld [vmem:[%s2486_s23 + $0x50] sm:$0xff]  ;;  %v2570_v46 = vld [vmem:[%s2486_s23 + $0x58] sm:$0xff]  ;;  %v2573_v47 = vld [vmem:[%s2486_s23 + $0x48] sm:$0xff] }
  0x33   : > { %4649 = vst [vmem:[#allocation12_spill] sm:$0xff] %v2507_v6  ;;  %v198_v19 = vmul.f32 0.46875, %v192_v18  ;;  %v167_v21 = vsel %vm161_vm0, %v165_v4, %v166_v15  ;;  %v163_v22 = vrot.slane %v2514_v11, 7  ;;  %v215_v29 = vmul.f32 0.53125, %v2504_v5  ;;  %v2598_v63 = vld [vmem:[%s2486_s23 + $0xd0] sm:$0xff]  ;;  %v2601_v3 = vld [vmem:[%s2486_s23 + $0xd8] sm:$0xff] }
  0x34   : > { %4650 = vst [vmem:[#allocation13_spill] sm:$0xff] %v2514_v11  ;;  %v2527_v23 = vadd.f32 %v214_v7, %v202_v16  ;;  %v2529_v24 = vadd.f32 %v212_v8, %v200_v17  ;;  %v203_v31 = vmul.f32 0.46875, %v170_v20  ;;  %v201_v32 = vmul.f32 0.46875, %v167_v21  ;;  %v2604_v4 = vld [vmem:[%s2486_s23 + $0xc8] sm:$0xff]  ;;  %v2608_v8 = vld [vmem:[%s2486_s23 + $0xc0] sm:$0xff]  ;;  %s2393_s24 = smov 127  }
  0x35   : > { %4651 = vst [vmem:[#allocation14_spill] sm:$0xff] %v2535_v26  ;;  %v2540_v28 = vadd.f32 %v210_v14, %v198_v19  ;;  %v164_v30 = vsel %vm161_vm0, %v162_v9, %v163_v22  ;;  %v213_v33 = vmul.f32 0.53125, %v2507_v6  ;;  %v211_v34 = vmul.f32 0.53125, %v2514_v11  ;;  %s2202_s25 = smul.u32 432, %s2482_s20  ;;  %s1983_s3 = scalar_lea.sflag [#allocation4], %s2482_s20 }
  0x36   : > { %4652 = vst [vmem:[#allocation15_spill] sm:$0xff] %v2538_v27  ;;  %365 = vrot.lane.b32.xlu2 %v2527_v23, %s2392_s16  ;;  %361 = vrot.lane.b32.xlu1 %v2529_v24, %s2392_s16  ;;  %v199_v35 = vmul.f32 0.46875, %v164_v30  ;;  %v174_v36 = vrot.slane %v2532_v25, 7  ;;  %v171_v37 = vrot.slane %v2535_v26, 7  ;;  %v172_v38 = vrot.slane %v2538_v27, 7  ;;  %s2203_s27 = smul.u32 432, %s2427_s10 }
  0x37   : > { %357 = vrot.lane.b32.xlu0 %v2540_v28, %s2392_s16  ;;  %v2555_v39 = vadd.f32 %v215_v29, %v203_v31  ;;  %v2557_v40 = vadd.f32 %v213_v33, %v201_v32  ;;  %4653 = vst [vmem:[#allocation16_spill] sm:$0xff] %v2567_v45  ;;  %v218_v49 = vmul.f32 0.53125, %v2532_v25  ;;  %v217_v51 = vmul.f32 0.53125, %v2538_v27  ;;  %v2633_v31 = vld [vmem:[%s2486_s23 + $0xe8] sm:$0xff]  ;;  %v2636_v32 = vld [vmem:[%s2486_s23 + $0xe0] sm:$0xff]  ;;  %s2795_s26 = scalar_lea.vmem [#allocation5], %s2202_s25 }
  0x38   : > { %v2559_v41 = vadd.f32 %v211_v34, %v199_v35  ;;  %v196_v42 = vsel %vm161_vm0, %v2532_v25, %v174_v36  ;;  %v173_v43 = vsel %vm161_vm0, %v171_v37, %v172_v38  ;;  %v195_v44 = vsel %vm161_vm0, %v2535_v26, %v171_v37  ;;  %4654 = vst [vmem:[#allocation17_spill] sm:$0xff] %v2570_v46  ;;  %s1994_s29 = scalar_lea.hbm %s4479_s1, %s2203_s27  ;;  %s1995_s30 = sshll.u32 %s2795_s26, 4  ;;  %s1996_s30 = int_to_ptr.vmem [resolvable:$true] %s1995_s30 }
  0x39   : > { %4655 = vst [vmem:[#allocation18_spill] sm:$0xff] %v2573_v47  ;;  %v206_v48 = vmul.f32 0.46875, %v196_v42  ;;  %v205_v50 = vmul.f32 0.46875, %v173_v43  ;;  %v204_v52 = vmul.f32 0.46875, %v195_v44  ;;  %v216_v53 = vmul.f32 0.53125, %v2535_v26  ;;  %s1997_s2 = sshll.u32 %s1994_s29, 4  ;;  %s1998_s2 = int_to_ptr.hbm [resolvable:$true] %s1997_s2 }
  0x3a   : > { %v177_v54 = vrot.slane %v2567_v45, 7  ;;  %v178_v55 = vrot.slane %v2570_v46, 7  ;;  %v175_v56 = vrot.slane %v2573_v47, 7  ;;  %4659 = vst [vmem:[#allocation22_spill] sm:$0xff] %v2601_v3  ;;  %v221_v7 = vmul.f32 0.53125, %v2570_v46  ;;  %s2336_s4 = sshra.s32 %s1998_s2, 4  ;;  %s2337_s4 = int_to_ptr.hbm [resolvable:$true] %s2336_s4 }
  0x3b   : > { %v2587_v57 = vadd.f32 %v218_v49, %v206_v48  ;;  %v2589_v58 = vadd.f32 %v217_v51, %v205_v50  ;;  %v2591_v59 = vadd.f32 %v216_v53, %v204_v52  ;;  %4660 = vst [vmem:[#allocation23_spill] sm:$0xff] %v2604_v4  ;;  %v220_v12 = vmul.f32 0.53125, %v2567_v45  ;;  %v2661_v53 = vld [vmem:[%s2486_s23 + $0x100] sm:$0xff]  ;;  %s2338_s5 = scalar_lea.hbm %s2337_s4, 432  ;;  %s2342_s14 = scalar_lea.hbm %s4479_s1, 864 }
  0x3c   : > { %v179_v60 = vsel %vm161_vm0, %v177_v54, %v178_v55  ;;  %v197_v61 = vsel %vm161_vm0, %v2567_v45, %v177_v54  ;;  %v176_v62 = vsel %vm161_vm0, %v174_v36, %v175_v56  ;;  %4661 = vst [vmem:[#allocation24_spill] sm:$0xff] %v2608_v8  ;;  %v219_v13 = vmul.f32 0.53125, %v2573_v47  ;;  %v2664_v54 = vld [vmem:[%s2486_s23 + $0x108] sm:$0xff]  ;;  %v2667_v55 = vld [vmem:[%s2486_s23 + $0xf8] sm:$0xff]  ;;  %p2339_p6 = scmp.ne.s32.totalorder %s2337_s4, %s2338_s5  ;;  %p2343_p3 = scmp.lt.s32.totalorder %s2337_s4, %s4479_s1 }
  0x3d   : > { %4656 = vst [vmem:[#allocation19_spill] sm:$0xff] %v2587_v57  ;;  %v209_v9 = vmul.f32 0.46875, %v179_v60  ;;  %v208_v10 = vmul.f32 0.46875, %v197_v61  ;;  %v207_v14 = vmul.f32 0.46875, %v176_v62  ;;  %v288_v15 = vrot.slane %v2598_v63, 1  ;;  %v2671_v60 = vld [vmem:[%s2486_s23 + $0xf0] sm:$0xff]  ;;  %p2344_p4 = scmp.lt.s32.totalorder %s2342_s14, %s2338_s5 }
  0x3e   : > { %367 = vrot.lane.b32.xlu2 %v2555_v39, %s2392_s16  ;;  %363 = vrot.lane.b32.xlu1 %v2557_v40, %s2392_s16  ;;  %4657 = vst [vmem:[#allocation20_spill] sm:$0xff] %v2589_v58  ;;  %v289_v16 = vrot.slane %v2601_v3, 1  ;;  %v286_v17 = vrot.slane %v2604_v4, 1  ;;  %v285_v18 = vrot.slane %v2608_v8, 1  ;;  %v262_v33 = vmul.f32 0.53125, %v2598_v63  ;;  %p2340_p13 = pnand %p2339_p6, %p2452_p11 }
  0x3f   : > { %359 = vrot.lane.b32.xlu0 %v2559_v41, %s2392_s16  ;;  %4658 = vst [vmem:[#allocation21_spill] sm:$0xff] %v2591_v59  ;;  %v2622_v19 = vadd.f32 %v221_v7, %v209_v9  ;;  %v2624_v20 = vadd.f32 %v220_v12, %v208_v10  ;;  %v2626_v21 = vadd.f32 %v219_v13, %v207_v14  ;;  %v261_v35 = vmul.f32 0.53125, %v2604_v4  ;;  %p2345_p5 = por %p2344_p4, %p2343_p3 }
  0x40   : > { %v290_v22 = vsel %vm284_vm1, %v288_v15, %v289_v16  ;;  %v315_v29 = vsel %vm284_vm1, %v286_v17, %v2604_v4  ;;  %v287_v30 = vsel %vm284_vm1, %v285_v18, %v286_v17  ;;  %4664 = vst [vmem:[#allocation27_spill] sm:$0xff] %v2633_v31  ;;  %v260_v37 = vmul.f32 0.53125, %v2608_v8  ;;  %p2341_p2 = pneg %p2340_p13 }
  0x41   : > { %4662 = vst [vmem:[#allocation25_spill] sm:$0xff] %v2624_v20  ;;  %v323_v34 = vmul.f32 0.46875, %v290_v22  ;;  %v322_v36 = vmul.f32 0.46875, %v315_v29  ;;  %v321_v38 = vmul.f32 0.46875, %v287_v30  ;;  %v292_v42 = vrot.slane %v2633_v31, 1 }
  0x42   : > { %4663 = vst [vmem:[#allocation26_spill] sm:$0xff] %v2626_v21  ;;  %v291_v43 = vrot.slane %v2636_v32, 1  ;;  %v316_v52 = vsel %vm284_vm1, %v289_v16, %v2601_v3  ;;  %v265_v56 = vmul.f32 0.53125, %v2633_v31  ;;  %v264_v62 = vmul.f32 0.53125, %v2636_v32  ;;  %p2346_p7 = pnand %p2345_p5, %p2341_p2 }
  0x43   : > { %4665 = vst [vmem:[#allocation28_spill] sm:$0xff] %v2636_v32  ;;  %v2649_v44 = vadd.f32 %v323_v34, %v262_v33  ;;  %v2651_v48 = vadd.f32 %v322_v36, %v261_v35  ;;  %v2653_v49 = vadd.f32 %v321_v38, %v260_v37  ;;  %v317_v50 = vsel %vm284_vm1, %v292_v42, %v2633_v31  ;;  %v2696_v33 = vld [vmem:[%s2486_s23 + $0x118] sm:$0xff]  ;;  %v2699_v34 = vld [vmem:[%s2486_s23 + $0x110] sm:$0xff] }
  0x44   : > { %v293_v51 = vsel %vm284_vm1, %v291_v43, %v292_v42  ;;  %4667 = vst [vmem:[#allocation30_spill] sm:$0xff] %v2661_v53  ;;  %v326_v61 = vmul.f32 0.46875, %v317_v50  ;;  %v263_v9 = vmul.f32 0.53125, %v2601_v3  ;;  %v324_v10 = vmul.f32 0.46875, %v316_v52 }
  0x45   : > { %4666 = vst [vmem:[#allocation29_spill] sm:$0xff] %v2649_v44  ;;  %v325_v7 = vmul.f32 0.46875, %v293_v51  ;;  %v297_v12 = vrot.slane %v2661_v53, 1  ;;  %v298_v13 = vrot.slane %v2664_v54, 1  ;;  %v295_v14 = vrot.slane %v2667_v55, 1 }
  0x46   : > { %373 = vrot.lane.b32.xlu2 %v2587_v57, %s2392_s16  ;;  %371 = vrot.lane.b32.xlu1 %v2589_v58, %s2392_s16  ;;  %4668 = vst [vmem:[#allocation31_spill] sm:$0xff] %v2664_v54  ;;  %v294_v15 = vrot.slane %v2671_v60, 1  ;;  %v2685_v16 = vadd.f32 %v326_v61, %v265_v56  ;;  %v2689_v18 = vadd.f32 %v324_v10, %v263_v9  ;;  %v268_v35 = vmul.f32 0.53125, %v2661_v53 }
  0x47   : > { %369 = vrot.lane.b32.xlu0 %v2591_v59, %s2392_s16  ;;  %4669 = vst [vmem:[#allocation32_spill] sm:$0xff] %v2667_v55  ;;  %v2687_v17 = vadd.f32 %v325_v7, %v264_v62  ;;  %v299_v22 = vsel %vm284_vm1, %v297_v12, %v298_v13  ;;  %v318_v29 = vsel %vm284_vm1, %v295_v14, %v2667_v55  ;;  %v267_v37 = vmul.f32 0.53125, %v2667_v55 }
  0x48   : > { %4670 = vst [vmem:[#allocation33_spill] sm:$0xff] %v2671_v60  ;;  %v296_v30 = vsel %vm284_vm1, %v294_v15, %v295_v14  ;;  %v329_v36 = vmul.f32 0.46875, %v299_v22  ;;  %v328_v38 = vmul.f32 0.46875, %v318_v29  ;;  %v266_v42 = vmul.f32 0.53125, %v2671_v60 }
  0x49   : > { %4671 = vst [vmem:[#allocation34_spill] sm:$0xff] %v2696_v33  ;;  %v327_v43 = vmul.f32 0.46875, %v296_v30  ;;  %v301_v50 = vrot.slane %v2696_v33, 1  ;;  %v300_v51 = vrot.slane %v2699_v34, 1  ;;  %v319_v9 = vsel %vm284_vm1, %v298_v13, %v2664_v54 }
  0x4a   : > { %4672 = vst [vmem:[#allocation35_spill] sm:$0xff] %v2699_v34  ;;  %v2712_v52 = vadd.f32 %v329_v36, %v268_v35  ;;  %v2714_v56 = vadd.f32 %v328_v38, %v267_v37  ;;  %v271_v10 = vmul.f32 0.53125, %v2696_v33  ;;  %v270_v14 = vmul.f32 0.53125, %v2699_v34  ;;  %v2757_v36 = vld [vmem:[%s2486_s23 + $0x88] sm:$0xff]  ;;  %v2768_v38 = vld [vmem:[%s2486_s23 + $0xb8] sm:$0xff] }
  0x4b   : > { %v2716_v61 = vadd.f32 %v327_v43, %v266_v42  ;;  %v320_v62 = vsel %vm284_vm1, %v301_v50, %v2696_v33  ;;  %v302_v7 = vsel %vm284_vm1, %v300_v51, %v301_v50  ;;  %v269_v22 = vmul.f32 0.53125, %v2664_v54  ;;  %4677 = vst [vmem:[#allocation40_spill] sm:$0xff] %v2768_v38  ;;  %v2774_v50 = vld [vmem:[%s2486_s23 + $0xa0] sm:$0xff] }
  0x4c   : > { %4673 = vst [vmem:[#allocation36_spill] sm:$0xff] %v2712_v52  ;;  %v332_v12 = vmul.f32 0.46875, %v320_v62  ;;  %v331_v15 = vmul.f32 0.46875, %v302_v7  ;;  %v330_v29 = vmul.f32 0.46875, %v319_v9  ;;  %v587_v37 = vmul.f32 %v2757_v36, %v2555_v39  ;;  %v2785_v9 = vld [vmem:[%s2486_s23 + $0x70] sm:$0xff] }
  0x4d   : > { %4674 = vst [vmem:[#allocation37_spill] sm:$0xff] %v2714_v56  ;;  %v593_v42 = vmul.f32 %v2768_v38, %v2622_v19  ;;  %v590_v62 = vmul.f32 %v2774_v50, %v2587_v57  ;;  %vm575_vm2 = vcmask 130048   ;;  %vm393_vm3 = vcmask 7168  }
  0x4e   : > { %379 = vrot.lane.b32.xlu2 %v2622_v19, %s2392_s16  ;;  %377 = vrot.lane.b32.xlu1 %v2624_v20, %s2392_s16  ;;  %4675 = vst [vmem:[#allocation38_spill] sm:$0xff] %v2716_v61  ;;  %v2732_v13 = vadd.f32 %v332_v12, %v271_v10  ;;  %v2734_v30 = vadd.f32 %v331_v15, %v270_v14  ;;  %vm514_vm4 = vcmask 121856  }
  0x4f   : > { %375 = vrot.lane.b32.xlu0 %v2626_v21, %s2392_s16  ;;  %v2736_v35 = vadd.f32 %v330_v29, %v269_v22  ;;  %v599_v43 = vmul.f32 %v587_v37, %v2685_v16  ;;  %v602_v10 = vmul.f32 %v590_v62, %v2712_v52  ;;  %v584_v12 = vmul.f32 %v2785_v9, %v2529_v24 }
  0x50   : > { %4676 = vst [vmem:[#allocation39_spill] sm:$0xff] %v2734_v30  ;;  %v605_v51 = vmul.f32 %v593_v42, %v2732_v13 }
  0x51   : > { %v596_v22 = vmul.f32 %v584_v12, %v2649_v44  ;;  %v2827_v12 = vld [vmem:[%s2486_s23 + $0x90] sm:$0xff] }
  0x52   : > { %v611_v7 = vadd.f32 %v605_v51, %v599_v43  ;;  %v2810_v43 = vld [vmem:[%s2486_s23 + $0x60] sm:$0xff]  ;;  %v2813_v51 = vld [vmem:[%s2486_s23 + $0x68] sm:$0xff]  ;;  %4679 = vst [vmem:[#allocation42_spill] sm:$0xff] %v2827_v12 }
  0x53   : > { %v608_v29 = vadd.f32 %v602_v10, %v596_v22  ;;  %4678 = vst [vmem:[#allocation41_spill] sm:$0xff] %v2810_v43  ;;  %v582_v62 = vmul.f32 %v2810_v43, %v2540_v28  ;;  %v2824_v10 = vld [vmem:[%s2486_s23 + $0x98] sm:$0xff] }
  0x54   : > { %v617_v15 = vmul.f32 0.5, %v611_v7  ;;  %v583_v7 = vmul.f32 %v2813_v51, %v2559_v41 }
  0x55   : > { %v614_v37 = vmul.f32 0.5, %v608_v29  ;;  %v589_v29 = vmul.f32 %v2824_v10, %v2589_v58 }
  0x56   : > { %482 = vrot.lane.b32.xlu2 %v2649_v44, %s2393_s24  ;;  %480 = vrot.lane.b32.xlu1 %v2651_v48, %s2393_s24  ;;  %2105 = vst.msk [vmem:[%s2795_s26 + $0x58] sm:$0xff] %vm575_vm2, %v617_v15  ;;  %v594_v15 = vmul.f32 %v582_v62, %v2653_v49  ;;  %v595_v22 = vmul.f32 %v583_v7, %v2651_v48  ;;  %v2844_v7 = vld [vmem:[%s2486_s23 + $0x80] sm:$0xff] }
  0x57   : > { %478 = vrot.lane.b32.xlu0 %v2653_v49, %s2393_s24  ;;  %2102 = vst.msk [vmem:[%s2795_s26 + $0x40] sm:$0xff] %vm575_vm2, %v614_v37  ;;  %v588_v37 = vmul.f32 %v2827_v12, %v2591_v59  ;;  %v601_v34 = vmul.f32 %v589_v29, %v2714_v56  ;;  %v2862_v29 = vld [vmem:[%s2486_s23 + $0xb0] sm:$0xff] }
  0x58   : > { %4680 = vst [vmem:[#allocation43_spill] sm:$0xff] %v2844_v7 }
  0x59   : > { %v600_v33 = vmul.f32 %v588_v37, %v2716_v61  ;;  %v607_v60 = vadd.f32 %v601_v34, %v595_v22  ;;  %v586_v34 = vmul.f32 %v2844_v7, %v2527_v23  ;;  %4682 = vst [vmem:[#allocation45_spill] sm:$0xff] %v2862_v29  ;;  %v2865_v37 = vld [vmem:[%s2486_s23 + $0xa8] sm:$0xff]  ;;  %v592_v7 = vmul.f32 %v2862_v29, %v2624_v20 }
  0x5a   : > { %4683 = vst [vmem:[#allocation46_spill] sm:$0xff] %v2865_v37  ;;  %v591_v3 = vmul.f32 %v2865_v37, %v2626_v21 }
  0x5b   : > { %v606_v55 = vadd.f32 %v600_v33, %v594_v15  ;;  %v613_v62 = vmul.f32 0.5, %v607_v60  ;;  %v2853_v60 = vld [vmem:[%s2486_s23 + $0x78] sm:$0xff] }
  0x5c   : > { %4681 = vst [vmem:[#allocation44_spill] sm:$0xff] %v2853_v60  ;;  %v585_v22 = vmul.f32 %v2853_v60, %v2557_v40  ;;  %v604_v60 = vmul.f32 %v592_v7, %v2734_v30 }
  0x5d   : > { %v612_v53 = vmul.f32 0.5, %v606_v55  ;;  %2101 = vst.msk [vmem:[%s2795_s26 + $0x38] sm:$0xff] %vm575_vm2, %v613_v62  ;;  %v598_v62 = vmul.f32 %v586_v34, %v2687_v17  ;;  %v603_v34 = vmul.f32 %v591_v3, %v2736_v35 }
  0x5e   : > { %488 = vrot.lane.b32.xlu2 %v2685_v16, %s2393_s24  ;;  %486 = vrot.lane.b32.xlu1 %v2687_v17, %s2393_s24 }
  0x5f   : > { %484 = vrot.lane.b32.xlu0 %v2689_v18, %s2393_s24  ;;  %2100 = vst.msk [vmem:[%s2795_s26 + $0x30] sm:$0xff] %vm575_vm2, %v612_v53  ;;  %v597_v53 = vmul.f32 %v585_v22, %v2689_v18  ;;  %v610_v31 = vadd.f32 %v604_v60, %v598_v62  ;;  %v2906_v62 = vmul.f32 0.53125, %v2587_v57 }
  0x61   : > { %v609_v22 = vadd.f32 %v603_v34, %v597_v53  ;;  %v616_v12 = vmul.f32 0.5, %v610_v31  ;;  %4684 = vst [vmem:[#allocation47_spill] sm:$0xff] %v2906_v62 }
  0x63   : > { %v615_v43 = vmul.f32 0.5, %v609_v22  ;;  %2104 = vst.msk [vmem:[%s2795_s26 + $0x50] sm:$0xff] %vm575_vm2, %v616_v12  ;;  %v2909_v22 = vmul.f32 0.53125, %v2529_v24 }
  0x65   : > { %2103 = vst.msk [vmem:[%s2795_s26 + $0x48] sm:$0xff] %vm575_vm2, %v615_v43 }
  0x66   : > { %494 = vrot.lane.b32.xlu2 %v2712_v52, %s2393_s24  ;;  %492 = vrot.lane.b32.xlu1 %v2714_v56, %s2393_s24  ;;  %4685 = vst [vmem:[#allocation48_spill] sm:$0xff] %v2909_v22 }
  0x67   : > { %490 = vrot.lane.b32.xlu0 %v2716_v61, %s2393_s24 }
  0x6e   : > { %500 = vrot.lane.b32.xlu2 %v2732_v13, %s2393_s24  ;;  %498 = vrot.lane.b32.xlu1 %v2734_v30, %s2393_s24 }
  0x6f   : > { %496 = vrot.lane.b32.xlu0 %v2736_v35, %s2393_s24 }
  0x76   : > { %629 = vrot.lane.b32.xlu2 %v2529_v24, %s2393_s24  ;;  %627 = vrot.lane.b32.xlu1 %v2559_v41, %s2393_s24 }
  0x77   : > { %625 = vrot.lane.b32.xlu0 %v2540_v28, %s2393_s24 }
  0x7e   : > { %635 = vrot.lane.b32.xlu2 %v2555_v39, %s2393_s24  ;;  %633 = vrot.lane.b32.xlu1 %v2527_v23, %s2393_s24 }
  0x7f   : > { %631 = vrot.lane.b32.xlu0 %v2557_v40, %s2393_s24 }
  0x86   : > { %641 = vrot.lane.b32.xlu2 %v2587_v57, %s2393_s24  ;;  %639 = vrot.lane.b32.xlu1 %v2589_v58, %s2393_s24 }
  0x87   : > { %637 = vrot.lane.b32.xlu0 %v2591_v59, %s2393_s24 }
  0x8e   : > { %647 = vrot.lane.b32.xlu2 %v2622_v19, %s2393_s24  ;;  %645 = vrot.lane.b32.xlu1 %v2624_v20, %s2393_s24 }
  0x8f   : > { %643 = vrot.lane.b32.xlu0 %v2626_v21, %s2393_s24 }
  0x90   : > { %v2792_v14 = vpop.permute.xlu2 %365 }
  0x96   : > { %713 = vrot.lane.b32.xlu2 %v2649_v44, %s2392_s16  ;;  %711 = vrot.lane.b32.xlu1 %v2651_v48, %s2392_s16 }
  0x97   : > { %709 = vrot.lane.b32.xlu0 %v2653_v49, %s2392_s16 }
  0x98   : > { %v2807_v42 = vpop.permute.xlu2 %367 }
  0x9e   : > { %719 = vrot.lane.b32.xlu2 %v2685_v16, %s2392_s16  ;;  %717 = vrot.lane.b32.xlu1 %v2687_v17, %s2392_s16 }
  0x9f   : > { %715 = vrot.lane.b32.xlu0 %v2689_v18, %s2392_s16 }
  0xa0   : > { %v374_v54 = vpop.permute.xlu2 %373 }
  0xa1   : > { %v402_v31 = vsel %vm393_vm3, %v2587_v57, %v374_v54 }
  0xa2   : > { %v414_v53 = vmul.f32 0.46875, %v402_v31 }
  0xa6   : > { %725 = vrot.lane.b32.xlu2 %v2712_v52, %s2392_s16  ;;  %723 = vrot.lane.b32.xlu1 %v2714_v56, %s2392_s16 }
  0xa7   : > { %721 = vrot.lane.b32.xlu0 %v2716_v61, %s2392_s16 }
  0xa8   : > { %v380_v33 = vpop.permute.xlu2 %379  ;;  %v362_v15 = vpop.permute.xlu1 %361 }
  0xa9   : > { %v2857_v55 = vpop.permute.xlu0 %357  ;;  %v396_v43 = vsel %vm393_vm3, %v2529_v24, %v362_v15  ;;  %v399_v15 = vsel %vm393_vm3, %v2555_v39, %v2807_v42 }
  0xaa   : > { %v408_v34 = vmul.f32 0.46875, %v396_v43  ;;  %v2926_v43 = vmul.f32 0.53125, %v2712_v52 }
  0xac   : > { %v432_v31 = vadd.f32 %v2909_v22, %v408_v34  ;;  %v2938_v34 = vmul.f32 0.53125, %v2555_v39 }
  0xae   : > { %731 = vrot.lane.b32.xlu2 %v2732_v13, %s2392_s16  ;;  %729 = vrot.lane.b32.xlu1 %v2734_v30, %s2392_s16 }
  0xaf   : > { %727 = vrot.lane.b32.xlu0 %v2736_v35, %s2392_s16 }
  0xb0   : > { %v483_v29 = vpop.permute.xlu2 %482  ;;  %v2881_v32 = vpop.permute.xlu1 %363 }
  0xb1   : > { %v2883_v37 = vpop.permute.xlu0 %359  ;;  %v517_v60 = vsel %vm514_vm4, %v483_v29, %v2649_v44  ;;  %v438_v29 = vadd.f32 %v2906_v62, %v414_v53  ;;  %v411_v53 = vmul.f32 0.46875, %v399_v15  ;;  %v2941_v62 = vmul.f32 0.53125, %v2622_v19 }
  0xb2   : > { %v529_v54 = vmul.f32 0.46875, %v517_v60 }
  0xb6   : > { %864 = vrot.lane.b32.xlu2 %v2496_v1, %s2392_s16  ;;  %862 = vrot.lane.b32.xlu1 %v2514_v11, %s2392_s16 }
  0xb7   : > { %860 = vrot.lane.b32.xlu0 %v2499_v2, %s2392_s16  ;;  %v2912_v2 = vmul.f32 0.53125, %v2649_v44 }
  0xb8   : > { %v489_v3 = vpop.permute.xlu2 %488  ;;  %v2895_v7 = vpop.permute.xlu1 %371 }
  0xb9   : > { %v2901_v12 = vpop.permute.xlu0 %369  ;;  %v541_v42 = vadd.f32 %v529_v54, %v2912_v2  ;;  %v520_v1 = vsel %vm514_vm4, %v489_v3, %v2685_v16 }
  0xba   : > { %v532_v54 = vmul.f32 0.46875, %v520_v1 }
  0xbe   : > { %870 = vrot.lane.b32.xlu2 %v2504_v5, %s2392_s16  ;;  %868 = vrot.lane.b32.xlu1 %v2493_v0, %s2392_s16  ;;  %v405_v0 = vsel %vm393_vm3, %v2622_v19, %v380_v33  ;;  %v450_v33 = vmul.f32 %v2774_v50, %v438_v29  ;;  %v2960_v29 = vmul.f32 0.53125, %v2732_v13 }
  0xbf   : > { %866 = vrot.lane.b32.xlu0 %v2507_v6, %s2392_s16  ;;  %v417_v44 = vmul.f32 0.46875, %v405_v0  ;;  %v435_v0 = vadd.f32 %v2938_v34, %v411_v53 }
  0xc0   : > { %v495_v60 = vpop.permute.xlu2 %494  ;;  %v2928_v57 = vpop.permute.xlu1 %377  ;;  %4686 = vst [vmem:[#allocation49_spill] sm:$0xff] %v2960_v29 }
  0xc1   : > { %v523_v6 = vsel %vm514_vm4, %v495_v60, %v2712_v52  ;;  %v2934_v5 = vpop.permute.xlu0 %375  ;;  %v444_v60 = vmul.f32 %v2785_v9, %v432_v31 }
  0xc2   : > { %v535_v11 = vmul.f32 0.46875, %v523_v6  ;;  %v2949_v6 = vmul.f32 0.53125, %v2685_v16 }
  0xc3   : > { %v553_v22 = vmul.f32 %v541_v42, %v444_v60 }
  0xc4   : > { %v547_v52 = vadd.f32 %v535_v11, %v2926_v43  ;;  %v441_v11 = vadd.f32 %v2941_v62, %v417_v44 }
  0xc6   : > { %v559_v15 = vmul.f32 %v547_v52, %v450_v33  ;;  %876 = vrot.lane.b32.xlu2 %v2532_v25, %s2392_s16  ;;  %874 = vrot.lane.b32.xlu1 %v2538_v27, %s2392_s16  ;;  %v544_v33 = vadd.f32 %v532_v54, %v2949_v6  ;;  %v453_v53 = vmul.f32 %v2768_v38, %v441_v11 }
  0xc7   : > { %872 = vrot.lane.b32.xlu0 %v2535_v26, %s2392_s16  ;;  %v447_v26 = vmul.f32 %v2757_v36, %v435_v0  ;;  %v398_v54 = vsel %vm393_vm3, %v2527_v23, %v2792_v14  ;;  %v395_v0 = vsel %vm393_vm3, %v2559_v41, %v2883_v37  ;;  %v401_v14 = vsel %vm393_vm3, %v2589_v58, %v2895_v7 }
  0xc8   : > { %v565_v3 = vadd.f32 %v559_v15, %v553_v22  ;;  %v501_v1 = vpop.permute.xlu2 %500  ;;  %v481_v52 = vpop.permute.xlu1 %480  ;;  %v400_v37 = vsel %vm393_vm3, %v2591_v59, %v2901_v12 }
  0xc9   : > { %v526_v31 = vsel %vm514_vm4, %v501_v1, %v2732_v13  ;;  %v479_v42 = vpop.permute.xlu0 %478  ;;  %v556_v22 = vmul.f32 %v544_v33, %v447_v26  ;;  %v2991_v33 = vmul.f32 0.53125, %v2527_v23  ;;  %v516_v7 = vsel %vm514_vm4, %v481_v52, %v2651_v48 }
  0xca   : > { %v571_v60 = vmul.f32 0.5, %v565_v3  ;;  %v538_v27 = vmul.f32 0.46875, %v526_v31  ;;  %v394_v3 = vsel %vm393_vm3, %v2540_v28, %v2857_v55  ;;  %v410_v31 = vmul.f32 0.46875, %v398_v54 }
  0xcb   : > { %4687 = vst [vmem:[#allocation50_spill] sm:$0xff] %v2991_v33  ;;  %v3000_v55 = vmul.f32 0.53125, %v2559_v41  ;;  %v413_v54 = vmul.f32 0.46875, %v401_v14  ;;  %v515_v12 = vsel %vm514_vm4, %v479_v42, %v2653_v49  ;;  %v412_v52 = vmul.f32 0.46875, %v400_v37 }
  0xcc   : > { %578 = vst.msk [vmem:[%s2795_s26 + $0x10] sm:$0xff] %vm575_vm2, %v571_v60  ;;  %v550_v44 = vadd.f32 %v538_v27, %v2960_v29  ;;  %v3024_v14 = vmul.f32 0.53125, %v2624_v20  ;;  %v528_v42 = vmul.f32 0.46875, %v516_v7  ;;  %v3035_v37 = vmul.f32 0.53125, %v2626_v21 }
  0xce   : > { %v562_v15 = vmul.f32 %v550_v44, %v453_v53  ;;  %882 = vrot.lane.b32.xlu2 %v2570_v46, %s2392_s16  ;;  %880 = vrot.lane.b32.xlu1 %v2567_v45, %s2392_s16  ;;  %v2997_v53 = vmul.f32 0.53125, %v2540_v28  ;;  %v407_v44 = vmul.f32 0.46875, %v395_v0  ;;  %v397_v0 = vsel %vm393_vm3, %v2557_v40, %v2881_v32  ;;  %4690 = vst [vmem:[#allocation53_spill] sm:$0xff] %v3024_v14 }
  0xcf   : > { %878 = vrot.lane.b32.xlu0 %v2573_v47, %s2392_s16  ;;  %v3018_v47 = vmul.f32 0.53125, %v2591_v59  ;;  %4692 = vst [vmem:[#allocation55_spill] sm:$0xff] %v3035_v37  ;;  %v527_v59 = vmul.f32 0.46875, %v515_v12  ;;  %v404_v12 = vsel %vm393_vm3, %v2624_v20, %v2928_v57 }
  0xd0   : > { %v568_v27 = vadd.f32 %v562_v15, %v556_v22  ;;  %v2982_v26 = vpop.permute.xlu2 %629  ;;  %v487_v11 = vpop.permute.xlu1 %486  ;;  %v406_v22 = vmul.f32 0.46875, %v394_v3  ;;  %v3005_v15 = vmul.f32 0.53125, %v2589_v58  ;;  %v3021_v3 = vadd.f32 %v2991_v33, %v410_v31 }
  0xd1   : > { %v485_v1 = vpop.permute.xlu0 %484  ;;  %4689 = vst [vmem:[#allocation52_spill] sm:$0xff] %v3018_v47  ;;  %v431_v32 = vadd.f32 %v3000_v55, %v407_v44  ;;  %v3038_v31 = vmul.f32 0.53125, %v2653_v49  ;;  %v409_v58 = vmul.f32 0.46875, %v397_v0  ;;  %v436_v46 = vadd.f32 %v3018_v47, %v412_v52 }
  0xd2   : > { %v574_v60 = vmul.f32 0.5, %v568_v27  ;;  %4688 = vst [vmem:[#allocation51_spill] sm:$0xff] %v3005_v15  ;;  %v3015_v27 = vmul.f32 0.53125, %v2557_v40  ;;  %v430_v7 = vadd.f32 %v2997_v53, %v406_v22  ;;  %v437_v33 = vadd.f32 %v3005_v15, %v413_v54 }
  0xd3   : > { %4693 = vst [vmem:[#allocation56_spill] sm:$0xff] %v3038_v31  ;;  %v3056_v22 = vmul.f32 0.53125, %v2716_v61  ;;  %v403_v54 = vsel %vm393_vm3, %v2626_v21, %v2934_v5  ;;  %v443_v47 = vmul.f32 %v2813_v51, %v431_v32  ;;  %v539_v57 = vadd.f32 %v527_v59, %v3038_v31 }
  0xd4   : > { %581 = vst.msk [vmem:[%s2795_s26 + $0x28] sm:$0xff] %vm575_vm2, %v574_v60  ;;  %v3027_v60 = vmul.f32 0.53125, %v2651_v48  ;;  %v449_v20 = vmul.f32 %v2824_v10, %v437_v33  ;;  %v416_v38 = vmul.f32 0.46875, %v404_v12  ;;  %v518_v5 = vsel %vm514_vm4, %v485_v1, %v2689_v18  ;;  %v4696_v33 = vld [vmem:[#allocation27_spill] sm:$0xff]  ;;  %v4697_v1 = vld [vmem:[#allocation28_spill] sm:$0xff] }
  0xd5   : > { %v3076_v31 = vmul.f32 0.53125, %v2687_v17 }
  0xd6   : > { %4691 = vst [vmem:[#allocation54_spill] sm:$0xff] %v3027_v60  ;;  %984 = vrot.lane.b32.xlu2 %v2598_v63, %s2393_s24  ;;  %982 = vrot.lane.b32.xlu1 %v2604_v4, %s2393_s24  ;;  %v3047_v4 = vmul.f32 0.53125, %v2714_v56  ;;  %v540_v15 = vadd.f32 %v528_v42, %v3027_v60  ;;  %v4695_v60 = vld [vmem:[#allocation42_spill] sm:$0xff] }
  0xd7   : > { %980 = vrot.lane.b32.xlu0 %v2608_v8, %s2393_s24 }
  0xd8   : > { %v3044_v45 = vpop.permute.xlu2 %635  ;;  %v493_v44 = vpop.permute.xlu1 %492  ;;  %v552_v59 = vmul.f32 %v540_v15, %v443_v47  ;;  %v433_v47 = vadd.f32 %v3015_v27, %v409_v58  ;;  %v440_v15 = vadd.f32 %v3024_v14, %v416_v38 }
  0xd9   : > { %v522_v8 = vsel %vm514_vm4, %v493_v44, %v2714_v56  ;;  %v491_v0 = vpop.permute.xlu0 %490  ;;  %v519_v44 = vsel %vm514_vm4, %v487_v11, %v2687_v17 }
  0xda   : > { %v534_v29 = vmul.f32 0.46875, %v522_v8  ;;  %v521_v52 = vsel %vm514_vm4, %v491_v0, %v2716_v61  ;;  %v4694_v8 = vld [vmem:[#allocation41_spill] sm:$0xff]  ;;  %v448_v0 = vmul.f32 %v4695_v60, %v436_v46  ;;  %v415_v61 = vmul.f32 0.46875, %v403_v54 }
  0xdb   : > { %v533_v56 = vmul.f32 0.46875, %v521_v52  ;;  %v442_v21 = vmul.f32 %v4694_v8, %v430_v7  ;;  %v531_v11 = vmul.f32 0.46875, %v519_v44  ;;  %v3083_v7 = vmul.f32 0.53125, %v2689_v18 }
  0xdc   : > { %v546_v42 = vadd.f32 %v534_v29, %v3047_v4  ;;  %v530_v46 = vmul.f32 0.46875, %v518_v5  ;;  %v3090_v44 = vmul.f32 0.53125, %v2734_v30 }
  0xdd   : > { %v545_v32 = vadd.f32 %v533_v56, %v3056_v22  ;;  %v551_v29 = vmul.f32 %v539_v57, %v442_v21  ;;  %v4698_v56 = vld [vmem:[#allocation22_spill] sm:$0xff]  ;;  %v439_v21 = vadd.f32 %v3035_v37, %v415_v61  ;;  %v543_v38 = vadd.f32 %v531_v11, %v3076_v31 }
  0xde   : > { %v558_v52 = vmul.f32 %v546_v42, %v449_v20  ;;  %990 = vrot.lane.b32.xlu2 %v4696_v33, %s2393_s24  ;;  %988 = vrot.lane.b32.xlu1 %v4697_v1, %s2393_s24  ;;  %v4702_v1 = vld [vmem:[#allocation44_spill] sm:$0xff] }
  0xdf   : > { %v557_v12 = vmul.f32 %v545_v32, %v448_v0  ;;  %986 = vrot.lane.b32.xlu0 %v4698_v56, %s2393_s24  ;;  %v3096_v0 = vmul.f32 0.53125, %v2736_v35  ;;  %v542_v56 = vadd.f32 %v530_v46, %v3083_v7  ;;  %v445_v11 = vmul.f32 %v4702_v1, %v433_v47  ;;  %v4706_v47 = vld [vmem:[#allocation33_spill] sm:$0xff] }
  0xe0   : > { %v564_v20 = vadd.f32 %v558_v52, %v552_v59  ;;  %v642_v54 = vpop.permute.xlu2 %641  ;;  %v499_v42 = vpop.permute.xlu1 %498 }
  0xe1   : > { %v563_v57 = vadd.f32 %v557_v12, %v551_v29  ;;  %v525_v5 = vsel %vm514_vm4, %v499_v42, %v2734_v30  ;;  %4699 = vst [vmem:[#allocation41_spill] sm:$0xff] %v3096_v0  ;;  %v497_v58 = vpop.permute.xlu0 %496  ;;  %v4700_v29 = vld [vmem:[#allocation43_spill] sm:$0xff]  ;;  %v4701_v42 = vld [vmem:[#allocation45_spill] sm:$0xff] }
  0xe2   : > { %v570_v32 = vmul.f32 0.5, %v564_v20  ;;  %v537_v59 = vmul.f32 0.46875, %v525_v5  ;;  %v524_v52 = vsel %vm514_vm4, %v497_v58, %v2736_v35  ;;  %v446_v12 = vmul.f32 %v4700_v29, %v3021_v3  ;;  %v4703_v20 = vld [vmem:[#allocation46_spill] sm:$0xff]  ;;  %v4705_v3 = vld [vmem:[#allocation32_spill] sm:$0xff] }
  0xe3   : > { %v569_v14 = vmul.f32 0.5, %v563_v57  ;;  %v536_v61 = vmul.f32 0.46875, %v524_v52  ;;  %v452_v30 = vmul.f32 %v4701_v42, %v440_v15  ;;  %v451_v5 = vmul.f32 %v4703_v20, %v439_v21  ;;  %v4704_v52 = vld [vmem:[#allocation30_spill] sm:$0xff] }
  0xe4   : > { %577 = vst.msk [vmem:[%s2795_s26 + $0x8] sm:$0xff] %vm575_vm2, %v570_v32  ;;  %v549_v37 = vadd.f32 %v537_v59, %v3090_v44  ;;  %v555_v46 = vmul.f32 %v543_v38, %v446_v12  ;;  %v554_v15 = vmul.f32 %v542_v56, %v445_v11  ;;  %v663_v38 = vsel %vm514_vm4, %v2982_v26, %v2529_v24  ;;  %v4707_v56 = vld [vmem:[#allocation34_spill] sm:$0xff]  ;;  %v4708_v11 = vld [vmem:[#allocation35_spill] sm:$0xff] }
  0xe5   : > { %576 = vst.msk [vmem:[%s2795_s26] sm:$0xff] %vm575_vm2, %v569_v14  ;;  %v548_v58 = vadd.f32 %v536_v61, %v3096_v0  ;;  %v675_v0 = vmul.f32 0.46875, %v663_v38 }
  0xe6   : > { %v561_v57 = vmul.f32 %v549_v37, %v452_v30  ;;  %996 = vrot.lane.b32.xlu2 %v4704_v52, %s2393_s24  ;;  %994 = vrot.lane.b32.xlu1 %v4705_v3, %s2393_s24 }
  0xe7   : > { %v560_v32 = vmul.f32 %v548_v58, %v451_v5  ;;  %992 = vrot.lane.b32.xlu0 %v4706_v47, %s2393_s24  ;;  %v4709_v5 = vld [vmem:[#allocation31_spill] sm:$0xff]  ;;  %v4710_v58 = vld [vmem:[#allocation48_spill] sm:$0xff] }
  0xe8   : > { %v567_v21 = vadd.f32 %v561_v57, %v555_v46  ;;  %v648_v59 = vpop.permute.xlu2 %647  ;;  %v628_v14 = vpop.permute.xlu1 %627  ;;  %v687_v24 = vadd.f32 %v675_v0, %v4710_v58  ;;  %v666_v57 = vsel %vm514_vm4, %v3044_v45, %v2555_v39  ;;  %v4713_v0 = vld [vmem:[#allocation13_spill] sm:$0xff]  ;;  %v4714_v58 = vld [vmem:[#allocation10_spill] sm:$0xff] }
  0xe9   : > { %v566_v30 = vadd.f32 %v560_v32, %v554_v15  ;;  %v626_v37 = vpop.permute.xlu0 %625  ;;  %v4711_v15 = vld [vmem:[#allocation29_spill] sm:$0xff] }
  0xea   : > { %v573_v61 = vmul.f32 0.5, %v567_v21 }
  0xeb   : > { %v572_v12 = vmul.f32 0.5, %v566_v30  ;;  %v699_v30 = vmul.f32 %v2785_v9, %v687_v24 }
  0xec   : > { %580 = vst.msk [vmem:[%s2795_s26 + $0x20] sm:$0xff] %vm575_vm2, %v573_v61  ;;  %v678_v61 = vmul.f32 0.46875, %v666_v57 }
  0xed   : > { %579 = vst.msk [vmem:[%s2795_s26 + $0x18] sm:$0xff] %vm575_vm2, %v572_v12 }
  0xee   : > { %1002 = vrot.lane.b32.xlu2 %v4707_v56, %s2393_s24  ;;  %1000 = vrot.lane.b32.xlu1 %v4708_v11, %s2393_s24  ;;  %v690_v39 = vadd.f32 %v678_v61, %v2938_v34  ;;  %v4716_v34 = vld [vmem:[#allocation11_spill] sm:$0xff]  ;;  %v4717_v61 = vld [vmem:[#allocation8_spill] sm:$0xff] }
  0xef   : > { %998 = vrot.lane.b32.xlu0 %v4709_v5, %s2393_s24  ;;  %v4712_v5 = vld [vmem:[#allocation9_spill] sm:$0xff] }
  0xf0   : > { %v714_v26 = vpop.permute.xlu2 %713  ;;  %v634_v46 = vpop.permute.xlu1 %633 }
  0xf1   : > { %v747_v32 = vsel %vm393_vm3, %v4711_v15, %v714_v26  ;;  %v632_v21 = vpop.permute.xlu0 %631  ;;  %v4715_v15 = vld [vmem:[#allocation19_spill] sm:$0xff] }
  0xf2   : > { %v759_v38 = vmul.f32 0.46875, %v747_v32  ;;  %v669_v24 = vsel %vm514_vm4, %v642_v54, %v4715_v15  ;;  %v4718_v54 = vld [vmem:[#allocation12_spill] sm:$0xff] }
  0xf4   : > { %v771_v12 = vadd.f32 %v759_v38, %v2912_v2  ;;  %v702_v38 = vmul.f32 %v2757_v36, %v690_v39  ;;  %v662_v39 = vsel %vm514_vm4, %v628_v14, %v2559_v41 }
  0xf6   : > { %v783_v11 = vmul.f32 %v771_v12, %v699_v30  ;;  %1130 = vrot.lane.b32.xlu2 %v4712_v5, %s2393_s24  ;;  %1128 = vrot.lane.b32.xlu1 %v4713_v0, %s2393_s24  ;;  %v681_v30 = vmul.f32 0.46875, %v669_v24  ;;  %v661_v24 = vsel %vm514_vm4, %v626_v37, %v2540_v28  ;;  %v1091_v28 = vmul.f32 %v2774_v50, %v2532_v25 }
  0xf7   : > { %1126 = vrot.lane.b32.xlu0 %v4714_v58, %s2393_s24  ;;  %v673_v41 = vmul.f32 0.46875, %v661_v24 }
  0xf8   : > { %v720_v45 = vpop.permute.xlu2 %719  ;;  %v3147_v26 = vpop.permute.xlu1 %639 }
  0xf9   : > { %v750_v2 = vsel %vm393_vm3, %v2685_v16, %v720_v45  ;;  %v3153_v57 = vpop.permute.xlu0 %637  ;;  %v4719_v16 = vld [vmem:[#allocation47_spill] sm:$0xff]  ;;  %v672_v45 = vsel %vm514_vm4, %v648_v59, %v2622_v19  ;;  %v674_v19 = vmul.f32 0.46875, %v662_v39 }
  0xfa   : > { %v762_v32 = vmul.f32 0.46875, %v750_v2  ;;  %v693_v58 = vadd.f32 %v681_v30, %v4719_v16  ;;  %v4720_v2 = vld [vmem:[#allocation36_spill] sm:$0xff]  ;;  %v1085_v30 = vmul.f32 %v2785_v9, %v4712_v5  ;;  %v4721_v16 = vld [vmem:[#allocation15_spill] sm:$0xff] }
  0xfb   : > { %v686_v5 = vadd.f32 %v674_v19, %v3000_v55 }
  0xfc   : > { %v774_v12 = vadd.f32 %v762_v32, %v2949_v6  ;;  %v705_v59 = vmul.f32 %v2774_v50, %v693_v58  ;;  %v4722_v58 = vld [vmem:[#allocation14_spill] sm:$0xff]  ;;  %v665_v50 = vsel %vm514_vm4, %v634_v46, %v2527_v23 }
  0xfd   : > { %v677_v19 = vmul.f32 0.46875, %v665_v50 }
  0xfe   : > { %v3157_v0 = vmul.f32 %v774_v12, %v702_v38  ;;  %1136 = vrot.lane.b32.xlu2 %v4716_v34, %s2393_s24  ;;  %1134 = vrot.lane.b32.xlu1 %v4717_v61, %s2393_s24  ;;  %v684_v61 = vmul.f32 0.46875, %v672_v45  ;;  %v685_v45 = vadd.f32 %v673_v41, %v2997_v53  ;;  %v1088_v53 = vmul.f32 %v2757_v36, %v4716_v34  ;;  %v4724_v36 = vld [vmem:[#allocation49_spill] sm:$0xff] }
  0xff   : > { %1132 = vrot.lane.b32.xlu0 %v4718_v54, %s2393_s24  ;;  %v1097_v54 = vmul.f32 %v2598_v63, %v1085_v30 }
 0x100   : > { %v726_v6 = vpop.permute.xlu2 %725  ;;  %v3170_v15 = vpop.permute.xlu1 %645  ;;  %v696_v9 = vadd.f32 %v684_v61, %v2941_v62 }
 0x101   : > { %v753_v32 = vsel %vm393_vm3, %v4720_v2, %v726_v6  ;;  %v3176_v38 = vpop.permute.xlu0 %643 }
 0x102   : > { %v765_v12 = vmul.f32 0.46875, %v753_v32 }
 0x104   : > { %v777_v14 = vadd.f32 %v765_v12, %v2926_v43  ;;  %v1103_v43 = vmul.f32 %v4704_v52, %v1091_v28  ;;  %v698_v12 = vmul.f32 %v2813_v51, %v686_v5 }
 0x106   : > { %v789_v37 = vmul.f32 %v777_v14, %v705_v59  ;;  %1142 = vrot.lane.b32.xlu2 %v2532_v25, %s2393_s24  ;;  %1140 = vrot.lane.b32.xlu1 %v4721_v16, %s2393_s24  ;;  %v664_v25 = vsel %vm514_vm4, %v632_v21, %v2557_v40  ;;  %v1109_v32 = vadd.f32 %v1103_v43, %v1097_v54  ;;  %v4723_v21 = vld [vmem:[#allocation40_spill] sm:$0xff]  ;;  %v4725_v59 = vld [vmem:[#allocation54_spill] sm:$0xff] }
 0x107   : > { %1138 = vrot.lane.b32.xlu0 %v4722_v58, %s2393_s24  ;;  %v676_v14 = vmul.f32 0.46875, %v664_v25  ;;  %v4726_v54 = vld [vmem:[#allocation56_spill] sm:$0xff]  ;;  %v4730_v25 = vld [vmem:[#allocation50_spill] sm:$0xff] }
 0x108   : > { %v795_v39 = vadd.f32 %v789_v37, %v783_v11  ;;  %v732_v6 = vpop.permute.xlu2 %731  ;;  %v712_v24 = vpop.permute.xlu1 %711  ;;  %v708_v11 = vmul.f32 %v4723_v21, %v696_v9  ;;  %v1115_v61 = vmul.f32 0.5, %v1109_v32  ;;  %v4727_v37 = vld [vmem:[#allocation17_spill] sm:$0xff]  ;;  %v4728_v58 = vld [vmem:[#allocation16_spill] sm:$0xff] }
 0x109   : > { %v756_v62 = vsel %vm393_vm3, %v2732_v13, %v732_v6  ;;  %v746_v55 = vsel %vm393_vm3, %v2651_v48, %v712_v24  ;;  %v710_v2 = vpop.permute.xlu0 %709  ;;  %v697_v48 = vmul.f32 %v4694_v8, %v685_v45  ;;  %v1094_v16 = vmul.f32 %v4723_v21, %v4727_v37  ;;  %v4729_v45 = vld [vmem:[#allocation18_spill] sm:$0xff] }
 0x10a   : > { %v801_v30 = vmul.f32 0.5, %v795_v39  ;;  %v768_v23 = vmul.f32 0.46875, %v756_v62  ;;  %v758_v46 = vmul.f32 0.46875, %v746_v55  ;;  %v745_v40 = vsel %vm393_vm3, %v2653_v49, %v710_v2  ;;  %2144 = vst.msk [vmem:[%s2795_s26 + $0xd0] sm:$0xff] %vm575_vm2, %v1115_v61  ;;  %v4731_v2 = vld [vmem:[#allocation20_spill] sm:$0xff] }
 0x10b   : > { %v757_v13 = vmul.f32 0.46875, %v745_v40  ;;  %v1100_v49 = vmul.f32 %v4696_v33, %v1088_v53  ;;  %v1106_v50 = vmul.f32 %v4707_v56, %v1094_v16  ;;  %v689_v39 = vadd.f32 %v677_v19, %v4730_v25 }
 0x10c   : > { %2108 = vst.msk [vmem:[%s2795_s26 + $0x70] sm:$0xff] %vm575_vm2, %v801_v30  ;;  %v780_v34 = vadd.f32 %v768_v23, %v4724_v36  ;;  %v770_v41 = vadd.f32 %v758_v46, %v4725_v59  ;;  %v688_v55 = vadd.f32 %v676_v14, %v3015_v27  ;;  %v668_v53 = vsel %vm514_vm4, %v3147_v26, %v4731_v2  ;;  %v4732_v23 = vld [vmem:[#allocation21_spill] sm:$0xff]  ;;  %v4735_v36 = vld [vmem:[#allocation51_spill] sm:$0xff] }
 0x10d   : > { %v769_v28 = vadd.f32 %v757_v13, %v4726_v54  ;;  %v1112_v56 = vadd.f32 %v1106_v50, %v1100_v49  ;;  %v680_v26 = vmul.f32 0.46875, %v668_v53  ;;  %v4737_v54 = vld [vmem:[#allocation25_spill] sm:$0xff] }
 0x10e   : > { %v792_v9 = vmul.f32 %v780_v34, %v708_v11  ;;  %v3220_v5 = vmul.f32 %v770_v41, %v698_v12  ;;  %1148 = vrot.lane.b32.xlu2 %v4727_v37, %s2393_s24  ;;  %1146 = vrot.lane.b32.xlu1 %v4728_v58, %s2393_s24  ;;  %v701_v12 = vmul.f32 %v4700_v29, %v689_v39  ;;  %v4736_v41 = vld [vmem:[#allocation52_spill] sm:$0xff]  ;;  %v4739_v37 = vld [vmem:[#allocation37_spill] sm:$0xff] }
 0x10f   : > { %v3226_v43 = vmul.f32 %v769_v28, %v697_v48  ;;  %1144 = vrot.lane.b32.xlu0 %v4729_v45, %s2393_s24  ;;  %v1118_v11 = vmul.f32 0.5, %v1112_v56  ;;  %v700_v13 = vmul.f32 %v4702_v1, %v688_v55  ;;  %v692_v34 = vadd.f32 %v680_v26, %v4735_v36  ;;  %v4738_v28 = vld [vmem:[#allocation26_spill] sm:$0xff]  ;;  %v3279_v39 = vld [vmem:[%s2486_s23 + $0x8] sm:$0xff] }
 0x110   : > { %v798_v6 = vadd.f32 %v792_v9, %v3157_v0  ;;  %v3233_v24 = vpop.permute.xlu2 %864  ;;  %v718_v62 = vpop.permute.xlu1 %717  ;;  %v667_v0 = vsel %vm514_vm4, %v3153_v57, %v4732_v23  ;;  %v670_v49 = vsel %vm514_vm4, %v3176_v38, %v4738_v28  ;;  %v4740_v45 = vld [vmem:[#allocation38_spill] sm:$0xff]  ;;  %4741 = vst [vmem:[#allocation42_spill] sm:$0xff] %v3279_v39 }
 0x111   : > { %v749_v32 = vsel %vm393_vm3, %v2687_v17, %v718_v62  ;;  %v716_v30 = vpop.permute.xlu0 %715  ;;  %v679_v61 = vmul.f32 0.46875, %v667_v0  ;;  %2147 = vst.msk [vmem:[%s2795_s26 + $0xe8] sm:$0xff] %vm575_vm2, %v1118_v11  ;;  %v682_v62 = vmul.f32 0.46875, %v670_v49  ;;  %v3297_v0 = vld [vmem:[%s2486_s23 + $0xd8] sm:$0xff] }
 0x112   : > { %v804_v46 = vmul.f32 0.5, %v798_v6  ;;  %v761_v40 = vmul.f32 0.46875, %v749_v32  ;;  %v748_v21 = vsel %vm393_vm3, %v2689_v18, %v716_v30  ;;  %v4733_v18 = vld [vmem:[#allocation23_spill] sm:$0xff]  ;;  %v704_v6 = vmul.f32 %v2824_v10, %v692_v34  ;;  %v3288_v32 = vld [vmem:[%s2486_s23] sm:$0xff] }
 0x113   : > { %v760_v27 = vmul.f32 0.46875, %v748_v21  ;;  %v691_v14 = vadd.f32 %v679_v61, %v4736_v41  ;;  %4742 = vst [vmem:[#allocation27_spill] sm:$0xff] %v3288_v32  ;;  %v1083_v30 = vmul.f32 %v3288_v32, %v4694_v8  ;;  %v4746_v21 = vld [vmem:[#allocation53_spill] sm:$0xff]  ;;  %v4747_v11 = vld [vmem:[#allocation55_spill] sm:$0xff] }
 0x114   : > { %2111 = vst.msk [vmem:[%s2795_s26 + $0x88] sm:$0xff] %vm575_vm2, %v804_v46  ;;  %v773_v17 = vadd.f32 %v761_v40, %v3076_v31  ;;  %v4734_v31 = vld [vmem:[#allocation24_spill] sm:$0xff]  ;;  %v3306_v46 = vld [vmem:[%s2486_s23 + $0x38] sm:$0xff] }
 0x115   : > { %v772_v48 = vadd.f32 %v760_v27, %v3083_v7  ;;  %v703_v2 = vmul.f32 %v4695_v60, %v691_v14  ;;  %4744 = vst [vmem:[#allocation22_spill] sm:$0xff] %v3306_v46  ;;  %v1090_v8 = vmul.f32 %v3306_v46, %v2824_v10  ;;  %v3331_v14 = vld [vmem:[%s2486_s23 + $0x10] sm:$0xff] }
 0x116   : > { %v3254_v57 = vmul.f32 %v773_v17, %v701_v12  ;;  %1214 = vrot.lane.b32.xlu2 %v2598_v63, %s2392_s16  ;;  %1212 = vrot.lane.b32.xlu1 %v4733_v18, %s2392_s16  ;;  %v671_v63 = vsel %vm514_vm4, %v3170_v15, %v4737_v54  ;;  %v1084_v15 = vmul.f32 %v3279_v39, %v2813_v51  ;;  %v4743_v51 = vld [vmem:[#allocation28_spill] sm:$0xff]  ;;  %v3334_v54 = vld [vmem:[%s2486_s23 + $0x18] sm:$0xff] }
 0x117   : > { %v3260_v19 = vmul.f32 %v772_v48, %v700_v13  ;;  %1210 = vrot.lane.b32.xlu0 %v4734_v31, %s2392_s16  ;;  %v683_v38 = vmul.f32 0.46875, %v671_v63  ;;  %v694_v12 = vadd.f32 %v682_v62, %v4747_v11  ;;  %v4748_v48 = vld [vmem:[#allocation39_spill] sm:$0xff]  ;;  %v1102_v36 = vmul.f32 %v4705_v3, %v1090_v8 }
 0x118   : > { %v3265_v59 = vpop.permute.xlu2 %870  ;;  %v724_v7 = vpop.permute.xlu1 %723  ;;  %v1353_v62 = vrot.slane %v3334_v54, 1  ;;  %v3398_v11 = vld [vmem:[%s2486_s23 + $0x18] sm:$0xff] }
 0x119   : > { %v752_v16 = vsel %vm393_vm3, %v4739_v37, %v724_v7  ;;  %v722_v9 = vpop.permute.xlu0 %721  ;;  %v695_v27 = vadd.f32 %v683_v38, %v4746_v21  ;;  %4755 = vst [vmem:[#allocation33_spill] sm:$0xff] %v3398_v11 }
 0x11a   : > { %v764_v58 = vmul.f32 0.46875, %v752_v16  ;;  %v751_v50 = vsel %vm393_vm3, %v4740_v45, %v722_v9  ;;  %v1314_v16 = vld [vmem:[%s2486_s23 + $0x8] sm:$0xff]  ;;  %v3347_v45 = vld [vmem:[%s2486_s23] sm:$0xff] }
 0x11b   : > { %v763_v25 = vmul.f32 0.46875, %v751_v50  ;;  %v707_v49 = vmul.f32 %v4701_v42, %v695_v27  ;;  %v4749_v9 = vld [vmem:[#allocation41_spill] sm:$0xff]  ;;  %v1349_v8 = vrot.slane %v3347_v45, 1 }
 0x11c   : > { %v776_v55 = vadd.f32 %v764_v58, %v3047_v4  ;;  %v3302_v4 = vld [vmem:[%s2486_s23 + $0xc8] sm:$0xff] }
 0x11d   : > { %v775_v53 = vadd.f32 %v763_v25, %v3056_v22  ;;  %v1096_v22 = vmul.f32 %v3302_v4, %v1084_v15  ;;  %v3350_v15 = vld [vmem:[%s2486_s23 + $0x10] sm:$0xff] }
 0x11e   : > { %v788_v56 = vmul.f32 %v776_v55, %v704_v6  ;;  %1220 = vrot.lane.b32.xlu2 %v4696_v33, %s2392_s16  ;;  %1218 = vrot.lane.b32.xlu1 %v4743_v51, %s2392_s16  ;;  %v3311_v33 = vld [vmem:[%s2486_s23 + $0x30] sm:$0xff]  ;;  %v3353_v6 = vmul.f32 0.53125, %v3350_v15  ;;  %v3362_v55 = vld [vmem:[%s2486_s23 + $0x28] sm:$0xff] }
 0x11f   : > { %v787_v23 = vmul.f32 %v775_v53, %v703_v2  ;;  %1216 = vrot.lane.b32.xlu0 %v3297_v0, %s2392_s16  ;;  %4745 = vst [vmem:[#allocation43_spill] sm:$0xff] %v3311_v33  ;;  %v1089_v40 = vmul.f32 %v3311_v33, %v4695_v60  ;;  %v3324_v60 = vld [vmem:[%s2486_s23 + $0xc0] sm:$0xff]  ;;  %v1108_v63 = vadd.f32 %v1102_v36, %v1096_v22  ;;  %v3365_v2 = vmul.f32 0.53125, %v3362_v55 }
 0x120   : > { %v794_v26 = vadd.f32 %v788_v56, %v3220_v5  ;;  %v3318_v17 = vpop.permute.xlu2 %876  ;;  %v730_v13 = vpop.permute.xlu1 %729  ;;  %v1095_v31 = vmul.f32 %v3324_v60, %v1083_v30  ;;  %v1350_v30 = vrot.slane %v1314_v16, 1  ;;  %v3380_v22 = vld [vmem:[%s2486_s23 + $0x20] sm:$0xff] }
 0x121   : > { %v793_v61 = vadd.f32 %v787_v23, %v3226_v43  ;;  %v755_v10 = vsel %vm393_vm3, %v4748_v48, %v730_v13  ;;  %v728_v18 = vpop.permute.xlu0 %727  ;;  %v1101_v28 = vmul.f32 %v4706_v47, %v1089_v40  ;;  %v1114_v50 = vmul.f32 0.5, %v1108_v63  ;;  %4750 = vst [vmem:[#allocation45_spill] sm:$0xff] %v3365_v2  ;;  %v3386_v40 = vld [vmem:[%s2486_s23 + $0x40] sm:$0xff] }
 0x122   : > { %v800_v34 = vmul.f32 0.5, %v794_v26  ;;  %v767_v5 = vmul.f32 0.46875, %v755_v10  ;;  %v754_v7 = vsel %vm393_vm3, %v2736_v35, %v728_v18  ;;  %v706_v35 = vmul.f32 %v4703_v20, %v694_v12  ;;  %4751 = vst [vmem:[#allocation44_spill] sm:$0xff] %v3380_v22  ;;  %v3405_v26 = vld [vmem:[%s2486_s23 + $0x58] sm:$0xff]  ;;  %v3424_v36 = vld [vmem:[%s2486_s23 + $0xe0] sm:$0xff] }
 0x123   : > { %v799_v43 = vmul.f32 0.5, %v793_v61  ;;  %v766_v41 = vmul.f32 0.46875, %v754_v7  ;;  %v1107_v25 = vadd.f32 %v1101_v28, %v1095_v31  ;;  %2143 = vst.msk [vmem:[%s2795_s26 + $0xc8] sm:$0xff] %vm575_vm2, %v1114_v50  ;;  %v3389_v21 = vmul.f32 0.53125, %v3386_v40  ;;  %v1318_v31 = vld [vmem:[%s2486_s23 + $0x28] sm:$0xff]  ;;  %v1317_v7 = vld [vmem:[%s2486_s23 + $0x20] sm:$0xff] }
 0x124   : > { %2107 = vst.msk [vmem:[%s2795_s26 + $0x68] sm:$0xff] %vm575_vm2, %v800_v34  ;;  %v779_v37 = vadd.f32 %v767_v5, %v3090_v44  ;;  %v1352_v44 = vrot.slane %v3331_v14, 1  ;;  %v3411_v13 = vmul.f32 0.53125, %v3288_v32  ;;  %v901_v48 = vsel %vm393_vm3, %v3362_v55, %v3265_v59 }
 0x125   : > { %2106 = vst.msk [vmem:[%s2795_s26 + $0x60] sm:$0xff] %vm575_vm2, %v799_v43  ;;  %v778_v58 = vadd.f32 %v766_v41, %v4749_v9  ;;  %v1379_v18 = vsel %vm284_vm1, %v1350_v30, %v1314_v16  ;;  %v1351_v5 = vsel %vm284_vm1, %v1349_v8, %v1350_v30  ;;  %v3430_v43 = vld [vmem:[%s2486_s23 + $0x50] sm:$0xff]  ;;  %v3435_v41 = vld [vmem:[%s2486_s23 + $0x48] sm:$0xff]  ;;  %v913_v9 = vmul.f32 0.46875, %v901_v48 }
 0x126   : > { %v791_v38 = vmul.f32 %v779_v37, %v707_v49  ;;  %1226 = vrot.lane.b32.xlu2 %v4704_v52, %s2392_s16  ;;  %1224 = vrot.lane.b32.xlu1 %v4705_v3, %s2392_s16  ;;  %v1113_v52 = vmul.f32 0.5, %v1107_v25  ;;  %v898_v3 = vsel %vm393_vm3, %v3350_v15, %v3233_v24  ;;  %4752 = vst [vmem:[#allocation46_spill] sm:$0xff] %v3386_v40  ;;  %v1327_v49 = vmul.f32 0.53125, %v3331_v14 }
 0x127   : > { %v790_v53 = vmul.f32 %v778_v58, %v706_v35  ;;  %1222 = vrot.lane.b32.xlu0 %v4706_v47, %s2392_s16  ;;  %v1087_v47 = vmul.f32 %v3380_v22, %v4700_v29  ;;  %4753 = vst [vmem:[#allocation30_spill] sm:$0xff] %v3389_v21  ;;  %v1086_v29 = vmul.f32 %v3398_v11, %v4702_v1  ;;  %v910_v1 = vmul.f32 0.46875, %v898_v3  ;;  %v3444_v58 = vld [vmem:[%s2486_s23 + $0x118] sm:$0xff] }
 0x128   : > { %v797_v56 = vadd.f32 %v791_v38, %v3254_v57  ;;  %v3375_v51 = vpop.permute.xlu2 %882  ;;  %v3377_v23 = vpop.permute.xlu1 %862  ;;  %v3393_v57 = vmul.f32 0.53125, %v3279_v39  ;;  %2142 = vst.msk [vmem:[%s2795_s26 + $0xc0] sm:$0xff] %vm575_vm2, %v1113_v52  ;;  %v1354_v61 = vsel %vm284_vm1, %v1352_v44, %v1353_v62  ;;  %v1093_v59 = vmul.f32 %v3430_v43, %v4701_v42  ;;  %v3449_v42 = vld [vmem:[%s2486_s23 + $0x110] sm:$0xff]  ;;  %v3455_v38 = vld [vmem:[%s2486_s23 + $0x108] sm:$0xff] }
 0x129   : > { %v796_v24 = vadd.f32 %v790_v53, %v3260_v19  ;;  %v3395_v27 = vpop.permute.xlu0 %860  ;;  %4756 = vst [vmem:[#allocation34_spill] sm:$0xff] %v3405_v26  ;;  %v3408_v19 = vmul.f32 0.53125, %v3405_v26  ;;  %v1099_v34 = vmul.f32 %v3424_v36, %v1087_v47  ;;  %v1092_v63 = vmul.f32 %v3435_v41, %v4703_v20  ;;  %v3465_v52 = vld [vmem:[%s2486_s23 + $0xd0] sm:$0xff] }
 0x12a   : > { %4754 = vst [vmem:[#allocation32_spill] sm:$0xff] %v3393_v57  ;;  %v803_v12 = vmul.f32 0.5, %v797_v56  ;;  %v1098_v28 = vmul.f32 %v3297_v0, %v1086_v29  ;;  %v1387_v37 = vmul.f32 0.46875, %v1354_v61  ;;  %v1326_v35 = vmul.f32 0.53125, %v1314_v16 }
 0x12b   : > { %4757 = vst [vmem:[#allocation35_spill] sm:$0xff] %v3408_v19  ;;  %v802_v10 = vmul.f32 0.5, %v796_v24  ;;  %v1386_v20 = vmul.f32 0.46875, %v1379_v18  ;;  %v1356_v50 = vrot.slane %v1318_v31, 1  ;;  %v1105_v25 = vmul.f32 %v3449_v42, %v1093_v59  ;;  %v3489_v59 = vld [vmem:[%s2486_s23 + $0x48] sm:$0xff] }
 0x12c   : > { %4758 = vst [vmem:[#allocation31_spill] sm:$0xff] %v3411_v13  ;;  %v1325_v14 = vmul.f32 0.53125, %v3347_v45  ;;  %v1385_v16 = vmul.f32 0.46875, %v1351_v5  ;;  %v1355_v44 = vrot.slane %v1317_v7, 1  ;;  %v1104_v53 = vmul.f32 %v3455_v38, %v1092_v63  ;;  %v1321_v5 = vld [vmem:[%s2486_s23 + $0x40] sm:$0xff] }
 0x12d   : > { %2110 = vst.msk [vmem:[%s2795_s26 + $0x80] sm:$0xff] %vm575_vm2, %v803_v12  ;;  %v904_v30 = vsel %vm393_vm3, %v3386_v40, %v3318_v17  ;;  %v3468_v3 = vmul.f32 0.53125, %v3465_v52  ;;  %v3471_v47 = vmul.f32 0.53125, %v3380_v22  ;;  %v1111_v8 = vadd.f32 %v1105_v25, %v1099_v34  ;;  %v3561_v40 = vld [vmem:[%s2486_s23 + $0xa0] sm:$0xff] }
 0x12e   : > { %4759 = vst [vmem:[#allocation48_spill] sm:$0xff] %v3430_v43  ;;  %1232 = vrot.lane.b32.xlu2 %v3444_v58, %s2392_s16  ;;  %1230 = vrot.lane.b32.xlu1 %v3449_v42, %s2392_s16  ;;  %v934_v24 = vadd.f32 %v3353_v6, %v910_v1  ;;  %v3477_v29 = vmul.f32 0.53125, %v3398_v11  ;;  %v3481_v12 = vadd.f32 %v1387_v37, %v1327_v49  ;;  %v916_v1 = vmul.f32 0.46875, %v904_v30 }
 0x12f   : > { %4760 = vst [vmem:[#allocation29_spill] sm:$0xff] %v3435_v41  ;;  %1228 = vrot.lane.b32.xlu0 %v3455_v38, %s2392_s16  ;;  %v1110_v61 = vadd.f32 %v1104_v53, %v1098_v28  ;;  %v937_v48 = vadd.f32 %v3365_v2, %v913_v9  ;;  %v1381_v18 = vsel %vm284_vm1, %v1356_v50, %v1318_v31  ;;  %v1117_v34 = vmul.f32 0.5, %v1111_v8  ;;  %v1320_v28 = vld [vmem:[%s2486_s23 + $0x38] sm:$0xff] }
 0x130   : > { %2109 = vst.msk [vmem:[%s2795_s26 + $0x78] sm:$0xff] %vm575_vm2, %v802_v10  ;;  %v985_v56 = vpop.permute.xlu2 %984  ;;  %v3473_v45 = vpop.permute.xlu1 %868  ;;  %v3484_v10 = vadd.f32 %v1386_v20, %v1326_v35  ;;  %v3491_v63 = vadd.f32 %v1385_v16, %v1325_v14  ;;  %v1357_v49 = vsel %vm284_vm1, %v1355_v44, %v1356_v50  ;;  %v907_v35 = vsel %vm393_vm3, %v3405_v26, %v3375_v51 }
 0x131   : > { %4761 = vst [vmem:[#allocation9_spill] sm:$0xff] %v3471_v47  ;;  %v3479_v17 = vpop.permute.xlu0 %866  ;;  %v1116_v37 = vmul.f32 0.5, %v1110_v61  ;;  %v897_v9 = vsel %vm393_vm3, %v3279_v39, %v3377_v23  ;;  %v1330_v20 = vmul.f32 0.53125, %v1318_v31  ;;  %v1380_v25 = vsel %vm284_vm1, %v1353_v62, %v3334_v54  ;;  %v1319_v23 = vld [vmem:[%s2486_s23 + $0x30] sm:$0xff] }
 0x132   : > { %4762 = vst [vmem:[#allocation13_spill] sm:$0xff] %v3477_v29  ;;  %v896_v50 = vsel %vm393_vm3, %v3288_v32, %v3395_v27  ;;  %v1329_v14 = vmul.f32 0.53125, %v1317_v7  ;;  %v1361_v51 = vrot.slane %v1321_v5, 1  ;;  %v1390_v62 = vmul.f32 0.46875, %v1381_v18  ;;  %v3523_v61 = vld [vmem:[%s2486_s23 + $0x70] sm:$0xff]  ;;  %v3529_v18 = vld [vmem:[%s2486_s23 + $0xe8] sm:$0xff] }
 0x133   : > { %4763 = vst [vmem:[#allocation10_spill] sm:$0xff] %v3481_v12  ;;  %v1389_v31 = vmul.f32 0.46875, %v1357_v49  ;;  %v1328_v27 = vmul.f32 0.53125, %v3334_v54  ;;  %v1359_v7 = vrot.slane %v1320_v28, 1  ;;  %v940_v44 = vadd.f32 %v3389_v21, %v916_v1 }
 0x134   : > { %4764 = vst [vmem:[#allocation19_spill] sm:$0xff] %v3484_v10  ;;  %v919_v53 = vmul.f32 0.46875, %v907_v35  ;;  %v909_v30 = vmul.f32 0.46875, %v897_v9  ;;  %v1388_v8 = vmul.f32 0.46875, %v1380_v25  ;;  %v3532_v54 = vmul.f32 0.53125, %v3529_v18  ;;  %v3537_v9 = vld [vmem:[%s2486_s23 + $0x88] sm:$0xff] }
 0x135   : > { %4765 = vst [vmem:[#allocation11_spill] sm:$0xff] %v3491_v63  ;;  %v1358_v35 = vrot.slane %v1319_v23, 1  ;;  %v3540_v25 = vmul.f32 %v3537_v9, %v937_v48  ;;  %v4771_v32 = vrot.slane %v3489_v59, 1  ;;  %v1018_v26 = vsel %vm514_vm4, %v985_v56, %v3465_v52 }
 0x136   : > { %2146 = vst.msk [vmem:[%s2795_s26 + $0xe0] sm:$0xff] %vm575_vm2, %v1117_v34  ;;  %1533 = vrot.lane.b32.xlu2 %v3481_v12, %s2392_s16  ;;  %1531 = vrot.lane.b32.xlu1 %v3484_v10, %s2392_s16  ;;  %v3526_v34 = vmul.f32 %v3523_v61, %v934_v24  ;;  %v3543_v24 = vmul.f32 0.53125, %v3306_v46  ;;  %v3555_v21 = vadd.f32 %v1390_v62, %v1330_v20  ;;  %v1333_v20 = vmul.f32 0.53125, %v1321_v5  ;;  %v1323_v62 = vld [vmem:[%s2486_s23 + $0x50] sm:$0xff] }
 0x137   : > { %2145 = vst.msk [vmem:[%s2795_s26 + $0xd8] sm:$0xff] %vm575_vm2, %v1116_v37  ;;  %1529 = vrot.lane.b32.xlu0 %v3491_v63, %s2392_s16  ;;  %v908_v37 = vmul.f32 0.46875, %v896_v50  ;;  %v3546_v50 = vmul.f32 0.53125, %v3311_v33  ;;  %v1363_v39 = vsel %vm284_vm1, %v1361_v51, %v4771_v32  ;;  %v3557_v48 = vadd.f32 %v1389_v31, %v1329_v14  ;;  %v1324_v32 = vld [vmem:[%s2486_s23 + $0x58] sm:$0xff] }
 0x138   : > { %4766 = vst [vmem:[#allocation8_spill] sm:$0xff] %v3523_v61  ;;  %v991_v49 = vpop.permute.xlu2 %990  ;;  %v3534_v1 = vpop.permute.xlu1 %874  ;;  %v952_v2 = vmul.f32 %v3561_v40, %v940_v44  ;;  %v943_v63 = vadd.f32 %v3408_v19, %v919_v53  ;;  %v933_v10 = vadd.f32 %v3393_v57, %v909_v30  ;;  %v3566_v12 = vadd.f32 %v1388_v8, %v1328_v27  ;;  %v3573_v61 = vld [vmem:[%s2486_s23 + $0x100] sm:$0xff]  ;;  %v3589_v30 = vld [vmem:[%s2486_s23 + $0xb8] sm:$0xff] }
 0x139   : > { %4767 = vst [vmem:[#allocation12_spill] sm:$0xff] %v3529_v18  ;;  %v3548_v16 = vpop.permute.xlu0 %872  ;;  %v932_v56 = vadd.f32 %v3411_v13, %v908_v37  ;;  %v1393_v51 = vmul.f32 0.46875, %v1363_v39  ;;  %v1360_v14 = vsel %vm284_vm1, %v1358_v35, %v1359_v7  ;;  %v1030_v31 = vmul.f32 0.46875, %v1018_v26  ;;  %v3603_v13 = vld [vmem:[%s2486_s23 + $0x60] sm:$0xff] }
 0x13a   : > { %4768 = vst [vmem:[#allocation47_spill] sm:$0xff] %v3537_v9  ;;  %v1382_v9 = vsel %vm284_vm1, %v1359_v7, %v1320_v28  ;;  %v3576_v44 = vmul.f32 0.53125, %v3573_v61  ;;  %v1332_v53 = vmul.f32 0.53125, %v1320_v28  ;;  %v3583_v39 = vmul.f32 0.53125, %v3430_v43  ;;  %v3595_v28 = vld [vmem:[%s2486_s23 + $0x68] sm:$0xff] }
 0x13b   : > { %4769 = vst [vmem:[#allocation36_spill] sm:$0xff] %v3543_v24  ;;  %v1392_v27 = vmul.f32 0.46875, %v1382_v9  ;;  %v3586_v5 = vmul.f32 0.53125, %v3435_v41  ;;  %v1331_v26 = vmul.f32 0.53125, %v1319_v23  ;;  %v1365_v7 = vrot.slane %v1324_v32, 1 }
 0x13c   : > { %4770 = vst [vmem:[#allocation15_spill] sm:$0xff] %v3546_v50  ;;  %v3592_v8 = vmul.f32 %v3589_v30, %v943_v63  ;;  %v3598_v37 = vmul.f32 %v3595_v28, %v933_v10  ;;  %v1391_v35 = vmul.f32 0.46875, %v1360_v14  ;;  %v1364_v9 = vrot.slane %v1323_v62, 1 }
 0x13d   : > { %4772 = vst [vmem:[#allocation14_spill] sm:$0xff] %v3555_v21  ;;  %v3606_v23 = vmul.f32 %v3603_v13, %v932_v56  ;;  %v900_v63 = vsel %vm393_vm3, %v3380_v22, %v3473_v45  ;;  %v899_v10 = vsel %vm393_vm3, %v3398_v11, %v3479_v17  ;;  %v3616_v57 = vadd.f32 %v1393_v51, %v1333_v20  ;;  %v3629_v17 = vld [vmem:[%s2486_s23 + $0xd0] sm:$0xff] }
 0x13e   : > { %4773 = vst [vmem:[#allocation40_spill] sm:$0xff] %v3557_v48  ;;  %1539 = vrot.lane.b32.xlu2 %v3555_v21, %s2392_s16  ;;  %1537 = vrot.lane.b32.xlu1 %v3557_v48, %s2392_s16  ;;  %v1042_v14 = vadd.f32 %v1030_v31, %v3468_v3  ;;  %v3626_v45 = vmul.f32 0.53125, %v3444_v58  ;;  %v1021_v20 = vsel %vm514_vm4, %v991_v49, %v3529_v18  ;;  %v3634_v31 = vmul.f32 0.53125, %v3302_v4  ;;  %v2166_v48 = vld [vmem:[%s2486_s23 + $0xc0] sm:$0xff]  ;;  %v2167_v21 = vld [vmem:[%s2486_s23 + $0xc8] sm:$0xff] }
 0x13f   : > { %4774 = vst [vmem:[#allocation49_spill] sm:$0xff] %v3561_v40  ;;  %1535 = vrot.lane.b32.xlu0 %v3566_v12, %s2392_s16  ;;  %v912_v11 = vmul.f32 0.46875, %v900_v63  ;;  %v911_v22 = vmul.f32 0.46875, %v899_v10  ;;  %v3637_v40 = vadd.f32 %v1391_v35, %v1331_v26  ;;  %v1033_v63 = vmul.f32 0.46875, %v1021_v20 }
 0x140   : > { %4775 = vst [vmem:[#allocation54_spill] sm:$0xff] %v3566_v12  ;;  %v4785_v12 = vrot.slane %v3489_v59, 1  ;;  %v1054_v18 = vmul.f32 %v1042_v14, %v3526_v34  ;;  %v1335_v26 = vmul.f32 0.53125, %v1323_v62  ;;  %v902_v34 = vsel %vm393_vm3, %v3311_v33, %v3548_v16 }
 0x141   : > { %4776 = vst [vmem:[#allocation56_spill] sm:$0xff] %v3573_v61  ;;  %v3621_v56 = vpop.permute.xlu0 %878  ;;  %v1446_v62 = vrot.slane %v2167_v21, 7  ;;  %v1045_v16 = vadd.f32 %v1033_v63, %v3532_v54  ;;  %v914_v33 = vmul.f32 0.46875, %v902_v34  ;;  %v1495_v63 = vmul.f32 0.53125, %v3629_v17 }
 0x142   : > { %4777 = vst [vmem:[#allocation17_spill] sm:$0xff] %v3583_v39  ;;  %v1383_v49 = vsel %vm284_vm1, %v4785_v12, %v3489_v59 }
 0x143   : > { %4778 = vst [vmem:[#allocation16_spill] sm:$0xff] %v3586_v5 }
 0x144   : > { %4779 = vst [vmem:[#allocation18_spill] sm:$0xff] %v3589_v30  ;;  %v3614_v30 = vpop.permute.xlu1 %880 }
 0x145   : > { %4780 = vst [vmem:[#allocation50_spill] sm:$0xff] %v3595_v28  ;;  %v997_v28 = vpop.permute.xlu2 %996 }
 0x146   : > { %4781 = vst [vmem:[#allocation20_spill] sm:$0xff] %v3603_v13  ;;  %v1024_v19 = vsel %vm514_vm4, %v997_v28, %v3573_v61  ;;  %v3623_v13 = vadd.f32 %v1392_v27, %v1332_v53  ;;  %v1384_v28 = vsel %vm284_vm1, %v1365_v7, %v1324_v32  ;;  %v1366_v53 = vsel %vm284_vm1, %v1364_v9, %v1365_v7 }
 0x147   : > { %4782 = vst [vmem:[#allocation21_spill] sm:$0xff] %v3616_v57  ;;  %v1036_v51 = vmul.f32 0.46875, %v1024_v19  ;;  %v1336_v61 = vmul.f32 0.53125, %v1324_v32  ;;  %v4582_v19 = vrot.slane %v3629_v17, 7  ;;  %v1396_v10 = vmul.f32 0.46875, %v1384_v28  ;;  %1545 = vrot.lane.b32.xlu2 %v3616_v57, %s2392_s16  ;;  %1541 = vrot.lane.b32.xlu0 %v3637_v40, %s2392_s16  ;;  %v2169_v57 = vld [vmem:[%s2486_s23 + $0xd8] sm:$0xff] }
 0x148   : > { %4783 = vst [vmem:[#allocation23_spill] sm:$0xff] %v3623_v13  ;;  %v903_v7 = vsel %vm393_vm3, %v3306_v46, %v3534_v1  ;;  %1543 = vrot.lane.b32.xlu1 %v3623_v13, %s2392_s16  ;;  %v1395_v12 = vmul.f32 0.46875, %v1366_v53  ;;  %v1334_v32 = vmul.f32 0.53125, %v3489_v59  ;;  %v1394_v1 = vmul.f32 0.46875, %v1383_v49  ;;  %v2170_v49 = vld [vmem:[%s2486_s23 + $0xe0] sm:$0xff] }
 0x149   : > { %4784 = vst [vmem:[#allocation24_spill] sm:$0xff] %v3637_v40  ;;  %v1048_v27 = vadd.f32 %v1036_v51, %v3576_v44  ;;  %v936_v9 = vadd.f32 %v3471_v47, %v912_v11  ;;  %v3664_v28 = vmul.f32 0.53125, %v3324_v60  ;;  %v1476_v59 = vsel %vm161_vm0, %v3629_v17, %v4582_v19  ;;  %v981_v11 = vpop.permute.xlu0 %980 }
 0x14a   : > { %v915_v53 = vmul.f32 0.46875, %v903_v7  ;;  %v3677_v40 = vadd.f32 %v1395_v12, %v1335_v26  ;;  %v3679_v19 = vadd.f32 %v1394_v1, %v1334_v32  ;;  %v1483_v13 = vmul.f32 0.46875, %v1476_v59 }
 0x14b   : > { %v1060_v35 = vmul.f32 %v1048_v27, %v952_v2  ;;  %v1445_v2 = vrot.slane %v2166_v48, 7  ;;  %4786 = vst [vmem:[#allocation51_spill] sm:$0xff] %v3664_v28  ;;  %v3695_v12 = vadd.f32 %v3477_v29, %v911_v22  ;;  %v1057_v32 = vmul.f32 %v1045_v16, %v3540_v25 }
 0x14c   : > { %v983_v51 = vpop.permute.xlu1 %982  ;;  %4788 = vst [vmem:[#allocation25_spill] sm:$0xff] %v3677_v40  ;;  %v1494_v1 = vmul.f32 0.53125, %v2167_v21  ;;  %v939_v22 = vadd.f32 %v3543_v24, %v915_v53  ;;  %v1493_v25 = vmul.f32 0.53125, %v2166_v48  ;;  %v3718_v53 = vadd.f32 %v1495_v63, %v1483_v13  ;;  %v2173_v24 = vld [vmem:[%s2486_s23 + $0xf8] sm:$0xff] }
 0x14d   : > { %v1066_v14 = vadd.f32 %v1060_v35, %v1054_v18  ;;  %v1003_v20 = vpop.permute.xlu2 %1002  ;;  %v3673_v18 = vadd.f32 %v1396_v10, %v1336_v61  ;;  %v2171_v35 = vld [vmem:[%s2486_s23 + $0xe8] sm:$0xff]  ;;  %4789 = vst [vmem:[#allocation26_spill] sm:$0xff] %v3679_v19  ;;  %v1447_v7 = vsel %vm161_vm0, %v1445_v2, %v1446_v62  ;;  %v1475_v10 = vsel %vm161_vm0, %v2166_v48, %v1445_v2 }
 0x14e   : > { %v1027_v27 = vsel %vm514_vm4, %v1003_v20, %v3444_v58  ;;  %v1451_v20 = vrot.slane %v2170_v49, 7  ;;  %v1452_v34 = vrot.slane %v2171_v35, 7  ;;  %v1482_v2 = vmul.f32 0.46875, %v1447_v7 }
 0x14f   : > { %4787 = vst [vmem:[#allocation52_spill] sm:$0xff] %v3673_v18  ;;  %v1072_v46 = vmul.f32 0.5, %v1066_v14  ;;  %v1039_v47 = vmul.f32 0.46875, %v1027_v27  ;;  %v3689_v14 = vld [vmem:[%s2486_s23 + $0x80] sm:$0xff]  ;;  %1551 = vrot.lane.b32.xlu2 %v3673_v18, %s2392_s16  ;;  %v1449_v62 = vrot.slane %v2169_v57, 7  ;;  %1547 = vrot.lane.b32.xlu0 %v3679_v19, %s2392_s16  ;;  %v1481_v21 = vmul.f32 0.46875, %v1475_v10 }
 0x150   : > { %4790 = vst [vmem:[#allocation37_spill] sm:$0xff] %v3689_v14  ;;  %v3692_v26 = vmul.f32 %v3689_v14, %v936_v9  ;;  %1549 = vrot.lane.b32.xlu1 %v3677_v40, %s2392_s16  ;;  %v938_v9 = vadd.f32 %v3546_v50, %v914_v33  ;;  %v1453_v33 = vsel %vm161_vm0, %v1451_v20, %v1452_v34  ;;  %v1497_v10 = vmul.f32 0.53125, %v2170_v49  ;;  %v2172_v50 = vld [vmem:[%s2486_s23 + $0xf0] sm:$0xff]  ;;  %v2175_v40 = vld [vmem:[%s2486_s23 + $0x108] sm:$0xff] }
 0x151   : > { %2138 = vst.msk [vmem:[%s2795_s26 + $0xa0] sm:$0xff] %vm575_vm2, %v1072_v46  ;;  %v1051_v61 = vadd.f32 %v1039_v47, %v3626_v45  ;;  %v906_v46 = vsel %vm393_vm3, %v3430_v43, %v3614_v30  ;;  %v3711_v30 = vld [vmem:[%s2486_s23 + $0x100] sm:$0xff]  ;;  %v1498_v43 = vmul.f32 0.53125, %v2171_v35  ;;  %v1477_v48 = vsel %vm161_vm0, %v2170_v49, %v1451_v20 }
 0x152   : > { %v918_v7 = vmul.f32 0.46875, %v906_v46  ;;  %v3724_v29 = vadd.f32 %v1494_v1, %v1482_v2  ;;  %v4592_v63 = vrot.slane %v3711_v30, 7  ;;  %v3732_v35 = vadd.f32 %v1493_v25, %v1481_v21  ;;  %v3745_v21 = vld [vmem:[%s2486_s23 + $0x98] sm:$0xff] }
 0x153   : > { %v1063_v47 = vmul.f32 %v1051_v61, %v3592_v8  ;;  %v905_v8 = vsel %vm393_vm3, %v3435_v41, %v3621_v56  ;;  %v987_v61 = vpop.permute.xlu0 %986  ;;  %v4792_v56 = vrot.slane %v3629_v17, 7  ;;  %v1486_v49 = vmul.f32 0.46875, %v1453_v33  ;;  %4794 = vst [vmem:[#allocation53_spill] sm:$0xff] %v3745_v21 }
 0x154   : > { %v989_v27 = vpop.permute.xlu1 %988  ;;  %4791 = vst [vmem:[#allocation38_spill] sm:$0xff] %v3724_v29  ;;  %v917_v34 = vmul.f32 0.46875, %v905_v8  ;;  %v1016_v20 = vsel %vm514_vm4, %v981_v11, %v3324_v60  ;;  %v1485_v17 = vmul.f32 0.46875, %v1477_v48  ;;  %v1454_v1 = vrot.slane %v2172_v50, 7  ;;  %v3753_v11 = vld [vmem:[%s2486_s23 + $0xf8] sm:$0xff] }
 0x155   : > { %v1069_v59 = vadd.f32 %v1063_v47, %v1057_v32  ;;  %v3716_v16 = vpop.permute.xlu2 %1130  ;;  %v1450_v13 = vsel %vm161_vm0, %v4792_v56, %v1449_v62  ;;  %v1017_v32 = vsel %vm514_vm4, %v983_v51, %v3302_v4  ;;  %4793 = vst [vmem:[#allocation28_spill] sm:$0xff] %v3732_v35  ;;  %v1455_v46 = vrot.slane %v2173_v24, 7  ;;  %v3772_v56 = vld [vmem:[%s2486_s23 + $0xf0] sm:$0xff] }
 0x156   : > { %v3739_v47 = vmul.f32 0.53125, %v3424_v36  ;;  %v3742_v2 = vmul.f32 0.53125, %v3297_v0  ;;  %v1484_v51 = vmul.f32 0.46875, %v1450_v13  ;;  %v1496_v62 = vmul.f32 0.53125, %v2169_v57  ;;  %4795 = vst [vmem:[#allocation55_spill] sm:$0xff] %v3753_v11 }
 0x157   : > { %v1075_v14 = vmul.f32 0.5, %v1069_v59  ;;  %v1029_v25 = vmul.f32 0.46875, %v1017_v32  ;;  %1653 = vrot.lane.b32.xlu2 %v3718_v53, %s2393_s24  ;;  %v3756_v8 = vmul.f32 0.53125, %v3753_v11  ;;  %v1479_v57 = vsel %vm161_vm0, %v3711_v30, %v4592_v63  ;;  %v3763_v59 = vld [vmem:[%s2486_s23 + $0x90] sm:$0xff]  ;;  %1649 = vrot.lane.b32.xlu0 %v3732_v35, %s2393_s24  ;;  %4797 = vst [vmem:[#allocation41_spill] sm:$0xff] %v3772_v56 }
 0x158   : > { %1651 = vrot.lane.b32.xlu1 %v3724_v29, %s2393_s24  ;;  %4796 = vst [vmem:[#allocation39_spill] sm:$0xff] %v3763_v59  ;;  %v3767_v33 = vadd.f32 %v3583_v39, %v918_v7  ;;  %v1028_v48 = vmul.f32 0.46875, %v1016_v20  ;;  %v3775_v13 = vmul.f32 0.53125, %v3772_v56  ;;  %v3778_v32 = vadd.f32 %v3586_v5, %v917_v34 }
 0x159   : > { %2141 = vst.msk [vmem:[%s2795_s26 + $0xb8] sm:$0xff] %vm575_vm2, %v1075_v14  ;;  %v951_v14 = vmul.f32 %v3745_v21, %v939_v22  ;;  %v950_v22 = vmul.f32 %v3763_v59, %v938_v9  ;;  %v3782_v59 = vadd.f32 %v1498_v43, %v1486_v49  ;;  %v3784_v7 = vadd.f32 %v1497_v10, %v1485_v17  ;;  %v2176_v49 = vld [vmem:[%s2486_s23 + $0x110] sm:$0xff]  ;;  %v2177_v17 = vld [vmem:[%s2486_s23 + $0x118] sm:$0xff] }
 0x15a   : > { %v1456_v20 = vsel %vm161_vm0, %v1454_v1, %v1455_v46  ;;  %v3789_v41 = vadd.f32 %v1496_v62, %v1484_v51  ;;  %v1489_v35 = vmul.f32 0.46875, %v1479_v57  ;;  %v1501_v34 = vmul.f32 0.53125, %v3711_v30 }
 0x15b   : > { %v993_v21 = vpop.permute.xlu0 %992  ;;  %v1041_v5 = vadd.f32 %v1029_v25, %v3634_v31  ;;  %v1478_v10 = vsel %vm161_vm0, %v2172_v50, %v1454_v1  ;;  %v1040_v46 = vadd.f32 %v1028_v48, %v3664_v28  ;;  %v1020_v51 = vsel %vm514_vm4, %v989_v27, %v3424_v36 }
 0x15c   : > { %v995_v9 = vpop.permute.xlu1 %994  ;;  %v1022_v43 = vsel %vm514_vm4, %v993_v21, %v3772_v56  ;;  %v1488_v57 = vmul.f32 0.46875, %v1456_v20  ;;  %v1500_v25 = vmul.f32 0.53125, %v2173_v24  ;;  %v1487_v56 = vmul.f32 0.46875, %v1478_v10 }
 0x15d   : > { %v3780_v63 = vpop.permute.xlu2 %1136  ;;  %v1023_v39 = vsel %vm514_vm4, %v995_v9, %v3753_v11  ;;  %v1034_v62 = vmul.f32 0.46875, %v1022_v43  ;;  %v1019_v9 = vsel %vm514_vm4, %v987_v61, %v3297_v0  ;;  %v1499_v11 = vmul.f32 0.53125, %v2172_v50 }
 0x15e   : > { %v1035_v29 = vmul.f32 0.46875, %v1023_v39  ;;  %v1460_v1 = vrot.slane %v2176_v49, 7  ;;  %v1461_v19 = vrot.slane %v2177_v17, 7  ;;  %v1053_v48 = vmul.f32 %v1041_v5, %v3598_v37 }
 0x15f   : > { %v1046_v21 = vadd.f32 %v1034_v62, %v3775_v13  ;;  %v1032_v18 = vmul.f32 0.46875, %v1020_v51  ;;  %1659 = vrot.lane.b32.xlu2 %v3782_v59, %s2393_s24  ;;  %v1052_v24 = vmul.f32 %v1040_v46, %v3606_v23  ;;  %v1031_v50 = vmul.f32 0.46875, %v1019_v9  ;;  %1655 = vrot.lane.b32.xlu0 %v3789_v41, %s2393_s24 }
 0x160   : > { %v1047_v39 = vadd.f32 %v1035_v29, %v3756_v8  ;;  %1657 = vrot.lane.b32.xlu1 %v3784_v7, %s2393_s24  ;;  %v3812_v29 = vmul.f32 0.53125, %v3449_v42  ;;  %v3818_v5 = vmul.f32 0.53125, %v3455_v38  ;;  %v3822_v20 = vadd.f32 %v1501_v34, %v1489_v35 }
 0x161   : > { %v1058_v27 = vmul.f32 %v1046_v21, %v950_v22  ;;  %v3824_v43 = vadd.f32 %v1500_v25, %v1488_v57  ;;  %v1458_v10 = vrot.slane %v2175_v40, 7  ;;  %v3828_v51 = vadd.f32 %v1499_v11, %v1487_v56  ;;  %v3842_v11 = vld [vmem:[%s2486_s23 + $0xb0] sm:$0xff] }
 0x162   : > { %v1059_v28 = vmul.f32 %v1047_v39, %v951_v14  ;;  %4798 = vst [vmem:[#allocation57_spill] sm:$0xff] %v3822_v20  ;;  %v1044_v62 = vadd.f32 %v1032_v18, %v3739_v47  ;;  %v1043_v9 = vadd.f32 %v1031_v50, %v3742_v2  ;;  %v1480_v21 = vsel %vm161_vm0, %v2176_v49, %v1460_v1 }
 0x163   : > { %4799 = vst [vmem:[#allocation58_spill] sm:$0xff] %v3824_v43  ;;  %v1064_v23 = vadd.f32 %v1058_v27, %v1052_v24  ;;  %v999_v46 = vpop.permute.xlu0 %998  ;;  %v954_v18 = vmul.f32 %v3842_v11, %v3767_v33  ;;  %v4801_v24 = vrot.slane %v3711_v30, 7  ;;  %v3853_v27 = vld [vmem:[%s2486_s23 + $0xa8] sm:$0xff] }
 0x164   : > { %v1065_v37 = vadd.f32 %v1059_v28, %v1053_v48  ;;  %v1001_v14 = vpop.permute.xlu1 %1000  ;;  %4800 = vst [vmem:[#allocation59_spill] sm:$0xff] %v3828_v51  ;;  %v1462_v28 = vsel %vm161_vm0, %v1460_v1, %v1461_v19  ;;  %v1025_v57 = vsel %vm514_vm4, %v999_v46, %v3455_v38  ;;  %v3837_v48 = vld [vmem:[%s2486_s23 + $0x78] sm:$0xff]  ;;  %v953_v1 = vmul.f32 %v3853_v27, %v3778_v32 }
 0x165   : > { %v3820_v61 = vpop.permute.xlu2 %1142  ;;  %v1026_v22 = vsel %vm514_vm4, %v1001_v14, %v3449_v42  ;;  %v1070_v39 = vmul.f32 0.5, %v1064_v23  ;;  %v1037_v25 = vmul.f32 0.46875, %v1025_v57  ;;  %v947_v19 = vmul.f32 %v3837_v48, %v3695_v12 }
 0x166   : > { %v1071_v35 = vmul.f32 0.5, %v1065_v37  ;;  %v1038_v34 = vmul.f32 0.46875, %v1026_v22  ;;  %v1459_v50 = vsel %vm161_vm0, %v4801_v24, %v1458_v10  ;;  %v1504_v37 = vmul.f32 0.53125, %v2177_v17 }
 0x167   : > { %2136 = vst.msk [vmem:[%s2795_s26 + $0x90] sm:$0xff] %vm575_vm2, %v1070_v39  ;;  %v1049_v12 = vadd.f32 %v1037_v25, %v3818_v5  ;;  %v1503_v14 = vmul.f32 0.53125, %v2176_v49  ;;  %v1056_v33 = vmul.f32 %v1044_v62, %v3692_v26  ;;  %1665 = vrot.lane.b32.xlu2 %v3822_v20, %s2393_s24  ;;  %v1492_v30 = vmul.f32 0.46875, %v1462_v28  ;;  %1661 = vrot.lane.b32.xlu0 %v3828_v51, %s2393_s24 }
 0x168   : > { %2137 = vst.msk [vmem:[%s2795_s26 + $0x98] sm:$0xff] %vm575_vm2, %v1071_v35  ;;  %v1050_v56 = vadd.f32 %v1038_v34, %v3812_v29  ;;  %1663 = vrot.lane.b32.xlu1 %v3824_v43, %s2393_s24  ;;  %v1491_v10 = vmul.f32 0.46875, %v1480_v21  ;;  %v1055_v22 = vmul.f32 %v1043_v9, %v947_v19  ;;  %v1490_v32 = vmul.f32 0.46875, %v1459_v50 }
 0x169   : > { %v1061_v46 = vmul.f32 %v1049_v12, %v953_v1  ;;  %v1502_v49 = vmul.f32 0.53125, %v2175_v40  ;;  %v1164_v35 = vsel %vm514_vm4, %v3716_v16, %v3350_v15  ;;  %v3870_v39 = vadd.f32 %v1504_v37, %v1492_v30  ;;  %v4803_v1 = vld [vmem:[#allocation8_spill] sm:$0xff]  ;;  %v4806_v30 = vld [vmem:[#allocation11_spill] sm:$0xff] }
 0x16a   : > { %v1062_v23 = vmul.f32 %v1050_v56, %v954_v18  ;;  %v3872_v9 = vadd.f32 %v1503_v14, %v1491_v10  ;;  %v1176_v19 = vmul.f32 0.46875, %v1164_v35  ;;  %v1167_v18 = vsel %vm514_vm4, %v3780_v63, %v3362_v55  ;;  %v4807_v55 = vld [vmem:[#allocation45_spill] sm:$0xff]  ;;  %v4810_v35 = vld [vmem:[#allocation47_spill] sm:$0xff] }
 0x16b   : > { %v1067_v34 = vadd.f32 %v1061_v46, %v1055_v22  ;;  %v1127_v57 = vpop.permute.xlu0 %1126  ;;  %4802 = vst [vmem:[#allocation60_spill] sm:$0xff] %v3870_v39  ;;  %v3874_v21 = vadd.f32 %v1502_v49, %v1490_v32  ;;  %v1179_v37 = vmul.f32 0.46875, %v1167_v18  ;;  %v4808_v22 = vld [vmem:[#allocation46_spill] sm:$0xff] }
 0x16c   : > { %v1068_v17 = vadd.f32 %v1062_v23, %v1056_v33  ;;  %v1129_v62 = vpop.permute.xlu1 %1128  ;;  %v1188_v15 = vadd.f32 %v1176_v19, %v3353_v6  ;;  %v4804_v23 = vld [vmem:[#allocation10_spill] sm:$0xff]  ;;  %v4805_v6 = vld [vmem:[#allocation19_spill] sm:$0xff]  ;;  %v1170_v46 = vsel %vm514_vm4, %v3820_v61, %v4808_v22 }
 0x16d   : > { %v1149_v26 = vpop.permute.xlu2 %1148  ;;  %v1073_v25 = vmul.f32 0.5, %v1067_v34  ;;  %v1191_v63 = vadd.f32 %v1179_v37, %v4807_v55  ;;  %v4813_v61 = vld [vmem:[#allocation54_spill] sm:$0xff]  ;;  %v4817_v55 = vld [vmem:[#allocation27_spill] sm:$0xff] }
 0x16e   : > { %v1074_v28 = vmul.f32 0.5, %v1068_v17  ;;  %v1200_v12 = vmul.f32 %v4803_v1, %v1188_v15  ;;  %v4811_v15 = vld [vmem:[#allocation14_spill] sm:$0xff] }
 0x16f   : > { %2139 = vst.msk [vmem:[%s2795_s26 + $0xa8] sm:$0xff] %vm575_vm2, %v1073_v25  ;;  %1671 = vrot.lane.b32.xlu2 %v3870_v39, %s2393_s24  ;;  %1667 = vrot.lane.b32.xlu0 %v3874_v21, %s2393_s24  ;;  %v1203_v34 = vmul.f32 %v4810_v35, %v1191_v63  ;;  %v4814_v18 = vld [vmem:[#allocation30_spill] sm:$0xff]  ;;  %v1162_v63 = vsel %vm514_vm4, %v1127_v57, %v4817_v55  ;;  %v4820_v35 = vld [vmem:[#allocation49_spill] sm:$0xff] }
 0x170   : > { %2140 = vst.msk [vmem:[%s2795_s26 + $0xb0] sm:$0xff] %vm575_vm2, %v1074_v28  ;;  %1669 = vrot.lane.b32.xlu1 %v3872_v9, %s2393_s24  ;;  %v1182_v28 = vmul.f32 0.46875, %v1170_v46 }
 0x173   : > { %v1133_v24 = vpop.permute.xlu0 %1132 }
 0x174   : > { %v1135_v16 = vpop.permute.xlu1 %1134 }
 0x175   : > { %v1215_v40 = vpop.permute.xlu2 %1214 }
 0x176   : > { %v1248_v56 = vsel %vm393_vm3, %v3465_v52, %v1215_v40  ;;  %v4812_v40 = vld [vmem:[#allocation40_spill] sm:$0xff] }
 0x177   : > { %v1260_v50 = vmul.f32 0.46875, %v1248_v56  ;;  %1799 = vrot.lane.b32.xlu2 %v4804_v23, %s2393_s24  ;;  %1795 = vrot.lane.b32.xlu0 %v4806_v30, %s2393_s24  ;;  %v1194_v56 = vadd.f32 %v1182_v28, %v4814_v18  ;;  %v3941_v18 = vld [vmem:[%s2486_s23 + $0xa0] sm:$0xff] }
 0x178   : > { %1797 = vrot.lane.b32.xlu1 %v4805_v6, %s2393_s24  ;;  %4821 = vst [vmem:[#allocation10_spill] sm:$0xff] %v3941_v18 }
 0x179   : > { %v1272_v14 = vadd.f32 %v1260_v50, %v3468_v3  ;;  %v4809_v3 = vld [vmem:[#allocation12_spill] sm:$0xff]  ;;  %v4815_v50 = vld [vmem:[#allocation34_spill] sm:$0xff] }
 0x17a   : > { %v1173_v1 = vsel %vm514_vm4, %v1149_v26, %v4815_v50  ;;  %v4822_v50 = vld [vmem:[#allocation21_spill] sm:$0xff] }
 0x17b   : > { %v1284_v33 = vmul.f32 %v1272_v14, %v1200_v12  ;;  %v3908_v49 = vpop.permute.xlu0 %1138 }
 0x17c   : > { %v3901_v10 = vpop.permute.xlu1 %1140 }
 0x17d   : > { %v1221_v52 = vpop.permute.xlu2 %1220 }
 0x17e   : > { %v1251_v32 = vsel %vm393_vm3, %v4809_v3, %v1221_v52  ;;  %v4818_v52 = vld [vmem:[#allocation56_spill] sm:$0xff] }
 0x17f   : > { %v1263_v17 = vmul.f32 0.46875, %v1251_v32  ;;  %1805 = vrot.lane.b32.xlu2 %v4811_v15, %s2393_s24  ;;  %1801 = vrot.lane.b32.xlu0 %v4813_v61, %s2393_s24  ;;  %v3934_v32 = vld [vmem:[%s2486_s23 + $0x70] sm:$0xff] }
 0x180   : > { %1803 = vrot.lane.b32.xlu1 %v4812_v40, %s2393_s24  ;;  %4819 = vst [vmem:[#allocation8_spill] sm:$0xff] %v3934_v32  ;;  %v1754_v26 = vmul.f32 %v3934_v32, %v4804_v23  ;;  %v4828_v32 = vld [vmem:[#allocation44_spill] sm:$0xff] }
 0x181   : > { %v1275_v25 = vadd.f32 %v1263_v17, %v3532_v54  ;;  %v4816_v54 = vld [vmem:[#allocation42_spill] sm:$0xff]  ;;  %v1185_v17 = vmul.f32 0.46875, %v1173_v1  ;;  %v1760_v1 = vmul.f32 %v3941_v18, %v4822_v50  ;;  %v1166_v18 = vsel %vm514_vm4, %v1135_v16, %v4828_v32 }
 0x182   : > { %v1163_v14 = vsel %vm514_vm4, %v1129_v62, %v4816_v54  ;;  %v4824_v54 = vld [vmem:[#allocation35_spill] sm:$0xff]  ;;  %v4831_v16 = vld [vmem:[#allocation18_spill] sm:$0xff] }
 0x183   : > { %v3912_v19 = vmul.f32 %v1275_v25, %v1203_v34  ;;  %v3931_v46 = vpop.permute.xlu0 %1144  ;;  %v1206_v34 = vmul.f32 %v4820_v35, %v1194_v56  ;;  %v1175_v28 = vmul.f32 0.46875, %v1163_v14  ;;  %v1174_v25 = vmul.f32 0.46875, %v1162_v63  ;;  %v4825_v56 = vld [vmem:[#allocation24_spill] sm:$0xff] }
 0x184   : > { %v3923_v37 = vpop.permute.xlu1 %1146  ;;  %v1197_v55 = vadd.f32 %v1185_v17, %v4824_v54  ;;  %v1766_v14 = vmul.f32 %v1754_v26, %v3718_v53 }
 0x185   : > { %v1227_v12 = vpop.permute.xlu2 %1226 }
 0x186   : > { %v1254_v22 = vsel %vm393_vm3, %v4818_v52, %v1227_v12  ;;  %v4823_v12 = vld [vmem:[#allocation23_spill] sm:$0xff]  ;;  %v1209_v32 = vmul.f32 %v4831_v16, %v1197_v55 }
 0x187   : > { %v1266_v3 = vmul.f32 0.46875, %v1254_v22  ;;  %1811 = vrot.lane.b32.xlu2 %v4822_v50, %s2393_s24  ;;  %1807 = vrot.lane.b32.xlu0 %v4825_v56, %s2393_s24  ;;  %v4827_v52 = vld [vmem:[#allocation31_spill] sm:$0xff]  ;;  %v4829_v50 = vld [vmem:[#allocation33_spill] sm:$0xff] }
 0x188   : > { %1809 = vrot.lane.b32.xlu1 %v4823_v12, %s2393_s24  ;;  %v1186_v22 = vadd.f32 %v1174_v25, %v4827_v52  ;;  %v1165_v17 = vsel %vm514_vm4, %v1133_v24, %v4829_v50  ;;  %v4832_v50 = vld [vmem:[#allocation50_spill] sm:$0xff]  ;;  %v3980_v16 = vld [vmem:[%s2486_s23 + $0xb8] sm:$0xff] }
 0x189   : > { %v1278_v62 = vadd.f32 %v1266_v3, %v3576_v44  ;;  %v4826_v44 = vld [vmem:[#allocation32_spill] sm:$0xff]  ;;  %4835 = vst [vmem:[#allocation11_spill] sm:$0xff] %v3980_v16 }
 0x18a   : > { %v1187_v63 = vadd.f32 %v1175_v28, %v4826_v44  ;;  %v3967_v44 = vld [vmem:[%s2486_s23 + $0x88] sm:$0xff] }
 0x18b   : > { %v1290_v57 = vmul.f32 %v1278_v62, %v1206_v34  ;;  %v1772_v62 = vmul.f32 %v1760_v1, %v3822_v20  ;;  %v1211_v54 = vpop.permute.xlu0 %1210  ;;  %4830 = vst [vmem:[#allocation19_spill] sm:$0xff] %v3967_v44  ;;  %v1757_v24 = vmul.f32 %v3967_v44, %v4811_v15 }
 0x18c   : > { %v1213_v34 = vpop.permute.xlu1 %1212  ;;  %v1246_v1 = vsel %vm393_vm3, %v3324_v60, %v1211_v54  ;;  %v4833_v60 = vld [vmem:[#allocation20_spill] sm:$0xff]  ;;  %v4834_v54 = vld [vmem:[#allocation51_spill] sm:$0xff] }
 0x18d   : > { %v1296_v3 = vadd.f32 %v1290_v57, %v1284_v33  ;;  %v1233_v35 = vpop.permute.xlu2 %1232  ;;  %v1247_v28 = vsel %vm393_vm3, %v3302_v4, %v1213_v34  ;;  %v1258_v52 = vmul.f32 0.46875, %v1246_v1  ;;  %v1178_v4 = vmul.f32 0.46875, %v1166_v18  ;;  %v4836_v18 = vld [vmem:[#allocation52_spill] sm:$0xff] }
 0x18e   : > { %v1257_v26 = vsel %vm393_vm3, %v3444_v58, %v1233_v35  ;;  %v1259_v57 = vmul.f32 0.46875, %v1247_v28  ;;  %v1778_v58 = vadd.f32 %v1772_v62, %v1766_v14  ;;  %v1199_v35 = vmul.f32 %v4832_v50, %v1187_v63  ;;  %v4837_v63 = vld [vmem:[#allocation25_spill] sm:$0xff] }
 0x18f   : > { %v1302_v25 = vmul.f32 0.5, %v1296_v3  ;;  %v1269_v33 = vmul.f32 0.46875, %v1257_v26  ;;  %v1198_v26 = vmul.f32 %v4833_v60, %v1186_v22  ;;  %v1177_v28 = vmul.f32 0.46875, %v1165_v17  ;;  %1817 = vrot.lane.b32.xlu2 %v4836_v18, %s2393_s24  ;;  %v4838_v22 = vld [vmem:[#allocation26_spill] sm:$0xff]  ;;  %v4839_v17 = vld [vmem:[#allocation9_spill] sm:$0xff]  ;;  %v4842_v60 = vld [vmem:[#allocation43_spill] sm:$0xff] }
 0x190   : > { %v1271_v34 = vadd.f32 %v1259_v57, %v3634_v31  ;;  %v1270_v55 = vadd.f32 %v1258_v52, %v4834_v54  ;;  %v1784_v1 = vmul.f32 0.5, %v1778_v58  ;;  %1815 = vrot.lane.b32.xlu1 %v4837_v63, %s2393_s24  ;;  %1813 = vrot.lane.b32.xlu0 %v4838_v22, %s2393_s24  ;;  %v1769_v62 = vmul.f32 %v1757_v24, %v3782_v59  ;;  %v4840_v58 = vld [vmem:[#allocation13_spill] sm:$0xff] }
 0x191   : > { %2150 = vst.msk [vmem:[%s2795_s26 + $0x100] sm:$0xff] %vm575_vm2, %v1302_v25  ;;  %v1281_v3 = vadd.f32 %v1269_v33, %v3626_v45  ;;  %v1763_v45 = vmul.f32 %v3980_v16, %v4836_v18  ;;  %v1190_v25 = vadd.f32 %v1178_v4, %v4839_v17  ;;  %v1189_v50 = vadd.f32 %v1177_v28, %v4840_v58  ;;  %v4847_v58 = vld [vmem:[#allocation15_spill] sm:$0xff] }
 0x192   : > { %v3982_v14 = vmul.f32 %v1271_v34, %v1199_v35  ;;  %v3990_v31 = vmul.f32 %v1270_v55, %v1198_v26  ;;  %2186 = vst.msk [vmem:[%s2795_s26 + $0x160] sm:$0xff] %vm575_vm2, %v1784_v1  ;;  %v4841_v35 = vld [vmem:[#allocation22_spill] sm:$0xff]  ;;  %v4843_v55 = vld [vmem:[#allocation37_spill] sm:$0xff] }
 0x193   : > { %v1293_v44 = vmul.f32 %v1281_v3, %v1209_v32  ;;  %v1775_v52 = vmul.f32 %v1763_v45, %v3870_v39  ;;  %v1169_v3 = vsel %vm514_vm4, %v3901_v10, %v4841_v35  ;;  %v1217_v34 = vpop.permute.xlu0 %1216  ;;  %v1202_v1 = vmul.f32 %v4843_v55, %v1190_v25  ;;  %v4845_v25 = vld [vmem:[#allocation28_spill] sm:$0xff] }
 0x194   : > { %v1219_v32 = vpop.permute.xlu1 %1218  ;;  %v1249_v26 = vsel %vm393_vm3, %v3297_v0, %v1217_v34  ;;  %v1181_v45 = vmul.f32 0.46875, %v1169_v3  ;;  %v1201_v10 = vmul.f32 %v3837_v48, %v1189_v50  ;;  %v4844_v0 = vld [vmem:[#allocation38_spill] sm:$0xff]  ;;  %v4848_v35 = vld [vmem:[#allocation48_spill] sm:$0xff] }
 0x195   : > { %v1299_v33 = vadd.f32 %v1293_v44, %v3912_v19  ;;  %v3999_v57 = vpop.permute.xlu2 %1533  ;;  %v1250_v24 = vsel %vm393_vm3, %v3424_v36, %v1219_v32  ;;  %v1168_v19 = vsel %vm514_vm4, %v3908_v49, %v4842_v60  ;;  %v1261_v54 = vmul.f32 0.46875, %v1249_v26  ;;  %v4850_v60 = vld [vmem:[#allocation55_spill] sm:$0xff]  ;;  %v4851_v26 = vld [vmem:[#allocation41_spill] sm:$0xff] }
 0x196   : > { %v1262_v4 = vmul.f32 0.46875, %v1250_v24  ;;  %v1781_v28 = vadd.f32 %v1775_v52, %v1769_v62  ;;  %v1180_v17 = vmul.f32 0.46875, %v1168_v19  ;;  %v1172_v3 = vsel %vm514_vm4, %v3923_v37, %v4848_v35  ;;  %v4849_v24 = vld [vmem:[#allocation29_spill] sm:$0xff]  ;;  %v4067_v35 = vld [vmem:[%s2486_s23 + $0x90] sm:$0xff] }
 0x197   : > { %v1305_v44 = vmul.f32 0.5, %v1299_v33  ;;  %v1273_v49 = vadd.f32 %v1261_v54, %v3742_v2  ;;  %1883 = vrot.lane.b32.xlu2 %v3718_v53, %s2392_s16  ;;  %v1171_v34 = vsel %vm514_vm4, %v3931_v46, %v4849_v24  ;;  %4857 = vst [vmem:[#allocation47_spill] sm:$0xff] %v4067_v35  ;;  %v4858_v24 = vld [vmem:[#allocation17_spill] sm:$0xff] }
 0x198   : > { %v1274_v36 = vadd.f32 %v1262_v4, %v3739_v47  ;;  %v1787_v33 = vmul.f32 0.5, %v1781_v28  ;;  %1881 = vrot.lane.b32.xlu1 %v4844_v0, %s2392_s16  ;;  %1879 = vrot.lane.b32.xlu0 %v4845_v25, %s2392_s16  ;;  %v4846_v47 = vld [vmem:[#allocation36_spill] sm:$0xff]  ;;  %v1192_v50 = vadd.f32 %v1180_v17, %v4847_v58  ;;  %v4046_v28 = vld [vmem:[%s2486_s23 + $0x68] sm:$0xff]  ;;  %v1183_v46 = vmul.f32 0.46875, %v1171_v34 }
 0x199   : > { %2153 = vst.msk [vmem:[%s2795_s26 + $0x118] sm:$0xff] %vm575_vm2, %v1305_v44  ;;  %v4025_v62 = vmul.f32 %v1273_v49, %v1201_v10  ;;  %v1193_v48 = vadd.f32 %v1181_v45, %v4846_v47  ;;  %v1753_v37 = vmul.f32 %v4046_v28, %v4805_v6  ;;  %v4053_v17 = vld [vmem:[%s2486_s23 + $0x60] sm:$0xff]  ;;  %v4855_v49 = vld [vmem:[#allocation39_spill] sm:$0xff] }
 0x19a   : > { %v4019_v32 = vmul.f32 %v1274_v36, %v1202_v1  ;;  %2189 = vst.msk [vmem:[%s2795_s26 + $0x178] sm:$0xff] %vm575_vm2, %v1787_v33  ;;  %v4853_v1 = vld [vmem:[#allocation53_spill] sm:$0xff]  ;;  %v1184_v36 = vmul.f32 0.46875, %v1172_v3  ;;  %v1204_v33 = vmul.f32 %v4855_v49, %v1192_v50  ;;  %v1758_v3 = vmul.f32 %v4067_v35, %v4825_v56 }
 0x19b   : > { %v1223_v44 = vpop.permute.xlu0 %1222  ;;  %4852 = vst [vmem:[#allocation45_spill] sm:$0xff] %v4046_v28  ;;  %v1205_v45 = vmul.f32 %v4853_v1, %v1193_v48  ;;  %v4064_v48 = vld [vmem:[%s2486_s23 + $0x98] sm:$0xff] }
 0x19c   : > { %v1225_v52 = vpop.permute.xlu1 %1224  ;;  %v1252_v54 = vsel %vm393_vm3, %v4851_v26, %v1223_v44  ;;  %4854 = vst [vmem:[#allocation46_spill] sm:$0xff] %v4053_v17  ;;  %v1759_v50 = vmul.f32 %v4064_v48, %v4823_v12  ;;  %v1196_v34 = vadd.f32 %v1184_v36, %v4858_v24 }
 0x19d   : > { %v4032_v2 = vpop.permute.xlu2 %1539  ;;  %v1253_v19 = vsel %vm393_vm3, %v4850_v60, %v1225_v52  ;;  %v1264_v55 = vmul.f32 0.46875, %v1252_v54  ;;  %v1752_v52 = vmul.f32 %v4053_v17, %v4806_v30  ;;  %4856 = vst [vmem:[#allocation12_spill] sm:$0xff] %v4064_v48  ;;  %v4859_v60 = vld [vmem:[#allocation16_spill] sm:$0xff] }
 0x19e   : > { %v1265_v4 = vmul.f32 0.46875, %v1253_v19  ;;  %v1195_v19 = vadd.f32 %v1183_v46, %v4859_v60 }
 0x19f   : > { %v1276_v47 = vadd.f32 %v1264_v55, %v3775_v13  ;;  %1889 = vrot.lane.b32.xlu2 %v3782_v59, %s2392_s16  ;;  %v1765_v13 = vmul.f32 %v1753_v37, %v4844_v0  ;;  %v1764_v1 = vmul.f32 %v1752_v52, %v4845_v25 }
 0x1a0   : > { %v1277_v10 = vadd.f32 %v1265_v4, %v3756_v8  ;;  %1887 = vrot.lane.b32.xlu1 %v3784_v7, %s2392_s16  ;;  %1885 = vrot.lane.b32.xlu0 %v3789_v41, %s2392_s16  ;;  %v1207_v52 = vmul.f32 %v3853_v27, %v1195_v19 }
 0x1a1   : > { %v1288_v8 = vmul.f32 %v1276_v47, %v1204_v33  ;;  %v1208_v47 = vmul.f32 %v3842_v11, %v1196_v34  ;;  %v4114_v34 = vld [vmem:[%s2486_s23 + $0x78] sm:$0xff] }
 0x1a2   : > { %v1289_v58 = vmul.f32 %v1277_v10, %v1205_v45  ;;  %v1771_v45 = vmul.f32 %v1759_v50, %v3824_v43 }
 0x1a3   : > { %v1294_v54 = vadd.f32 %v1288_v8, %v3990_v31  ;;  %v1229_v37 = vpop.permute.xlu0 %1228  ;;  %v1770_v31 = vmul.f32 %v1758_v3, %v3828_v51 }
 0x1a4   : > { %v1295_v44 = vadd.f32 %v1289_v58, %v3982_v14  ;;  %v1231_v26 = vpop.permute.xlu1 %1230  ;;  %v1255_v14 = vsel %vm393_vm3, %v3455_v38, %v1229_v37  ;;  %v1777_v33 = vadd.f32 %v1771_v45, %v1765_v13 }
 0x1a5   : > { %v4079_v4 = vpop.permute.xlu2 %1545  ;;  %v1256_v55 = vsel %vm393_vm3, %v3449_v42, %v1231_v26  ;;  %v1300_v46 = vmul.f32 0.5, %v1294_v54  ;;  %v1267_v49 = vmul.f32 0.46875, %v1255_v14  ;;  %v1776_v8 = vadd.f32 %v1770_v31, %v1764_v1  ;;  %v4124_v54 = vld [vmem:[%s2486_s23 + $0xb0] sm:$0xff] }
 0x1a6   : > { %v1301_v36 = vmul.f32 0.5, %v1295_v44  ;;  %v1268_v10 = vmul.f32 0.46875, %v1256_v55  ;;  %v1783_v58 = vmul.f32 0.5, %v1777_v33  ;;  %v1755_v44 = vmul.f32 %v4114_v34, %v4813_v61  ;;  %v4127_v55 = vld [vmem:[%s2486_s23 + $0xa8] sm:$0xff] }
 0x1a7   : > { %2148 = vst.msk [vmem:[%s2795_s26 + $0xf0] sm:$0xff] %vm575_vm2, %v1300_v46  ;;  %v1279_v38 = vadd.f32 %v1267_v49, %v3818_v5  ;;  %1895 = vrot.lane.b32.xlu2 %v3822_v20, %s2392_s16  ;;  %v1782_v5 = vmul.f32 0.5, %v1776_v8  ;;  %v1761_v1 = vmul.f32 %v4127_v55, %v4838_v22  ;;  %v4860_v8 = vld [vmem:[#allocation21_spill] sm:$0xff] }
 0x1a8   : > { %2149 = vst.msk [vmem:[%s2795_s26 + $0xf8] sm:$0xff] %vm575_vm2, %v1301_v36  ;;  %v1280_v42 = vadd.f32 %v1268_v10, %v3812_v29  ;;  %1893 = vrot.lane.b32.xlu1 %v3824_v43, %s2392_s16  ;;  %1891 = vrot.lane.b32.xlu0 %v3828_v51, %s2392_s16  ;;  %v4104_v29 = vld [vmem:[%s2486_s23 + $0x80] sm:$0xff]  ;;  %v1767_v45 = vmul.f32 %v1755_v44, %v3789_v41 }
 0x1a9   : > { %v1291_v11 = vmul.f32 %v1279_v38, %v1207_v52  ;;  %2185 = vst.msk [vmem:[%s2795_s26 + $0x158] sm:$0xff] %vm575_vm2, %v1783_v58  ;;  %v1756_v24 = vmul.f32 %v4104_v29, %v4812_v40  ;;  %v1773_v10 = vmul.f32 %v1761_v1, %v3874_v21  ;;  %v1567_v58 = vsel %vm393_vm3, %v4804_v23, %v3999_v57 }
 0x1aa   : > { %v1292_v50 = vmul.f32 %v1280_v42, %v1208_v47  ;;  %2184 = vst.msk [vmem:[%s2795_s26 + $0x150] sm:$0xff] %vm575_vm2, %v1782_v5 }
 0x1ab   : > { %v1297_v60 = vadd.f32 %v1291_v11, %v4025_v62  ;;  %v4117_v19 = vpop.permute.xlu0 %1529  ;;  %v1768_v37 = vmul.f32 %v1756_v24, %v3784_v7  ;;  %v1762_v62 = vmul.f32 %v4124_v54, %v4837_v63  ;;  %v1779_v31 = vadd.f32 %v1773_v10, %v1767_v45 }
 0x1ac   : > { %v1298_v27 = vadd.f32 %v1292_v50, %v4019_v32  ;;  %v4109_v3 = vpop.permute.xlu1 %1531  ;;  %v1573_v50 = vsel %vm393_vm3, %v4860_v8, %v4079_v4  ;;  %v1579_v24 = vmul.f32 0.46875, %v1567_v58  ;;  %v1570_v4 = vsel %vm393_vm3, %v4811_v15, %v4032_v2 }
 0x1ad   : > { %v1552_v13 = vpop.permute.xlu2 %1551  ;;  %v1303_v32 = vmul.f32 0.5, %v1297_v60  ;;  %v1774_v36 = vmul.f32 %v1762_v62, %v3872_v9  ;;  %v1785_v42 = vmul.f32 0.5, %v1779_v31  ;;  %v4167_v60 = vmul.f32 0.53125, %v4860_v8 }
 0x1ae   : > { %v1304_v26 = vmul.f32 0.5, %v1298_v27  ;;  %v4164_v27 = vmul.f32 0.53125, %v4804_v23  ;;  %v1585_v44 = vmul.f32 0.46875, %v1573_v50  ;;  %v4178_v62 = vmul.f32 0.53125, %v3822_v20  ;;  %v4862_v50 = vld [vmem:[#allocation8_spill] sm:$0xff] }
 0x1af   : > { %2151 = vst.msk [vmem:[%s2795_s26 + $0x108] sm:$0xff] %vm575_vm2, %v1303_v32  ;;  %1901 = vrot.lane.b32.xlu2 %v3870_v39, %s2392_s16  ;;  %v1780_v49 = vadd.f32 %v1774_v36, %v1768_v37  ;;  %v1576_v36 = vsel %vm393_vm3, %v4836_v18, %v1552_v13  ;;  %v4190_v2 = vmul.f32 0.53125, %v4811_v15 }
 0x1b0   : > { %2152 = vst.msk [vmem:[%s2795_s26 + $0x110] sm:$0xff] %vm575_vm2, %v1304_v26  ;;  %1899 = vrot.lane.b32.xlu1 %v3872_v9, %s2392_s16  ;;  %1897 = vrot.lane.b32.xlu0 %v3874_v21, %s2392_s16  ;;  %v4170_v26 = vmul.f32 0.53125, %v3718_v53  ;;  %v1603_v32 = vadd.f32 %v4164_v27, %v1579_v24  ;;  %v1609_v37 = vadd.f32 %v4167_v60, %v1585_v44  ;;  %v1588_v44 = vmul.f32 0.46875, %v1576_v36 }
 0x1b1   : > { %v1786_v47 = vmul.f32 0.5, %v1780_v49  ;;  %2187 = vst.msk [vmem:[%s2795_s26 + $0x168] sm:$0xff] %vm575_vm2, %v1785_v42  ;;  %v4193_v42 = vmul.f32 0.53125, %v4836_v18 }
 0x1b2   : > { %4861 = vst [vmem:[#allocation14_spill] sm:$0xff] %v4167_v60  ;;  %v1615_v13 = vmul.f32 %v4862_v50, %v1603_v32 }
 0x1b3   : > { %v4149_v33 = vpop.permute.xlu0 %1535  ;;  %2188 = vst.msk [vmem:[%s2795_s26 + $0x170] sm:$0xff] %vm575_vm2, %v1786_v47  ;;  %v1582_v47 = vmul.f32 0.46875, %v1570_v4  ;;  %v1612_v18 = vadd.f32 %v4193_v42, %v1588_v44 }
 0x1b4   : > { %v4147_v46 = vpop.permute.xlu1 %1537 }
 0x1b5   : > { %v1654_v14 = vpop.permute.xlu2 %1653  ;;  %v1606_v4 = vadd.f32 %v4190_v2, %v1582_v47  ;;  %v1624_v47 = vmul.f32 %v3980_v16, %v1612_v18  ;;  %v4226_v18 = vmul.f32 0.53125, %v4806_v30 }
 0x1b6   : > { %v1687_v5 = vsel %vm514_vm4, %v1654_v14, %v3718_v53 }
 0x1b7   : > { %v1699_v57 = vmul.f32 0.46875, %v1687_v5  ;;  %v4863_v5 = vld [vmem:[#allocation10_spill] sm:$0xff]  ;;  %4866 = vst [vmem:[#allocation30_spill] sm:$0xff] %v4226_v18 }
 0x1b8   : > { %v1621_v24 = vmul.f32 %v4863_v5, %v1609_v37 }
 0x1b9   : > { %v1711_v49 = vadd.f32 %v1699_v57, %v4170_v26  ;;  %v4201_v57 = vmul.f32 0.53125, %v3782_v59 }
 0x1bb   : > { %v1542_v11 = vpop.permute.xlu0 %1541 }
 0x1bc   : > { %v1544_v38 = vpop.permute.xlu1 %1543 }
 0x1bd   : > { %v1660_v52 = vpop.permute.xlu2 %1659 }
 0x1be   : > { %v1690_v58 = vsel %vm514_vm4, %v1660_v52, %v3782_v59  ;;  %v4206_v52 = vmul.f32 0.53125, %v3870_v39 }
 0x1c0   : > { %4864 = vst [vmem:[#allocation54_spill] sm:$0xff] %v4206_v52 }
 0x1c3   : > { %v4186_v14 = vpop.permute.xlu0 %1547 }
 0x1c4   : > { %v4180_v45 = vpop.permute.xlu1 %1549 }
 0x1c5   : > { %v1666_v1 = vpop.permute.xlu2 %1665 }
 0x1c6   : > { %v1693_v10 = vsel %vm514_vm4, %v1666_v1, %v3822_v20  ;;  %v1723_v20 = vmul.f32 %v1711_v49, %v1615_v13 }
 0x1c7   : > { %v1705_v31 = vmul.f32 0.46875, %v1693_v10  ;;  %v1702_v10 = vmul.f32 0.46875, %v1690_v58 }
 0x1c9   : > { %v1717_v1 = vadd.f32 %v1705_v31, %v4178_v62  ;;  %v1714_v31 = vadd.f32 %v1702_v10, %v4201_v57 }
 0x1cb   : > { %v1729_v60 = vmul.f32 %v1717_v1, %v1621_v24  ;;  %v1650_v49 = vpop.permute.xlu0 %1649  ;;  %v4865_v24 = vld [vmem:[#allocation19_spill] sm:$0xff] }
 0x1cc   : > { %v1652_v37 = vpop.permute.xlu1 %1651  ;;  %v1618_v1 = vmul.f32 %v4865_v24, %v1606_v4 }
 0x1cd   : > { %v1735_v8 = vadd.f32 %v1729_v60, %v1723_v20  ;;  %v1672_v32 = vpop.permute.xlu2 %1671  ;;  %v1566_v20 = vsel %vm393_vm3, %v4805_v6, %v4109_v3  ;;  %v1565_v60 = vsel %vm393_vm3, %v4806_v30, %v4117_v19  ;;  %v1572_v19 = vsel %vm393_vm3, %v4823_v12, %v1544_v38 }
 0x1ce   : > { %v1696_v36 = vsel %vm514_vm4, %v1672_v32, %v3870_v39  ;;  %v1726_v32 = vmul.f32 %v1714_v31, %v1618_v1  ;;  %v1578_v4 = vmul.f32 0.46875, %v1566_v20  ;;  %v1571_v31 = vsel %vm393_vm3, %v4825_v56, %v1542_v11 }
 0x1cf   : > { %v1741_v13 = vmul.f32 0.5, %v1735_v8  ;;  %v1708_v58 = vmul.f32 0.46875, %v1696_v36  ;;  %v4223_v8 = vmul.f32 0.53125, %v4805_v6  ;;  %v1577_v36 = vmul.f32 0.46875, %v1565_v60 }
 0x1d0   : > { %v1686_v20 = vsel %vm514_vm4, %v1652_v37, %v4844_v0  ;;  %v4239_v60 = vmul.f32 0.53125, %v4812_v40  ;;  %v1685_v38 = vsel %vm514_vm4, %v1650_v49, %v4845_v25  ;;  %v1569_v11 = vsel %vm393_vm3, %v4812_v40, %v4147_v46 }
 0x1d1   : > { %2180 = vst.msk [vmem:[%s2795_s26 + $0x130] sm:$0xff] %vm575_vm2, %v1741_v13  ;;  %v1720_v44 = vadd.f32 %v1708_v58, %v4206_v52  ;;  %v1602_v1 = vadd.f32 %v4223_v8, %v1578_v4  ;;  %v4255_v37 = vmul.f32 0.53125, %v4825_v56  ;;  %v1583_v4 = vmul.f32 0.46875, %v1571_v31 }
 0x1d2   : > { %v1698_v49 = vmul.f32 0.46875, %v1686_v20  ;;  %v1697_v56 = vmul.f32 0.46875, %v1685_v38  ;;  %v1581_v52 = vmul.f32 0.46875, %v1569_v11  ;;  %v1568_v31 = vsel %vm393_vm3, %v4813_v61, %v4149_v33 }
 0x1d3   : > { %v1732_v10 = vmul.f32 %v1720_v44, %v1624_v47  ;;  %v1656_v13 = vpop.permute.xlu0 %1655  ;;  %v1601_v47 = vadd.f32 %v4226_v18, %v1577_v36  ;;  %v4242_v44 = vmul.f32 0.53125, %v4823_v12  ;;  %4868 = vst [vmem:[#allocation42_spill] sm:$0xff] %v4255_v37  ;;  %v4258_v36 = vmul.f32 0.53125, %v4837_v63 }
 0x1d4   : > { %v1658_v39 = vpop.permute.xlu1 %1657  ;;  %v4269_v12 = vmul.f32 0.53125, %v4845_v25  ;;  %v4287_v11 = vmul.f32 0.53125, %v3828_v51  ;;  %v1688_v25 = vsel %vm514_vm4, %v1656_v13, %v3789_v41 }
 0x1d5   : > { %v1738_v3 = vadd.f32 %v1732_v10, %v1726_v32  ;;  %v4228_v16 = vpop.permute.xlu2 %1799  ;;  %4867 = vst [vmem:[#allocation34_spill] sm:$0xff] %v4242_v44  ;;  %v1584_v32 = vmul.f32 0.46875, %v1572_v19  ;;  %v4252_v10 = vmul.f32 0.53125, %v4813_v61  ;;  %v4264_v19 = vmul.f32 0.53125, %v4844_v0 }
 0x1d6   : > { %v1613_v46 = vmul.f32 %v4053_v17, %v1601_v47  ;;  %v4278_v0 = vmul.f32 0.53125, %v3824_v43  ;;  %v1575_v47 = vsel %vm393_vm3, %v4837_v63, %v4180_v45  ;;  %v1709_v45 = vadd.f32 %v1697_v56, %v4269_v12 }
 0x1d7   : > { %v1744_v58 = vmul.f32 0.5, %v1738_v3  ;;  %v4261_v3 = vmul.f32 0.53125, %v4838_v22  ;;  %v1608_v40 = vadd.f32 %v4242_v44, %v1584_v32  ;;  %v1574_v32 = vsel %vm393_vm3, %v4838_v22, %v4186_v14 }
 0x1d8   : > { %4869 = vst [vmem:[#allocation27_spill] sm:$0xff] %v4278_v0  ;;  %v1710_v44 = vadd.f32 %v1698_v49, %v4264_v19  ;;  %v1700_v13 = vmul.f32 0.46875, %v1688_v25  ;;  %v4320_v25 = vmul.f32 0.53125, %v3874_v21 }
 0x1d9   : > { %2183 = vst.msk [vmem:[%s2795_s26 + $0x148] sm:$0xff] %vm575_vm2, %v1744_v58  ;;  %v1614_v58 = vmul.f32 %v4046_v28, %v1602_v1  ;;  %v1607_v1 = vadd.f32 %v4255_v37, %v1583_v4  ;;  %v1580_v37 = vmul.f32 0.46875, %v1568_v31  ;;  %v1620_v63 = vmul.f32 %v4064_v48, %v1608_v40 }
 0x1da   : > { %v1587_v28 = vmul.f32 0.46875, %v1575_v47  ;;  %v1605_v47 = vadd.f32 %v4239_v60, %v1581_v52 }
 0x1db   : > { %v1662_v33 = vpop.permute.xlu0 %1661  ;;  %v1619_v49 = vmul.f32 %v4067_v35, %v1607_v1  ;;  %v1722_v31 = vmul.f32 %v1710_v44, %v1614_v58 }
 0x1dc   : > { %v1664_v20 = vpop.permute.xlu1 %1663  ;;  %v1691_v4 = vsel %vm514_vm4, %v1662_v33, %v3828_v51  ;;  %v4304_v33 = vmul.f32 0.53125, %v3784_v7  ;;  %v1611_v1 = vadd.f32 %v4258_v36, %v1587_v28 }
 0x1dd   : > { %v4275_v18 = vpop.permute.xlu2 %1805  ;;  %v1692_v38 = vsel %vm514_vm4, %v1664_v20, %v3824_v43  ;;  %v1689_v20 = vsel %vm514_vm4, %v1658_v39, %v3784_v7  ;;  %v1703_v43 = vmul.f32 0.46875, %v1691_v4  ;;  %v4308_v39 = vmul.f32 0.53125, %v3789_v41 }
 0x1de   : > { %v1704_v17 = vmul.f32 0.46875, %v1692_v38  ;;  %v1586_v38 = vmul.f32 0.46875, %v1574_v32  ;;  %v1701_v51 = vmul.f32 0.46875, %v1689_v20  ;;  %v1721_v4 = vmul.f32 %v1709_v45, %v1613_v46 }
 0x1df   : > { %v1715_v56 = vadd.f32 %v1703_v43, %v4287_v11  ;;  %v1712_v20 = vadd.f32 %v1700_v13, %v4308_v39 }
 0x1e0   : > { %v1716_v14 = vadd.f32 %v1704_v17, %v4278_v0  ;;  %v1604_v17 = vadd.f32 %v4252_v10, %v1580_v37  ;;  %v4314_v0 = vmul.f32 0.53125, %v3872_v9  ;;  %v1610_v44 = vadd.f32 %v4261_v3, %v1586_v38 }
 0x1e1   : > { %v1727_v48 = vmul.f32 %v1715_v56, %v1619_v49  ;;  %v1713_v28 = vadd.f32 %v1701_v51, %v4304_v33  ;;  %v1623_v38 = vmul.f32 %v4124_v54, %v1611_v1 }
 0x1e2   : > { %v1728_v40 = vmul.f32 %v1716_v14, %v1620_v63  ;;  %v1622_v51 = vmul.f32 %v4127_v55, %v1610_v44 }
 0x1e3   : > { %v1733_v58 = vadd.f32 %v1727_v48, %v1721_v4  ;;  %v1668_v52 = vpop.permute.xlu0 %1667  ;;  %v1617_v48 = vmul.f32 %v4104_v29, %v1605_v47 }
 0x1e4   : > { %v1734_v32 = vadd.f32 %v1728_v40, %v1722_v31  ;;  %v1670_v43 = vpop.permute.xlu1 %1669  ;;  %v1694_v45 = vsel %vm514_vm4, %v1668_v52, %v3874_v21  ;;  %v1616_v31 = vmul.f32 %v4114_v34, %v1604_v17 }
 0x1e5   : > { %v1812_v35 = vpop.permute.xlu2 %1811  ;;  %v1695_v63 = vsel %vm514_vm4, %v1670_v43, %v3872_v9  ;;  %v1739_v14 = vmul.f32 0.5, %v1733_v58  ;;  %v1706_v49 = vmul.f32 0.46875, %v1694_v45  ;;  %v1725_v4 = vmul.f32 %v1713_v28, %v1617_v48 }
 0x1e6   : > { %v1740_v37 = vmul.f32 0.5, %v1734_v32  ;;  %v1707_v46 = vmul.f32 0.46875, %v1695_v63  ;;  %v1724_v32 = vmul.f32 %v1712_v20, %v1616_v31  ;;  %v1833_v63 = vsel %vm514_vm4, %v4228_v16, %v4804_v23 }
 0x1e7   : > { %2178 = vst.msk [vmem:[%s2795_s26 + $0x120] sm:$0xff] %vm575_vm2, %v1739_v14  ;;  %v1718_v40 = vadd.f32 %v1706_v49, %v4320_v25  ;;  %v1836_v14 = vsel %vm514_vm4, %v4275_v18, %v4811_v15 }
 0x1e8   : > { %2179 = vst.msk [vmem:[%s2795_s26 + $0x128] sm:$0xff] %vm575_vm2, %v1740_v37  ;;  %v1719_v56 = vadd.f32 %v1707_v46, %v4314_v0  ;;  %v1845_v46 = vmul.f32 0.46875, %v1833_v63 }
 0x1e9   : > { %v1730_v47 = vmul.f32 %v1718_v40, %v1622_v51 }
 0x1ea   : > { %v1731_v13 = vmul.f32 %v1719_v56, %v1623_v38  ;;  %v1857_v28 = vadd.f32 %v1845_v46, %v4164_v27  ;;  %v1848_v38 = vmul.f32 0.46875, %v1836_v14  ;;  %v4873_v46 = vld [vmem:[#allocation57_spill] sm:$0xff] }
 0x1eb   : > { %v1736_v17 = vadd.f32 %v1730_v47, %v1724_v32  ;;  %v1796_v52 = vpop.permute.xlu0 %1795 }
 0x1ec   : > { %v1737_v43 = vadd.f32 %v1731_v13, %v1725_v4  ;;  %v1798_v58 = vpop.permute.xlu1 %1797  ;;  %v1869_v48 = vmul.f32 %v4862_v50, %v1857_v28  ;;  %v1860_v51 = vadd.f32 %v1848_v38, %v4190_v2  ;;  %v4870_v4 = vld [vmem:[#allocation21_spill] sm:$0xff] }
 0x1ed   : > { %v1818_v1 = vpop.permute.xlu2 %1817  ;;  %v1742_v37 = vmul.f32 0.5, %v1736_v17  ;;  %v1839_v13 = vsel %vm514_vm4, %v1812_v35, %v4870_v4  ;;  %v4872_v17 = vld [vmem:[#allocation52_spill] sm:$0xff]  ;;  %v1832_v35 = vsel %vm514_vm4, %v1798_v58, %v4805_v6  ;;  %v4874_v58 = vld [vmem:[#allocation30_spill] sm:$0xff] }
 0x1ee   : > { %v1743_v44 = vmul.f32 0.5, %v1737_v43  ;;  %v1872_v32 = vmul.f32 %v4865_v24, %v1860_v51  ;;  %v1851_v47 = vmul.f32 0.46875, %v1839_v13  ;;  %v1842_v2 = vsel %vm514_vm4, %v1818_v1, %v4872_v17  ;;  %v4876_v13 = vld [vmem:[#allocation60_spill] sm:$0xff] }
 0x1ef   : > { %2181 = vst.msk [vmem:[%s2795_s26 + $0x138] sm:$0xff] %vm575_vm2, %v1742_v37 }
 0x1f0   : > { %2182 = vst.msk [vmem:[%s2795_s26 + $0x140] sm:$0xff] %vm575_vm2, %v1743_v44 }
 0x1f3   : > { %v1802_v16 = vpop.permute.xlu0 %1801 }
 0x1f4   : > { %v1804_v20 = vpop.permute.xlu1 %1803 }
 0x1f5   : > { %v1884_v45 = vpop.permute.xlu2 %1883 }
 0x1f6   : > { %v1917_v23 = vsel %vm393_vm3, %v3718_v53, %v1884_v45  ;;  %v1854_v45 = vmul.f32 0.46875, %v1842_v2 }
 0x1f7   : > { %v1929_v49 = vmul.f32 0.46875, %v1917_v23  ;;  %v1844_v23 = vmul.f32 0.46875, %v1832_v35 }
 0x1f8   : > { %v1866_v38 = vadd.f32 %v1854_v45, %v4193_v42 }
 0x1f9   : > { %v1941_v56 = vadd.f32 %v1929_v49, %v4170_v26  ;;  %v4871_v26 = vld [vmem:[#allocation14_spill] sm:$0xff]  ;;  %v1856_v6 = vadd.f32 %v1844_v23, %v4223_v8 }
 0x1fa   : > { %v1863_v63 = vadd.f32 %v1851_v47, %v4871_v26  ;;  %v4879_v26 = vld [vmem:[#allocation11_spill] sm:$0xff] }
 0x1fb   : > { %v1953_v31 = vmul.f32 %v1941_v56, %v1869_v48  ;;  %v1808_v18 = vpop.permute.xlu0 %1807 }
 0x1fc   : > { %v1810_v40 = vpop.permute.xlu1 %1809  ;;  %v1875_v14 = vmul.f32 %v4863_v5, %v1863_v63  ;;  %v1834_v5 = vsel %vm514_vm4, %v1802_v16, %v4813_v61  ;;  %v1878_v63 = vmul.f32 %v4879_v26, %v1866_v38  ;;  %v4881_v61 = vld [vmem:[#allocation54_spill] sm:$0xff] }
 0x1fd   : > { %v1890_v27 = vpop.permute.xlu2 %1889 }
 0x1fe   : > { %v1920_v15 = vsel %vm393_vm3, %v3782_v59, %v1890_v27  ;;  %v1831_v59 = vsel %vm514_vm4, %v1796_v52, %v4806_v30  ;;  %v4875_v27 = vld [vmem:[#allocation40_spill] sm:$0xff] }
 0x1ff   : > { %v1932_v53 = vmul.f32 0.46875, %v1920_v15  ;;  %v1843_v1 = vmul.f32 0.46875, %v1831_v59  ;;  %v1835_v4 = vsel %vm514_vm4, %v1804_v20, %v4875_v27  ;;  %v4877_v15 = vld [vmem:[#allocation38_spill] sm:$0xff]  ;;  %v4880_v20 = vld [vmem:[#allocation45_spill] sm:$0xff] }
 0x200   : > { %v1868_v2 = vmul.f32 %v4880_v20, %v1856_v6  ;;  %v4882_v59 = vld [vmem:[#allocation46_spill] sm:$0xff]  ;;  %v4883_v6 = vld [vmem:[#allocation23_spill] sm:$0xff] }
 0x201   : > { %v1944_v50 = vadd.f32 %v1932_v53, %v4201_v57  ;;  %v1855_v30 = vadd.f32 %v1843_v1, %v4874_v58  ;;  %v1838_v58 = vsel %vm514_vm4, %v1810_v40, %v4883_v6 }
 0x203   : > { %v1956_v43 = vmul.f32 %v1944_v50, %v1872_v32  ;;  %v4369_v28 = vpop.permute.xlu0 %1813 }
 0x204   : > { %v4361_v37 = vpop.permute.xlu1 %1815 }
 0x205   : > { %v1896_v44 = vpop.permute.xlu2 %1895 }
 0x206   : > { %v1923_v24 = vsel %vm393_vm3, %v4873_v46, %v1896_v44  ;;  %v1847_v44 = vmul.f32 0.46875, %v1835_v4  ;;  %v1867_v46 = vmul.f32 %v4882_v59, %v1855_v30  ;;  %v1850_v4 = vmul.f32 0.46875, %v1838_v58 }
 0x207   : > { %v1935_v57 = vmul.f32 0.46875, %v1923_v24  ;;  %v1846_v24 = vmul.f32 0.46875, %v1834_v5 }
 0x208   : > { %v1859_v1 = vadd.f32 %v1847_v44, %v4239_v60 }
 0x209   : > { %v1947_v49 = vadd.f32 %v1935_v57, %v4178_v62  ;;  %v1858_v38 = vadd.f32 %v1846_v24, %v4252_v10 }
 0x20b   : > { %v1959_v48 = vmul.f32 %v1947_v49, %v1875_v14  ;;  %v1880_v53 = vpop.permute.xlu0 %1879  ;;  %v1870_v40 = vmul.f32 %v4114_v34, %v1858_v38  ;;  %v1840_v34 = vsel %vm514_vm4, %v4369_v28, %v4838_v22 }
 0x20c   : > { %v1882_v51 = vpop.permute.xlu1 %1881 }
 0x20d   : > { %v1965_v52 = vadd.f32 %v1959_v48, %v1953_v31  ;;  %v1902_v56 = vpop.permute.xlu2 %1901  ;;  %v1916_v42 = vsel %vm393_vm3, %v4877_v15, %v1882_v51  ;;  %v4878_v31 = vld [vmem:[#allocation28_spill] sm:$0xff] }
 0x20e   : > { %v1926_v62 = vsel %vm393_vm3, %v4876_v13, %v1902_v56  ;;  %v1928_v47 = vmul.f32 0.46875, %v1916_v42  ;;  %v1915_v50 = vsel %vm393_vm3, %v4878_v31, %v1880_v53  ;;  %v4886_v53 = vld [vmem:[#allocation42_spill] sm:$0xff]  ;;  %v4889_v31 = vld [vmem:[#allocation59_spill] sm:$0xff] }
 0x20f   : > { %v1971_v8 = vmul.f32 0.5, %v1965_v52  ;;  %v1938_v32 = vmul.f32 0.46875, %v1926_v62  ;;  %v1927_v17 = vmul.f32 0.46875, %v1915_v50  ;;  %v4884_v52 = vld [vmem:[#allocation24_spill] sm:$0xff]  ;;  %v4885_v62 = vld [vmem:[#allocation34_spill] sm:$0xff] }
 0x210   : > { %v1940_v35 = vadd.f32 %v1928_v47, %v4264_v19  ;;  %v1862_v15 = vadd.f32 %v1850_v4, %v4885_v62 }
 0x211   : > { %2192 = vst.msk [vmem:[%s2795_s26 + $0x190] sm:$0xff] %vm575_vm2, %v1971_v8  ;;  %v1950_v16 = vadd.f32 %v1938_v32, %v4881_v61  ;;  %v1939_v57 = vadd.f32 %v1927_v17, %v4269_v12  ;;  %v1837_v12 = vsel %vm514_vm4, %v1808_v18, %v4884_v52  ;;  %v4887_v8 = vld [vmem:[#allocation25_spill] sm:$0xff]  ;;  %v4888_v32 = vld [vmem:[#allocation58_spill] sm:$0xff] }
 0x212   : > { %v1952_v14 = vmul.f32 %v1940_v35, %v1868_v2  ;;  %v4891_v2 = vld [vmem:[#allocation27_spill] sm:$0xff] }
 0x213   : > { %v1962_v45 = vmul.f32 %v1950_v16, %v1878_v63  ;;  %v1951_v23 = vmul.f32 %v1939_v57, %v1867_v46  ;;  %v1886_v30 = vpop.permute.xlu0 %1885  ;;  %v4890_v63 = vld [vmem:[#allocation12_spill] sm:$0xff]  ;;  %v1852_v16 = vmul.f32 0.46875, %v1840_v34 }
 0x214   : > { %v1888_v48 = vpop.permute.xlu1 %1887  ;;  %v1918_v27 = vsel %vm393_vm3, %v3789_v41, %v1886_v30  ;;  %v1874_v17 = vmul.f32 %v4890_v63, %v1862_v15 }
 0x215   : > { %v1968_v49 = vadd.f32 %v1962_v45, %v1956_v43  ;;  %v1919_v19 = vsel %vm393_vm3, %v3784_v7, %v1888_v48  ;;  %v1930_v60 = vmul.f32 0.46875, %v1918_v27  ;;  %v1871_v43 = vmul.f32 %v4104_v29, %v1859_v1 }
 0x216   : > { %v1931_v51 = vmul.f32 0.46875, %v1919_v19  ;;  %v1849_v7 = vmul.f32 0.46875, %v1837_v12  ;;  %v1841_v29 = vsel %vm514_vm4, %v4361_v37, %v4887_v8  ;;  %v4892_v37 = vld [vmem:[#allocation47_spill] sm:$0xff]  ;;  %v1864_v57 = vadd.f32 %v1852_v16, %v4261_v3 }
 0x217   : > { %v1974_v56 = vmul.f32 0.5, %v1968_v49  ;;  %v1942_v5 = vadd.f32 %v1930_v60, %v4308_v39  ;;  %v1853_v20 = vmul.f32 0.46875, %v1841_v29 }
 0x218   : > { %v1943_v10 = vadd.f32 %v1931_v51, %v4304_v33  ;;  %v1861_v41 = vadd.f32 %v1849_v7, %v4886_v53 }
 0x219   : > { %2195 = vst.msk [vmem:[%s2795_s26 + $0x1a8] sm:$0xff] %vm575_vm2, %v1974_v56  ;;  %v1954_v18 = vmul.f32 %v1942_v5, %v1870_v40  ;;  %v1865_v22 = vadd.f32 %v1853_v20, %v4258_v36 }
 0x21a   : > { %v1955_v13 = vmul.f32 %v1943_v10, %v1871_v43  ;;  %v1873_v61 = vmul.f32 %v4892_v37, %v1861_v41 }
 0x21b   : > { %v1892_v33 = vpop.permute.xlu0 %1891  ;;  %v1877_v36 = vmul.f32 %v4124_v54, %v1865_v22 }
 0x21c   : > { %v1894_v42 = vpop.permute.xlu1 %1893  ;;  %v1921_v50 = vsel %vm393_vm3, %v4889_v31, %v1892_v33 }
 0x21d   : > { %v1922_v47 = vsel %vm393_vm3, %v4888_v32, %v1894_v42  ;;  %v1933_v26 = vmul.f32 0.46875, %v1921_v50 }
 0x21e   : > { %v1934_v39 = vmul.f32 0.46875, %v1922_v47 }
 0x21f   : > { %v1945_v35 = vadd.f32 %v1933_v26, %v4287_v11 }
 0x220   : > { %v1946_v44 = vadd.f32 %v1934_v39, %v4891_v2 }
 0x221   : > { %v1957_v46 = vmul.f32 %v1945_v35, %v1873_v61 }
 0x222   : > { %v1958_v59 = vmul.f32 %v1946_v44, %v1874_v17 }
 0x223   : > { %v1963_v45 = vadd.f32 %v1957_v46, %v1951_v23  ;;  %v1898_v49 = vpop.permute.xlu0 %1897 }
 0x224   : > { %v1964_v28 = vadd.f32 %v1958_v59, %v1952_v14  ;;  %v1900_v24 = vpop.permute.xlu1 %1899  ;;  %v1924_v11 = vsel %vm393_vm3, %v3874_v21, %v1898_v49 }
 0x225   : > { %v1925_v1 = vsel %vm393_vm3, %v3872_v9, %v1900_v24  ;;  %v1969_v6 = vmul.f32 0.5, %v1963_v45  ;;  %v1936_v58 = vmul.f32 0.46875, %v1924_v11  ;;  %v1876_v9 = vmul.f32 %v4127_v55, %v1864_v57 }
 0x226   : > { %v1970_v48 = vmul.f32 0.5, %v1964_v28  ;;  %v1937_v38 = vmul.f32 0.46875, %v1925_v1 }
 0x227   : > { %2190 = vst.msk [vmem:[%s2795_s26 + $0x180] sm:$0xff] %vm575_vm2, %v1969_v6  ;;  %v1948_v21 = vadd.f32 %v1936_v58, %v4320_v25 }
 0x228   : > { %2191 = vst.msk [vmem:[%s2795_s26 + $0x188] sm:$0xff] %vm575_vm2, %v1970_v48  ;;  %v1949_v3 = vadd.f32 %v1937_v38, %v4314_v0 }
 0x229   : > { %v1960_v23 = vmul.f32 %v1948_v21, %v1876_v9 }
 0x22a   : > { %v1961_v14 = vmul.f32 %v1949_v3, %v1877_v36 }
 0x22b   : > { %v1966_v19 = vadd.f32 %v1960_v23, %v1954_v18 }
 0x22c   : > { %v1967_v54 = vadd.f32 %v1961_v14, %v1955_v13 }
 0x22d   : > { %v1972_v30 = vmul.f32 0.5, %v1966_v19 }
 0x22e   : > { %v1973_v0 = vmul.f32 0.5, %v1967_v54 }
 0x22f   : > { %2193 = vst.msk [vmem:[%s2795_s26 + $0x198] sm:$0xff] %vm575_vm2, %v1972_v30 }
 0x230   : > { %2194 = vst.msk [vmem:[%s2795_s26 + $0x1a0] sm:$0xff] %vm575_vm2, %v1973_v0 }
 0x231   : > { %2349 = shalt.err (!%p2346_p7)
}
 0x232   : > { %s2394_s20 = smov 128   ;;  %s2395_s22 = smov 8  }
 0x233   : > { %2206 = dma.vmem_to_hbm [thread:$0]  (%p2452_p11), %s1996_s30, 6912, %s1998_s2, %s1983_s3, %s2394_s20, %s2394_s20, %s2395_s22  }
 0x234 PF: > { %s2012_s23 = sand.u32 1, %s2376_s6   ;;  %p2213_p8 = pnand %p2073_p9, %p2456_p12 }
 0x235   : > { %s2013_s16 = scalar_lea.sflag [#allocation4], %s2012_s23 }
 0x236   : > { %p2214_p10 = pneg %p2213_p8 }
 0x238   : > { %2371 = dma.done.wait (%p2214_p10), %s2013_s16, 6912  }
 0x239   : > { %2373 = vsyncadd (%p2214_p10), %s2013_s16, 4294960384  ;;  %p14_p0 = scmp.ge.s32.totalorder %s2431_s12, 4   ;;  %s4893_s6 = smov %s2380_s7 }
 0x23a   : > { %s4894_s7 = smov %s2384_s8  ;;  %s4895_s8 = smov %s2443_s15 }
 0x23b   : > { %s4896_s9 = smov %s2431_s12  ;;  %16 = sbr.rel (!%p14_p0) target bundleno = 5 (0x5), region = 79 }
 0x240   :  { %2019 = vsyncpa [#allocation3], 1 }
 0x241   :  { %2021 = vsyncpa [#allocation3 + $0x1], 1 }
 0x242   :  { %2022 = vsyncpa [#allocation4], 1 }
 0x243   :  { %2024 = vsyncpa [#allocation4 + $0x1], 1 }

</bundles_post_ra>
